<compile_context>
chip_gen: v7x
topology: tpu7x:2x2x1
jax: 0.10.0
libtpu: 0.0.40
codegen_flags: <defaults>
</compile_context>

<pallas_src>
import functools

import jax
import jax.numpy as jnp
from jax.experimental import pallas as pl
from jax.experimental.pallas import tpu as pltpu

MODEL_DIM = 20
NUM_HEADS = 10
HEAD_DIM = MODEL_DIM // NUM_HEADS           # = 2
PATCH = 4
PATCH_DEPTH = PATCH * PATCH * 1             # in_channels = 1
NUM_CLASS = 10
FFN_DIM = 2048                              # nn.TransformerEncoderLayer default
NUM_LAYERS = 6
MAX_NUM_TOKEN = 220
LN_EPS = 1e-5
FF_CHUNK = 512                              # lane-aligned FFN hidden chunk
ATTN_SCALE = HEAD_DIM ** -0.5


def _layernorm(z, gamma, beta):
    """PyTorch LayerNorm over last dim: biased variance, eps inside sqrt."""
    mean = jnp.mean(z, axis=-1, keepdims=True)
    zc = z - mean
    var = jnp.mean(zc * zc, axis=-1, keepdims=True)
    return zc * jax.lax.rsqrt(var + LN_EPS) * gamma + beta


# -----------------------------------------------------------------------------
# Single fused kernel: grid axis = encoder layer index (sequential).
#  * step 0   : patch-embed matmul + [cls | patches] + positional table -> x_s
#  * each step: one full TransformerEncoderLayer (attention over axis L,
#               head_dim=2 handled with a block-diagonal head-mask matmul so
#               every contraction stays an MXU-friendly (N,E)@(E,*) matmul).
#  * last step: classification head on the cls-token rows -> logits.
# Activations (x / q / k / v) persist across grid steps in VMEM scratch.
# -----------------------------------------------------------------------------
def _fused_vit_kernel(
    patches_ref, patch_w_ref, cls_ref, pos_ref, hm_ref, hmt_ref,
    w_q_ref, b_q_ref, w_k_ref, b_k_ref, w_v_ref, b_v_ref,
    w_o_ref, b_o_ref, ln1_g_ref, ln1_b_ref,
    w_ff1_ref, b_ff1_ref, w_ff2_ref, b_ff2_ref, ln2_g_ref, ln2_b_ref,
    head_w_ref, head_b_ref,
    logits_ref,
    x_s, q_s, k_s, v_s,
    *, num_img, num_tok):
    li = pl.program_id(0)
    L, N = num_img, num_tok
    P = N - 1                                   # patches per image

    # ---- layer-0 prologue: patch embedding + cls token + positional table ----
    @pl.when(li == 0)
    def _init():
        pe = jnp.dot(patches_ref[...], patch_w_ref[...],
                     preferred_element_type=jnp.float32)       # (L*P, E)
        pos = pos_ref[...]                                      # (N, E)
        cls = cls_ref[...]                                      # (L, E)
        for l in range(L):
            x_s[l, 0:1, :] = cls[l:l + 1, :] + pos[0:1, :]
            x_s[l, 1:N, :] = pe[l * P:(l + 1) * P, :] + pos[1:N, :]

    # ---- current layer weights (per-layer VMEM blocks) ----
    w_q = w_q_ref[0]; b_q = b_q_ref[0]
    w_k = w_k_ref[0]; b_k = b_k_ref[0]
    w_v = w_v_ref[0]; b_v = b_v_ref[0]
    w_o = w_o_ref[0]; b_o = b_o_ref[0]
    g1 = ln1_g_ref[0]; be1 = ln1_b_ref[0]
    g2 = ln2_g_ref[0]; be2 = ln2_b_ref[0]
    b_ff2 = b_ff2_ref[0]
    hm = hm_ref[...]                           # (E, H): block-diag head mask
    hmt = hmt_ref[...]                         # (H, E)

    # ---- QKV projection (1/sqrt(head_dim) folded into Q once) ----
    for l in range(L):
        xl = x_s[l]                                             # (N, E)
        q_s[l] = (jnp.dot(xl, w_q, preferred_element_type=jnp.float32) + b_q) * ATTN_SCALE
        k_s[l] = jnp.dot(xl, w_k, preferred_element_type=jnp.float32) + b_k
        v_s[l] = jnp.dot(xl, w_v, preferred_element_type=jnp.float32) + b_v

    # ---- attention over axis L + out-proj + LN1 + FFN + LN2 (per row l1) ----
    # TODO(synk): loops are unrolled over L (= image batch); fine for small L,
    # would need a fori_loop/online-softmax rewrite for large L.
    for l1 in range(L):
        q1 = q_s[l1]                                            # (N, E)
        scores = [jnp.dot(q1 * k_s[l2], hm, preferred_element_type=jnp.float32)
                  for l2 in range(L)]                           # each (N, H)
        mx = scores[0]
        for s in scores[1:]:
            mx = jnp.maximum(mx, s)
        exps = [jnp.exp(s - mx) for s in scores]
        den = exps[0]
        for e in exps[1:]:
            den = den + e
        inv = pl.reciprocal(den, approx=True)                   # EUP
        ctx = None
        for l2 in range(L):
            p_full = jnp.dot(exps[l2] * inv, hmt,
                             preferred_element_type=jnp.float32)  # (N, E)
            term = p_full * v_s[l2]
            ctx = term if ctx is None else ctx + term
        # out-projection + residual + LN1 (fused epilogue)
        proj = jnp.dot(ctx, w_o, preferred_element_type=jnp.float32) + b_o
        h = _layernorm(x_s[l1] + proj, g1, be1)
        # FFN in lane-aligned 512-wide chunks; relu; residual + LN2 epilogue
        acc = None
        for c in range(FFN_DIM // FF_CHUNK):
            lo, hi = c * FF_CHUNK, (c + 1) * FF_CHUNK
            w1c = w_ff1_ref[0, :, lo:hi]                        # (E, FF_CHUNK)
            b1c = b_ff1_ref[0, :, lo:hi]                        # (1, FF_CHUNK)
            hc = jnp.maximum(
                jnp.dot(h, w1c, preferred_element_type=jnp.float32) + b1c, 0.0)
            w2c = w_ff2_ref[0, lo:hi, :]                        # (FF_CHUNK, E)
            part = jnp.dot(hc, w2c, preferred_element_type=jnp.float32)
            acc = part if acc is None else acc + part
        ff = acc + b_ff2
        x_s[l1] = _layernorm(h + ff, g2, be2)

    # ---- classification head on cls-token rows (last layer only) ----
    @pl.when(li == NUM_LAYERS - 1)
    def _head():
        hw = head_w_ref[...]                                    # (E, C)
        hb = head_b_ref[...]                                    # (1, C)
        for l in range(L):
            cls_row = x_s[l, 0:1, :]                            # (1, E)
            logits_ref[l:l + 1, :] = (
                jnp.dot(cls_row, hw, preferred_element_type=jnp.float32) + hb)


# -----------------------------------------------------------------------------
# Parameters (deterministic, synthetic).  Per-layer encoder weights are stacked
# along a leading layer axis so the kernel's BlockSpec can index them per grid
# step; biases / LN params are (NL, 1, D) so the last two block dims match the
# full array dims (TPU tiling rule).
# -----------------------------------------------------------------------------
def init_params(key, batch_size):
    keys = jax.random.split(key, 6)
    lk = jax.random.split(keys[5], 12)

    def nrm(k, shape, scale=1.0):
        return scale * jax.random.normal(k, shape, jnp.float32)

    E, F, NL = MODEL_DIM, FFN_DIM, NUM_LAYERS
    params = {
        'patch_weight': nrm(keys[0], (PATCH_DEPTH, E)),
        'pos_table': nrm(keys[1], (MAX_NUM_TOKEN, E)),
        'cls_token': nrm(keys[2], (batch_size, 1, E)),
        'head_w': nrm(keys[3], (E, NUM_CLASS), E ** -0.5),
        'head_b': nrm(keys[4], (1, NUM_CLASS), 0.02),
        'head_mask': (jnp.arange(E)[:, None] // HEAD_DIM
                      == jnp.arange(NUM_HEADS)[None, :]).astype(jnp.float32),
        'w_q': nrm(lk[0], (NL, E, E), E ** -0.5),
        'b_q': nrm(lk[1], (NL, 1, E), 0.02),
        'w_k': nrm(lk[2], (NL, E, E), E ** -0.5),
        'b_k': nrm(lk[3], (NL, 1, E), 0.02),
        'w_v': nrm(lk[4], (NL, E, E), E ** -0.5),
        'b_v': nrm(lk[5], (NL, 1, E), 0.02),
        'w_o': nrm(lk[6], (NL, E, E), E ** -0.5),
        'b_o': nrm(lk[7], (NL, 1, E), 0.02),
        'w_ff1': nrm(lk[8], (NL, E, F), E ** -0.5),
        'b_ff1': nrm(lk[9], (NL, 1, F), 0.02),
        'w_ff2': nrm(lk[10], (NL, F, E), F ** -0.5),
        'b_ff2': nrm(lk[11], (NL, 1, E), 0.02),
        'ln1_g': jnp.ones((NL, 1, E), jnp.float32),
        'ln1_b': jnp.zeros((NL, 1, E), jnp.float32),
        'ln2_g': jnp.ones((NL, 1, E), jnp.float32),
        'ln2_b': jnp.zeros((NL, 1, E), jnp.float32),
    }
    params['head_mask_t'] = params['head_mask'].T
    return params


# -----------------------------------------------------------------------------
# MiniModel.forward (inference path; label=None so the NLLLoss branch is skipped)
# -----------------------------------------------------------------------------
@jax.jit
def mini_model_forward(image, params):
    B, C, H, W = image.shape
    gh, gw = H // PATCH, W // PATCH
    num_patches = gh * gw
    S = num_patches + 1
    E, F = MODEL_DIM, FFN_DIM

    # image2emb_conv: stride-4 conv == non-overlapping patch extraction (layout
    # plumbing stays in the wrapper; the matmul itself happens inside the kernel).
    patches = image.reshape(B, C, gh, PATCH, gw, PATCH)
    patches = patches.transpose(0, 2, 4, 1, 3, 5).reshape(
        B * num_patches, C * PATCH * PATCH)
    pos = params['pos_table'][:S]
    cls = params['cls_token'].reshape(B, E)

    const2 = lambda shape: pl.BlockSpec(shape, lambda li: (0, 0))
    per_layer_mat = lambda d1, d2: pl.BlockSpec((1, d1, d2), lambda li: (li, 0, 0))
    per_layer_vec = lambda d: pl.BlockSpec((1, 1, d), lambda li: (li, 0, 0))

    in_specs = [
        const2((B * num_patches, PATCH_DEPTH)),     # patches
        const2((PATCH_DEPTH, E)),                   # patch_weight
        const2((B, E)),                             # cls token
        const2((S, E)),                             # positional table slice
        const2((E, NUM_HEADS)),                     # head_mask
        const2((NUM_HEADS, E)),                     # head_mask_t
        per_layer_mat(E, E), per_layer_vec(E),      # w_q, b_q
        per_layer_mat(E, E), per_layer_vec(E),      # w_k, b_k
        per_layer_mat(E, E), per_layer_vec(E),      # w_v, b_v
        per_layer_mat(E, E), per_layer_vec(E),      # w_o, b_o
        per_layer_vec(E), per_layer_vec(E),         # ln1_g, ln1_b
        per_layer_mat(E, F), per_layer_vec(F),      # w_ff1, b_ff1
        per_layer_mat(F, E), per_layer_vec(E),      # w_ff2, b_ff2
        per_layer_vec(E), per_layer_vec(E),         # ln2_g, ln2_b
        const2((E, NUM_CLASS)),                     # head_w
        const2((1, NUM_CLASS)),                     # head_b
    ]

    kern = functools.partial(_fused_vit_kernel, num_img=B, num_tok=S)

    logits = pl.pallas_call(
        kern,
        grid=(NUM_LAYERS,),
        in_specs=in_specs,
        out_specs=pl.BlockSpec((B, NUM_CLASS), lambda li: (0, 0)),
        out_shape=jax.ShapeDtypeStruct((B, NUM_CLASS), jnp.float32),
        scratch_shapes=[
            pltpu.VMEM((B, S, E), jnp.float32),   # x  (layer activation)
            pltpu.VMEM((B, S, E), jnp.float32),   # q (pre-scaled)
            pltpu.VMEM((B, S, E), jnp.float32),   # k
            pltpu.VMEM((B, S, E), jnp.float32),   # v
        ],
        compiler_params=pltpu.CompilerParams(
            dimension_semantics=("arbitrary",)),   # layer axis carries state
    )(
        patches, params['patch_weight'], cls, pos,
        params['head_mask'], params['head_mask_t'],
        params['w_q'], params['b_q'], params['w_k'], params['b_k'],
        params['w_v'], params['b_v'], params['w_o'], params['b_o'],
        params['ln1_g'], params['ln1_b'],
        params['w_ff1'], params['b_ff1'], params['w_ff2'], params['b_ff2'],
        params['ln2_g'], params['ln2_b'],
        params['head_w'], params['head_b'],
    )
    return {'prediction': logits}


if __name__ == "__main__":
    B = 2
    IMG = 16      # 16x16 image, patch 4 -> 4x4 = 16 patches -> 17 tokens
    key = jax.random.PRNGKey(0)
    k_img, k_par = jax.random.split(key)
    image = jax.random.normal(k_img, (B, 1, IMG, IMG), jnp.float32)
    params = init_params(k_par, B)
    out = mini_model_forward(image, params)
    pred = jax.block_until_ready(out['prediction'])
    assert pred.shape == (B, NUM_CLASS)
    assert bool(jnp.all(jnp.isfinite(pred)))
    print("KERNEL_OK")
</pallas_src>

<mosaic_0001>
module attributes {stable_mosaic.version = 11 : i64} {
  func.func @_fused_vit_kernel(%arg0: i32, %arg1: memref<32x16xf32, #tpu.memory_space<vmem>>, %arg2: memref<16x20xf32, #tpu.memory_space<vmem>>, %arg3: memref<2x20xf32, #tpu.memory_space<vmem>>, %arg4: memref<17x20xf32, #tpu.memory_space<vmem>>, %arg5: memref<20x10xf32, #tpu.memory_space<vmem>>, %arg6: memref<10x20xf32, #tpu.memory_space<vmem>>, %arg7: memref<1x20x20xf32, #tpu.memory_space<vmem>>, %arg8: memref<1x1x20xf32, #tpu.memory_space<vmem>>, %arg9: memref<1x20x20xf32, #tpu.memory_space<vmem>>, %arg10: memref<1x1x20xf32, #tpu.memory_space<vmem>>, %arg11: memref<1x20x20xf32, #tpu.memory_space<vmem>>, %arg12: memref<1x1x20xf32, #tpu.memory_space<vmem>>, %arg13: memref<1x20x20xf32, #tpu.memory_space<vmem>>, %arg14: memref<1x1x20xf32, #tpu.memory_space<vmem>>, %arg15: memref<1x1x20xf32, #tpu.memory_space<vmem>>, %arg16: memref<1x1x20xf32, #tpu.memory_space<vmem>>, %arg17: memref<1x20x2048xf32, #tpu.memory_space<vmem>>, %arg18: memref<1x1x2048xf32, #tpu.memory_space<vmem>>, %arg19: memref<1x2048x20xf32, #tpu.memory_space<vmem>>, %arg20: memref<1x1x20xf32, #tpu.memory_space<vmem>>, %arg21: memref<1x1x20xf32, #tpu.memory_space<vmem>>, %arg22: memref<1x1x20xf32, #tpu.memory_space<vmem>>, %arg23: memref<20x10xf32, #tpu.memory_space<vmem>>, %arg24: memref<1x10xf32, #tpu.memory_space<vmem>>, %arg25: memref<2x10xf32, #tpu.memory_space<vmem>>, %arg26: memref<2x17x20xf32, #tpu.memory_space<vmem>>, %arg27: memref<2x17x20xf32, #tpu.memory_space<vmem>>, %arg28: memref<2x17x20xf32, #tpu.memory_space<vmem>>, %arg29: memref<2x17x20xf32, #tpu.memory_space<vmem>>) attributes {dimension_semantics = [#tpu.dimension_semantics<arbitrary>], iteration_bounds = array<i64: 6>, scalar_prefetch = 0 : i64, scratch_operands = 4 : i64, tpu.core_type = #tpu.core_type<tc>, window_params = [{pipeline_mode = #tpu.pipeline_mode<synchronous>, transform_indices = @transform_0, window_bounds = array<i64: 32, 16>}, {pipeline_mode = #tpu.pipeline_mode<synchronous>, transform_indices = @transform_1, window_bounds = array<i64: 16, 20>}, {pipeline_mode = #tpu.pipeline_mode<synchronous>, transform_indices = @transform_2, window_bounds = array<i64: 2, 20>}, {pipeline_mode = #tpu.pipeline_mode<synchronous>, transform_indices = @transform_3, window_bounds = array<i64: 17, 20>}, {pipeline_mode = #tpu.pipeline_mode<synchronous>, transform_indices = @transform_4, window_bounds = array<i64: 20, 10>}, {pipeline_mode = #tpu.pipeline_mode<synchronous>, transform_indices = @transform_5, window_bounds = array<i64: 10, 20>}, {transform_indices = @transform_6, window_bounds = array<i64: 1, 20, 20>}, {transform_indices = @transform_7, window_bounds = array<i64: 1, 1, 20>}, {transform_indices = @transform_8, window_bounds = array<i64: 1, 20, 20>}, {transform_indices = @transform_9, window_bounds = array<i64: 1, 1, 20>}, {transform_indices = @transform_10, window_bounds = array<i64: 1, 20, 20>}, {transform_indices = @transform_11, window_bounds = array<i64: 1, 1, 20>}, {transform_indices = @transform_12, window_bounds = array<i64: 1, 20, 20>}, {transform_indices = @transform_13, window_bounds = array<i64: 1, 1, 20>}, {transform_indices = @transform_14, window_bounds = array<i64: 1, 1, 20>}, {transform_indices = @transform_15, window_bounds = array<i64: 1, 1, 20>}, {transform_indices = @transform_16, window_bounds = array<i64: 1, 20, 2048>}, {transform_indices = @transform_17, window_bounds = array<i64: 1, 1, 2048>}, {transform_indices = @transform_18, window_bounds = array<i64: 1, 2048, 20>}, {transform_indices = @transform_19, window_bounds = array<i64: 1, 1, 20>}, {transform_indices = @transform_20, window_bounds = array<i64: 1, 1, 20>}, {transform_indices = @transform_21, window_bounds = array<i64: 1, 1, 20>}, {pipeline_mode = #tpu.pipeline_mode<synchronous>, transform_indices = @transform_22, window_bounds = array<i64: 20, 10>}, {pipeline_mode = #tpu.pipeline_mode<synchronous>, transform_indices = @transform_23, window_bounds = array<i64: 1, 10>}, {pipeline_mode = #tpu.pipeline_mode<synchronous>, transform_indices = @transform_24, window_bounds = array<i64: 2, 10>}]} {
    %c0_i32 = arith.constant 0 : i32
    %0 = arith.cmpi eq, %arg0, %c0_i32 : i32
    %1 = arith.extui %0 : i1 to i32
    %c0_i32_0 = arith.constant 0 : i32
    %2 = arith.cmpi ne, %1, %c0_i32_0 : i32
    scf.if %2 {
      %c0_239 = arith.constant 0 : index
      %c0_240 = arith.constant 0 : index
      %340 = vector.load %arg1[%c0_239, %c0_240] : memref<32x16xf32, #tpu.memory_space<vmem>>, vector<32x16xf32>
      %c0_241 = arith.constant 0 : index
      %c0_242 = arith.constant 0 : index
      %341 = vector.load %arg2[%c0_241, %c0_242] : memref<16x20xf32, #tpu.memory_space<vmem>>, vector<16x20xf32>
      %cst_243 = arith.constant dense<0.000000e+00> : vector<32x20xf32>
      %342 = tpu.matmul %340, %341, %cst_243 {dimension_numbers = #tpu.dot_dimension_numbers<[1], [0], [0], [1], [0, 0, 1, 1], [], []>} : vector<32x16xf32>, vector<16x20xf32>, vector<32x20xf32> -> vector<32x20xf32>
      %c0_244 = arith.constant 0 : index
      %c0_245 = arith.constant 0 : index
      %343 = vector.load %arg4[%c0_244, %c0_245] : memref<17x20xf32, #tpu.memory_space<vmem>>, vector<17x20xf32>
      %c0_246 = arith.constant 0 : index
      %c0_247 = arith.constant 0 : index
      %344 = vector.load %arg3[%c0_246, %c0_247] : memref<2x20xf32, #tpu.memory_space<vmem>>, vector<2x20xf32>
      %345 = vector.extract_strided_slice %344 {offsets = [0, 0], sizes = [1, 20], strides = [1, 1]} : vector<2x20xf32> to vector<1x20xf32>
      %346 = vector.extract_strided_slice %343 {offsets = [0, 0], sizes = [1, 20], strides = [1, 1]} : vector<17x20xf32> to vector<1x20xf32>
      %347 = arith.addf %345, %346 : vector<1x20xf32>
      %c0_248 = arith.constant 0 : index
      %c0_249 = arith.constant 0 : index
      %c0_250 = arith.constant 0 : index
      %348 = vector.load %arg26[%c0_248, %c0_249, %c0_250] : memref<2x17x20xf32, #tpu.memory_space<vmem>>, vector<1x1x20xf32>
      %349 = vector.shape_cast %348 : vector<1x1x20xf32> to vector<1x20xf32>
      %350 = vector.shape_cast %347 : vector<1x20xf32> to vector<1x1x20xf32>
      tpu.vector_store %arg26[%c0_248, %c0_249, %c0_250], %350 {strides = array<i32>} : memref<2x17x20xf32, #tpu.memory_space<vmem>>, vector<1x1x20xf32>,
      %351 = vector.extract_strided_slice %342 {offsets = [0, 0], sizes = [16, 20], strides = [1, 1]} : vector<32x20xf32> to vector<16x20xf32>
      %352 = vector.extract_strided_slice %343 {offsets = [1, 0], sizes = [16, 20], strides = [1, 1]} : vector<17x20xf32> to vector<16x20xf32>
      %353 = arith.addf %351, %352 : vector<16x20xf32>
      %c0_251 = arith.constant 0 : index
      %c1_252 = arith.constant 1 : index
      %c0_253 = arith.constant 0 : index
      %354 = vector.load %arg26[%c0_251, %c1_252, %c0_253] : memref<2x17x20xf32, #tpu.memory_space<vmem>>, vector<1x16x20xf32>
      %355 = vector.shape_cast %354 : vector<1x16x20xf32> to vector<16x20xf32>
      %356 = vector.shape_cast %353 : vector<16x20xf32> to vector<1x16x20xf32>
      tpu.vector_store %arg26[%c0_251, %c1_252, %c0_253], %356 {strides = array<i32>} : memref<2x17x20xf32, #tpu.memory_space<vmem>>, vector<1x16x20xf32>,
      %357 = vector.extract_strided_slice %344 {offsets = [1, 0], sizes = [1, 20], strides = [1, 1]} : vector<2x20xf32> to vector<1x20xf32>
      %358 = vector.extract_strided_slice %343 {offsets = [0, 0], sizes = [1, 20], strides = [1, 1]} : vector<17x20xf32> to vector<1x20xf32>
      %359 = arith.addf %357, %358 : vector<1x20xf32>
      %c1_254 = arith.constant 1 : index
      %c0_255 = arith.constant 0 : index
      %c0_256 = arith.constant 0 : index
      %360 = vector.load %arg26[%c1_254, %c0_255, %c0_256] : memref<2x17x20xf32, #tpu.memory_space<vmem>>, vector<1x1x20xf32>
      %361 = vector.shape_cast %360 : vector<1x1x20xf32> to vector<1x20xf32>
      %362 = vector.shape_cast %359 : vector<1x20xf32> to vector<1x1x20xf32>
      tpu.vector_store %arg26[%c1_254, %c0_255, %c0_256], %362 {strides = array<i32>} : memref<2x17x20xf32, #tpu.memory_space<vmem>>, vector<1x1x20xf32>,
      %363 = vector.extract_strided_slice %342 {offsets = [16, 0], sizes = [16, 20], strides = [1, 1]} : vector<32x20xf32> to vector<16x20xf32>
      %364 = vector.extract_strided_slice %343 {offsets = [1, 0], sizes = [16, 20], strides = [1, 1]} : vector<17x20xf32> to vector<16x20xf32>
      %365 = arith.addf %363, %364 : vector<16x20xf32>
      %c1_257 = arith.constant 1 : index
      %c1_258 = arith.constant 1 : index
      %c0_259 = arith.constant 0 : index
      %366 = vector.load %arg26[%c1_257, %c1_258, %c0_259] : memref<2x17x20xf32, #tpu.memory_space<vmem>>, vector<1x16x20xf32>
      %367 = vector.shape_cast %366 : vector<1x16x20xf32> to vector<16x20xf32>
      %368 = vector.shape_cast %365 : vector<16x20xf32> to vector<1x16x20xf32>
      tpu.vector_store %arg26[%c1_257, %c1_258, %c0_259], %368 {strides = array<i32>} : memref<2x17x20xf32, #tpu.memory_space<vmem>>, vector<1x16x20xf32>,
    } else {
    }
    %c0 = arith.constant 0 : index
    %c0_1 = arith.constant 0 : index
    %c0_2 = arith.constant 0 : index
    %3 = vector.load %arg7[%c0, %c0_1, %c0_2] : memref<1x20x20xf32, #tpu.memory_space<vmem>>, vector<1x20x20xf32>
    %4 = vector.shape_cast %3 : vector<1x20x20xf32> to vector<20x20xf32>
    %c0_3 = arith.constant 0 : index
    %c0_4 = arith.constant 0 : index
    %c0_5 = arith.constant 0 : index
    %5 = vector.load %arg8[%c0_3, %c0_4, %c0_5] : memref<1x1x20xf32, #tpu.memory_space<vmem>>, vector<1x1x20xf32>
    %6 = vector.shape_cast %5 : vector<1x1x20xf32> to vector<1x20xf32>
    %c0_6 = arith.constant 0 : index
    %c0_7 = arith.constant 0 : index
    %c0_8 = arith.constant 0 : index
    %7 = vector.load %arg9[%c0_6, %c0_7, %c0_8] : memref<1x20x20xf32, #tpu.memory_space<vmem>>, vector<1x20x20xf32>
    %8 = vector.shape_cast %7 : vector<1x20x20xf32> to vector<20x20xf32>
    %c0_9 = arith.constant 0 : index
    %c0_10 = arith.constant 0 : index
    %c0_11 = arith.constant 0 : index
    %9 = vector.load %arg10[%c0_9, %c0_10, %c0_11] : memref<1x1x20xf32, #tpu.memory_space<vmem>>, vector<1x1x20xf32>
    %10 = vector.shape_cast %9 : vector<1x1x20xf32> to vector<1x20xf32>
    %c0_12 = arith.constant 0 : index
    %c0_13 = arith.constant 0 : index
    %c0_14 = arith.constant 0 : index
    %11 = vector.load %arg11[%c0_12, %c0_13, %c0_14] : memref<1x20x20xf32, #tpu.memory_space<vmem>>, vector<1x20x20xf32>
    %12 = vector.shape_cast %11 : vector<1x20x20xf32> to vector<20x20xf32>
    %c0_15 = arith.constant 0 : index
    %c0_16 = arith.constant 0 : index
    %c0_17 = arith.constant 0 : index
    %13 = vector.load %arg12[%c0_15, %c0_16, %c0_17] : memref<1x1x20xf32, #tpu.memory_space<vmem>>, vector<1x1x20xf32>
    %14 = vector.shape_cast %13 : vector<1x1x20xf32> to vector<1x20xf32>
    %c0_18 = arith.constant 0 : index
    %c0_19 = arith.constant 0 : index
    %c0_20 = arith.constant 0 : index
    %15 = vector.load %arg13[%c0_18, %c0_19, %c0_20] : memref<1x20x20xf32, #tpu.memory_space<vmem>>, vector<1x20x20xf32>
    %16 = vector.shape_cast %15 : vector<1x20x20xf32> to vector<20x20xf32>
    %c0_21 = arith.constant 0 : index
    %c0_22 = arith.constant 0 : index
    %c0_23 = arith.constant 0 : index
    %17 = vector.load %arg14[%c0_21, %c0_22, %c0_23] : memref<1x1x20xf32, #tpu.memory_space<vmem>>, vector<1x1x20xf32>
    %18 = vector.shape_cast %17 : vector<1x1x20xf32> to vector<1x20xf32>
    %c0_24 = arith.constant 0 : index
    %c0_25 = arith.constant 0 : index
    %c0_26 = arith.constant 0 : index
    %19 = vector.load %arg15[%c0_24, %c0_25, %c0_26] : memref<1x1x20xf32, #tpu.memory_space<vmem>>, vector<1x1x20xf32>
    %20 = vector.shape_cast %19 : vector<1x1x20xf32> to vector<1x20xf32>
    %c0_27 = arith.constant 0 : index
    %c0_28 = arith.constant 0 : index
    %c0_29 = arith.constant 0 : index
    %21 = vector.load %arg16[%c0_27, %c0_28, %c0_29] : memref<1x1x20xf32, #tpu.memory_space<vmem>>, vector<1x1x20xf32>
    %22 = vector.shape_cast %21 : vector<1x1x20xf32> to vector<1x20xf32>
    %c0_30 = arith.constant 0 : index
    %c0_31 = arith.constant 0 : index
    %c0_32 = arith.constant 0 : index
    %23 = vector.load %arg21[%c0_30, %c0_31, %c0_32] : memref<1x1x20xf32, #tpu.memory_space<vmem>>, vector<1x1x20xf32>
    %24 = vector.shape_cast %23 : vector<1x1x20xf32> to vector<1x20xf32>
    %c0_33 = arith.constant 0 : index
    %c0_34 = arith.constant 0 : index
    %c0_35 = arith.constant 0 : index
    %25 = vector.load %arg22[%c0_33, %c0_34, %c0_35] : memref<1x1x20xf32, #tpu.memory_space<vmem>>, vector<1x1x20xf32>
    %26 = vector.shape_cast %25 : vector<1x1x20xf32> to vector<1x20xf32>
    %c0_36 = arith.constant 0 : index
    %c0_37 = arith.constant 0 : index
    %c0_38 = arith.constant 0 : index
    %27 = vector.load %arg20[%c0_36, %c0_37, %c0_38] : memref<1x1x20xf32, #tpu.memory_space<vmem>>, vector<1x1x20xf32>
    %28 = vector.shape_cast %27 : vector<1x1x20xf32> to vector<1x20xf32>
    %c0_39 = arith.constant 0 : index
    %c0_40 = arith.constant 0 : index
    %29 = vector.load %arg5[%c0_39, %c0_40] : memref<20x10xf32, #tpu.memory_space<vmem>>, vector<20x10xf32>
    %c0_41 = arith.constant 0 : index
    %c0_42 = arith.constant 0 : index
    %30 = vector.load %arg6[%c0_41, %c0_42] : memref<10x20xf32, #tpu.memory_space<vmem>>, vector<10x20xf32>
    %c0_43 = arith.constant 0 : index
    %c0_44 = arith.constant 0 : index
    %c0_45 = arith.constant 0 : index
    %31 = vector.load %arg26[%c0_43, %c0_44, %c0_45] : memref<2x17x20xf32, #tpu.memory_space<vmem>>, vector<1x17x20xf32>
    %32 = vector.shape_cast %31 : vector<1x17x20xf32> to vector<17x20xf32>
    %cst = arith.constant dense<0.000000e+00> : vector<17x20xf32>
    %33 = tpu.matmul %32, %4, %cst {dimension_numbers = #tpu.dot_dimension_numbers<[1], [0], [0], [1], [0, 0, 1, 1], [], []>} : vector<17x20xf32>, vector<20x20xf32>, vector<17x20xf32> -> vector<17x20xf32>
    %34 = vector.broadcast %6 : vector<1x20xf32> to vector<17x20xf32>
    %35 = arith.addf %33, %34 : vector<17x20xf32>
    %cst_46 = arith.constant 0.707106769 : f32
    %36 = vector.broadcast %cst_46 : f32 to vector<17x20xf32>
    %37 = arith.mulf %35, %36 : vector<17x20xf32>
    %c0_47 = arith.constant 0 : index
    %c0_48 = arith.constant 0 : index
    %c0_49 = arith.constant 0 : index
    %38 = vector.load %arg27[%c0_47, %c0_48, %c0_49] : memref<2x17x20xf32, #tpu.memory_space<vmem>>, vector<1x17x20xf32>
    %39 = vector.shape_cast %38 : vector<1x17x20xf32> to vector<17x20xf32>
    %40 = vector.shape_cast %37 : vector<17x20xf32> to vector<1x17x20xf32>
    tpu.vector_store %arg27[%c0_47, %c0_48, %c0_49], %40 {strides = array<i32>} : memref<2x17x20xf32, #tpu.memory_space<vmem>>, vector<1x17x20xf32>,
    %cst_50 = arith.constant dense<0.000000e+00> : vector<17x20xf32>
    %41 = tpu.matmul %32, %8, %cst_50 {dimension_numbers = #tpu.dot_dimension_numbers<[1], [0], [0], [1], [0, 0, 1, 1], [], []>} : vector<17x20xf32>, vector<20x20xf32>, vector<17x20xf32> -> vector<17x20xf32>
    %42 = vector.broadcast %10 : vector<1x20xf32> to vector<17x20xf32>
    %43 = arith.addf %41, %42 : vector<17x20xf32>
    %c0_51 = arith.constant 0 : index
    %c0_52 = arith.constant 0 : index
    %c0_53 = arith.constant 0 : index
    %44 = vector.load %arg28[%c0_51, %c0_52, %c0_53] : memref<2x17x20xf32, #tpu.memory_space<vmem>>, vector<1x17x20xf32>
    %45 = vector.shape_cast %44 : vector<1x17x20xf32> to vector<17x20xf32>
    %46 = vector.shape_cast %43 : vector<17x20xf32> to vector<1x17x20xf32>
    tpu.vector_store %arg28[%c0_51, %c0_52, %c0_53], %46 {strides = array<i32>} : memref<2x17x20xf32, #tpu.memory_space<vmem>>, vector<1x17x20xf32>,
    %cst_54 = arith.constant dense<0.000000e+00> : vector<17x20xf32>
    %47 = tpu.matmul %32, %12, %cst_54 {dimension_numbers = #tpu.dot_dimension_numbers<[1], [0], [0], [1], [0, 0, 1, 1], [], []>} : vector<17x20xf32>, vector<20x20xf32>, vector<17x20xf32> -> vector<17x20xf32>
    %48 = vector.broadcast %14 : vector<1x20xf32> to vector<17x20xf32>
    %49 = arith.addf %47, %48 : vector<17x20xf32>
    %c0_55 = arith.constant 0 : index
    %c0_56 = arith.constant 0 : index
    %c0_57 = arith.constant 0 : index
    %50 = vector.load %arg29[%c0_55, %c0_56, %c0_57] : memref<2x17x20xf32, #tpu.memory_space<vmem>>, vector<1x17x20xf32>
    %51 = vector.shape_cast %50 : vector<1x17x20xf32> to vector<17x20xf32>
    %52 = vector.shape_cast %49 : vector<17x20xf32> to vector<1x17x20xf32>
    tpu.vector_store %arg29[%c0_55, %c0_56, %c0_57], %52 {strides = array<i32>} : memref<2x17x20xf32, #tpu.memory_space<vmem>>, vector<1x17x20xf32>,
    %c1 = arith.constant 1 : index
    %c0_58 = arith.constant 0 : index
    %c0_59 = arith.constant 0 : index
    %53 = vector.load %arg26[%c1, %c0_58, %c0_59] : memref<2x17x20xf32, #tpu.memory_space<vmem>>, vector<1x17x20xf32>
    %54 = vector.shape_cast %53 : vector<1x17x20xf32> to vector<17x20xf32>
    %cst_60 = arith.constant dense<0.000000e+00> : vector<17x20xf32>
    %55 = tpu.matmul %54, %4, %cst_60 {dimension_numbers = #tpu.dot_dimension_numbers<[1], [0], [0], [1], [0, 0, 1, 1], [], []>} : vector<17x20xf32>, vector<20x20xf32>, vector<17x20xf32> -> vector<17x20xf32>
    %56 = vector.broadcast %6 : vector<1x20xf32> to vector<17x20xf32>
    %57 = arith.addf %55, %56 : vector<17x20xf32>
    %cst_61 = arith.constant 0.707106769 : f32
    %58 = vector.broadcast %cst_61 : f32 to vector<17x20xf32>
    %59 = arith.mulf %57, %58 : vector<17x20xf32>
    %c1_62 = arith.constant 1 : index
    %c0_63 = arith.constant 0 : index
    %c0_64 = arith.constant 0 : index
    %60 = vector.load %arg27[%c1_62, %c0_63, %c0_64] : memref<2x17x20xf32, #tpu.memory_space<vmem>>, vector<1x17x20xf32>
    %61 = vector.shape_cast %60 : vector<1x17x20xf32> to vector<17x20xf32>
    %62 = vector.shape_cast %59 : vector<17x20xf32> to vector<1x17x20xf32>
    tpu.vector_store %arg27[%c1_62, %c0_63, %c0_64], %62 {strides = array<i32>} : memref<2x17x20xf32, #tpu.memory_space<vmem>>, vector<1x17x20xf32>,
    %cst_65 = arith.constant dense<0.000000e+00> : vector<17x20xf32>
    %63 = tpu.matmul %54, %8, %cst_65 {dimension_numbers = #tpu.dot_dimension_numbers<[1], [0], [0], [1], [0, 0, 1, 1], [], []>} : vector<17x20xf32>, vector<20x20xf32>, vector<17x20xf32> -> vector<17x20xf32>
    %64 = vector.broadcast %10 : vector<1x20xf32> to vector<17x20xf32>
    %65 = arith.addf %63, %64 : vector<17x20xf32>
    %c1_66 = arith.constant 1 : index
    %c0_67 = arith.constant 0 : index
    %c0_68 = arith.constant 0 : index
    %66 = vector.load %arg28[%c1_66, %c0_67, %c0_68] : memref<2x17x20xf32, #tpu.memory_space<vmem>>, vector<1x17x20xf32>
    %67 = vector.shape_cast %66 : vector<1x17x20xf32> to vector<17x20xf32>
    %68 = vector.shape_cast %65 : vector<17x20xf32> to vector<1x17x20xf32>
    tpu.vector_store %arg28[%c1_66, %c0_67, %c0_68], %68 {strides = array<i32>} : memref<2x17x20xf32, #tpu.memory_space<vmem>>, vector<1x17x20xf32>,
    %cst_69 = arith.constant dense<0.000000e+00> : vector<17x20xf32>
    %69 = tpu.matmul %54, %12, %cst_69 {dimension_numbers = #tpu.dot_dimension_numbers<[1], [0], [0], [1], [0, 0, 1, 1], [], []>} : vector<17x20xf32>, vector<20x20xf32>, vector<17x20xf32> -> vector<17x20xf32>
    %70 = vector.broadcast %14 : vector<1x20xf32> to vector<17x20xf32>
    %71 = arith.addf %69, %70 : vector<17x20xf32>
    %c1_70 = arith.constant 1 : index
    %c0_71 = arith.constant 0 : index
    %c0_72 = arith.constant 0 : index
    %72 = vector.load %arg29[%c1_70, %c0_71, %c0_72] : memref<2x17x20xf32, #tpu.memory_space<vmem>>, vector<1x17x20xf32>
    %73 = vector.shape_cast %72 : vector<1x17x20xf32> to vector<17x20xf32>
    %74 = vector.shape_cast %71 : vector<17x20xf32> to vector<1x17x20xf32>
    tpu.vector_store %arg29[%c1_70, %c0_71, %c0_72], %74 {strides = array<i32>} : memref<2x17x20xf32, #tpu.memory_space<vmem>>, vector<1x17x20xf32>,
    %c0_73 = arith.constant 0 : index
    %c0_74 = arith.constant 0 : index
    %c0_75 = arith.constant 0 : index
    %75 = vector.load %arg27[%c0_73, %c0_74, %c0_75] : memref<2x17x20xf32, #tpu.memory_space<vmem>>, vector<1x17x20xf32>
    %76 = vector.shape_cast %75 : vector<1x17x20xf32> to vector<17x20xf32>
    %c0_76 = arith.constant 0 : index
    %c0_77 = arith.constant 0 : index
    %c0_78 = arith.constant 0 : index
    %77 = vector.load %arg28[%c0_76, %c0_77, %c0_78] : memref<2x17x20xf32, #tpu.memory_space<vmem>>, vector<1x17x20xf32>
    %78 = vector.shape_cast %77 : vector<1x17x20xf32> to vector<17x20xf32>
    %79 = arith.mulf %76, %78 : vector<17x20xf32>
    %cst_79 = arith.constant dense<0.000000e+00> : vector<17x10xf32>
    %80 = tpu.matmul %79, %29, %cst_79 {dimension_numbers = #tpu.dot_dimension_numbers<[1], [0], [0], [1], [0, 0, 1, 1], [], []>} : vector<17x20xf32>, vector<20x10xf32>, vector<17x10xf32> -> vector<17x10xf32>
    %c1_80 = arith.constant 1 : index
    %c0_81 = arith.constant 0 : index
    %c0_82 = arith.constant 0 : index
    %81 = vector.load %arg28[%c1_80, %c0_81, %c0_82] : memref<2x17x20xf32, #tpu.memory_space<vmem>>, vector<1x17x20xf32>
    %82 = vector.shape_cast %81 : vector<1x17x20xf32> to vector<17x20xf32>
    %83 = arith.mulf %76, %82 : vector<17x20xf32>
    %cst_83 = arith.constant dense<0.000000e+00> : vector<17x10xf32>
    %84 = tpu.matmul %83, %29, %cst_83 {dimension_numbers = #tpu.dot_dimension_numbers<[1], [0], [0], [1], [0, 0, 1, 1], [], []>} : vector<17x20xf32>, vector<20x10xf32>, vector<17x10xf32> -> vector<17x10xf32>
    %85 = arith.maximumf %80, %84 : vector<17x10xf32>
    %86 = arith.subf %80, %85 : vector<17x10xf32>
    %87 = math.exp %86 : vector<17x10xf32>
    %88 = arith.subf %84, %85 : vector<17x10xf32>
    %89 = math.exp %88 : vector<17x10xf32>
    %90 = arith.addf %87, %89 : vector<17x10xf32>
    %91 = tpu.reciprocal %90 {approx = true} : vector<17x10xf32> -> vector<17x10xf32>
    %92 = arith.mulf %87, %91 : vector<17x10xf32>
    %cst_84 = arith.constant dense<0.000000e+00> : vector<17x20xf32>
    %93 = tpu.matmul %92, %30, %cst_84 {dimension_numbers = #tpu.dot_dimension_numbers<[1], [0], [0], [1], [0, 0, 1, 1], [], []>} : vector<17x10xf32>, vector<10x20xf32>, vector<17x20xf32> -> vector<17x20xf32>
    %c0_85 = arith.constant 0 : index
    %c0_86 = arith.constant 0 : index
    %c0_87 = arith.constant 0 : index
    %94 = vector.load %arg29[%c0_85, %c0_86, %c0_87] : memref<2x17x20xf32, #tpu.memory_space<vmem>>, vector<1x17x20xf32>
    %95 = vector.shape_cast %94 : vector<1x17x20xf32> to vector<17x20xf32>
    %96 = arith.mulf %93, %95 : vector<17x20xf32>
    %97 = arith.mulf %89, %91 : vector<17x10xf32>
    %cst_88 = arith.constant dense<0.000000e+00> : vector<17x20xf32>
    %98 = tpu.matmul %97, %30, %cst_88 {dimension_numbers = #tpu.dot_dimension_numbers<[1], [0], [0], [1], [0, 0, 1, 1], [], []>} : vector<17x10xf32>, vector<10x20xf32>, vector<17x20xf32> -> vector<17x20xf32>
    %c1_89 = arith.constant 1 : index
    %c0_90 = arith.constant 0 : index
    %c0_91 = arith.constant 0 : index
    %99 = vector.load %arg29[%c1_89, %c0_90, %c0_91] : memref<2x17x20xf32, #tpu.memory_space<vmem>>, vector<1x17x20xf32>
    %100 = vector.shape_cast %99 : vector<1x17x20xf32> to vector<17x20xf32>
    %101 = arith.mulf %98, %100 : vector<17x20xf32>
    %102 = arith.addf %96, %101 : vector<17x20xf32>
    %cst_92 = arith.constant dense<0.000000e+00> : vector<17x20xf32>
    %103 = tpu.matmul %102, %16, %cst_92 {dimension_numbers = #tpu.dot_dimension_numbers<[1], [0], [0], [1], [0, 0, 1, 1], [], []>} : vector<17x20xf32>, vector<20x20xf32>, vector<17x20xf32> -> vector<17x20xf32>
    %104 = vector.broadcast %18 : vector<1x20xf32> to vector<17x20xf32>
    %105 = arith.addf %103, %104 : vector<17x20xf32>
    %c0_93 = arith.constant 0 : index
    %c0_94 = arith.constant 0 : index
    %c0_95 = arith.constant 0 : index
    %106 = vector.load %arg26[%c0_93, %c0_94, %c0_95] : memref<2x17x20xf32, #tpu.memory_space<vmem>>, vector<1x17x20xf32>
    %107 = vector.shape_cast %106 : vector<1x17x20xf32> to vector<17x20xf32>
    %108 = arith.addf %107, %105 : vector<17x20xf32>
    %cst_96 = arith.constant dense<0.000000e+00> : vector<17xf32>
    %109 = vector.multi_reduction <add>, %108, %cst_96 [1] : vector<17x20xf32> to vector<17xf32>
    %110 = vector.shape_cast %109 : vector<17xf32> to vector<17x1xf32>
    %cst_97 = arith.constant 2.000000e+01 : f32
    %111 = vector.broadcast %cst_97 : f32 to vector<17x1xf32>
    %112 = arith.divf %110, %111 : vector<17x1xf32>
    %113 = vector.broadcast %112 : vector<17x1xf32> to vector<17x20xf32>
    %114 = arith.subf %108, %113 : vector<17x20xf32>
    %115 = arith.mulf %114, %114 : vector<17x20xf32>
    %cst_98 = arith.constant dense<0.000000e+00> : vector<17xf32>
    %116 = vector.multi_reduction <add>, %115, %cst_98 [1] : vector<17x20xf32> to vector<17xf32>
    %117 = vector.shape_cast %116 : vector<17xf32> to vector<17x1xf32>
    %cst_99 = arith.constant 2.000000e+01 : f32
    %118 = vector.broadcast %cst_99 : f32 to vector<17x1xf32>
    %119 = arith.divf %117, %118 : vector<17x1xf32>
    %cst_100 = arith.constant 9.99999974E-6 : f32
    %120 = vector.broadcast %cst_100 : f32 to vector<17x1xf32>
    %121 = arith.addf %119, %120 : vector<17x1xf32>
    %122 = math.rsqrt %121 : vector<17x1xf32>
    %123 = vector.broadcast %122 : vector<17x1xf32> to vector<17x20xf32>
    %124 = arith.mulf %114, %123 : vector<17x20xf32>
    %125 = vector.broadcast %20 : vector<1x20xf32> to vector<17x20xf32>
    %126 = arith.mulf %124, %125 : vector<17x20xf32>
    %127 = vector.broadcast %22 : vector<1x20xf32> to vector<17x20xf32>
    %128 = arith.addf %126, %127 : vector<17x20xf32>
    %c0_101 = arith.constant 0 : index
    %c0_102 = arith.constant 0 : index
    %c0_103 = arith.constant 0 : index
    %129 = vector.load %arg17[%c0_101, %c0_102, %c0_103] : memref<1x20x2048xf32, #tpu.memory_space<vmem>>, vector<1x20x512xf32>
    %130 = vector.shape_cast %129 : vector<1x20x512xf32> to vector<20x512xf32>
    %c0_104 = arith.constant 0 : index
    %c0_105 = arith.constant 0 : index
    %c0_106 = arith.constant 0 : index
    %131 = vector.load %arg18[%c0_104, %c0_105, %c0_106] : memref<1x1x2048xf32, #tpu.memory_space<vmem>>, vector<1x1x512xf32>
    %132 = vector.shape_cast %131 : vector<1x1x512xf32> to vector<1x512xf32>
    %cst_107 = arith.constant dense<0.000000e+00> : vector<17x512xf32>
    %133 = tpu.matmul %128, %130, %cst_107 {dimension_numbers = #tpu.dot_dimension_numbers<[1], [0], [0], [1], [0, 0, 1, 1], [], []>} : vector<17x20xf32>, vector<20x512xf32>, vector<17x512xf32> -> vector<17x512xf32>
    %134 = vector.broadcast %132 : vector<1x512xf32> to vector<17x512xf32>
    %135 = arith.addf %133, %134 : vector<17x512xf32>
    %cst_108 = arith.constant 0.000000e+00 : f32
    %136 = vector.broadcast %cst_108 : f32 to vector<17x512xf32>
    %137 = arith.maximumf %135, %136 : vector<17x512xf32>
    %c0_109 = arith.constant 0 : index
    %c0_110 = arith.constant 0 : index
    %c0_111 = arith.constant 0 : index
    %138 = vector.load %arg19[%c0_109, %c0_110, %c0_111] : memref<1x2048x20xf32, #tpu.memory_space<vmem>>, vector<1x512x20xf32>
    %139 = vector.shape_cast %138 : vector<1x512x20xf32> to vector<512x20xf32>
    %cst_112 = arith.constant dense<0.000000e+00> : vector<17x20xf32>
    %140 = tpu.matmul %137, %139, %cst_112 {dimension_numbers = #tpu.dot_dimension_numbers<[1], [0], [0], [1], [0, 0, 1, 1], [], []>} : vector<17x512xf32>, vector<512x20xf32>, vector<17x20xf32> -> vector<17x20xf32>
    %c0_113 = arith.constant 0 : index
    %c0_114 = arith.constant 0 : index
    %c512 = arith.constant 512 : index
    %141 = vector.load %arg17[%c0_113, %c0_114, %c512] : memref<1x20x2048xf32, #tpu.memory_space<vmem>>, vector<1x20x512xf32>
    %142 = vector.shape_cast %141 : vector<1x20x512xf32> to vector<20x512xf32>
    %c0_115 = arith.constant 0 : index
    %c0_116 = arith.constant 0 : index
    %c512_117 = arith.constant 512 : index
    %143 = vector.load %arg18[%c0_115, %c0_116, %c512_117] : memref<1x1x2048xf32, #tpu.memory_space<vmem>>, vector<1x1x512xf32>
    %144 = vector.shape_cast %143 : vector<1x1x512xf32> to vector<1x512xf32>
    %cst_118 = arith.constant dense<0.000000e+00> : vector<17x512xf32>
    %145 = tpu.matmul %128, %142, %cst_118 {dimension_numbers = #tpu.dot_dimension_numbers<[1], [0], [0], [1], [0, 0, 1, 1], [], []>} : vector<17x20xf32>, vector<20x512xf32>, vector<17x512xf32> -> vector<17x512xf32>
    %146 = vector.broadcast %144 : vector<1x512xf32> to vector<17x512xf32>
    %147 = arith.addf %145, %146 : vector<17x512xf32>
    %cst_119 = arith.constant 0.000000e+00 : f32
    %148 = vector.broadcast %cst_119 : f32 to vector<17x512xf32>
    %149 = arith.maximumf %147, %148 : vector<17x512xf32>
    %c0_120 = arith.constant 0 : index
    %c512_121 = arith.constant 512 : index
    %c0_122 = arith.constant 0 : index
    %150 = vector.load %arg19[%c0_120, %c512_121, %c0_122] : memref<1x2048x20xf32, #tpu.memory_space<vmem>>, vector<1x512x20xf32>
    %151 = vector.shape_cast %150 : vector<1x512x20xf32> to vector<512x20xf32>
    %cst_123 = arith.constant dense<0.000000e+00> : vector<17x20xf32>
    %152 = tpu.matmul %149, %151, %cst_123 {dimension_numbers = #tpu.dot_dimension_numbers<[1], [0], [0], [1], [0, 0, 1, 1], [], []>} : vector<17x512xf32>, vector<512x20xf32>, vector<17x20xf32> -> vector<17x20xf32>
    %153 = arith.addf %140, %152 : vector<17x20xf32>
    %c0_124 = arith.constant 0 : index
    %c0_125 = arith.constant 0 : index
    %c1024 = arith.constant 1024 : index
    %154 = vector.load %arg17[%c0_124, %c0_125, %c1024] : memref<1x20x2048xf32, #tpu.memory_space<vmem>>, vector<1x20x512xf32>
    %155 = vector.shape_cast %154 : vector<1x20x512xf32> to vector<20x512xf32>
    %c0_126 = arith.constant 0 : index
    %c0_127 = arith.constant 0 : index
    %c1024_128 = arith.constant 1024 : index
    %156 = vector.load %arg18[%c0_126, %c0_127, %c1024_128] : memref<1x1x2048xf32, #tpu.memory_space<vmem>>, vector<1x1x512xf32>
    %157 = vector.shape_cast %156 : vector<1x1x512xf32> to vector<1x512xf32>
    %cst_129 = arith.constant dense<0.000000e+00> : vector<17x512xf32>
    %158 = tpu.matmul %128, %155, %cst_129 {dimension_numbers = #tpu.dot_dimension_numbers<[1], [0], [0], [1], [0, 0, 1, 1], [], []>} : vector<17x20xf32>, vector<20x512xf32>, vector<17x512xf32> -> vector<17x512xf32>
    %159 = vector.broadcast %157 : vector<1x512xf32> to vector<17x512xf32>
    %160 = arith.addf %158, %159 : vector<17x512xf32>
    %cst_130 = arith.constant 0.000000e+00 : f32
    %161 = vector.broadcast %cst_130 : f32 to vector<17x512xf32>
    %162 = arith.maximumf %160, %161 : vector<17x512xf32>
    %c0_131 = arith.constant 0 : index
    %c1024_132 = arith.constant 1024 : index
    %c0_133 = arith.constant 0 : index
    %163 = vector.load %arg19[%c0_131, %c1024_132, %c0_133] : memref<1x2048x20xf32, #tpu.memory_space<vmem>>, vector<1x512x20xf32>
    %164 = vector.shape_cast %163 : vector<1x512x20xf32> to vector<512x20xf32>
    %cst_134 = arith.constant dense<0.000000e+00> : vector<17x20xf32>
    %165 = tpu.matmul %162, %164, %cst_134 {dimension_numbers = #tpu.dot_dimension_numbers<[1], [0], [0], [1], [0, 0, 1, 1], [], []>} : vector<17x512xf32>, vector<512x20xf32>, vector<17x20xf32> -> vector<17x20xf32>
    %166 = arith.addf %153, %165 : vector<17x20xf32>
    %c0_135 = arith.constant 0 : index
    %c0_136 = arith.constant 0 : index
    %c1536 = arith.constant 1536 : index
    %167 = vector.load %arg17[%c0_135, %c0_136, %c1536] : memref<1x20x2048xf32, #tpu.memory_space<vmem>>, vector<1x20x512xf32>
    %168 = vector.shape_cast %167 : vector<1x20x512xf32> to vector<20x512xf32>
    %c0_137 = arith.constant 0 : index
    %c0_138 = arith.constant 0 : index
    %c1536_139 = arith.constant 1536 : index
    %169 = vector.load %arg18[%c0_137, %c0_138, %c1536_139] : memref<1x1x2048xf32, #tpu.memory_space<vmem>>, vector<1x1x512xf32>
    %170 = vector.shape_cast %169 : vector<1x1x512xf32> to vector<1x512xf32>
    %cst_140 = arith.constant dense<0.000000e+00> : vector<17x512xf32>
    %171 = tpu.matmul %128, %168, %cst_140 {dimension_numbers = #tpu.dot_dimension_numbers<[1], [0], [0], [1], [0, 0, 1, 1], [], []>} : vector<17x20xf32>, vector<20x512xf32>, vector<17x512xf32> -> vector<17x512xf32>
    %172 = vector.broadcast %170 : vector<1x512xf32> to vector<17x512xf32>
    %173 = arith.addf %171, %172 : vector<17x512xf32>
    %cst_141 = arith.constant 0.000000e+00 : f32
    %174 = vector.broadcast %cst_141 : f32 to vector<17x512xf32>
    %175 = arith.maximumf %173, %174 : vector<17x512xf32>
    %c0_142 = arith.constant 0 : index
    %c1536_143 = arith.constant 1536 : index
    %c0_144 = arith.constant 0 : index
    %176 = vector.load %arg19[%c0_142, %c1536_143, %c0_144] : memref<1x2048x20xf32, #tpu.memory_space<vmem>>, vector<1x512x20xf32>
    %177 = vector.shape_cast %176 : vector<1x512x20xf32> to vector<512x20xf32>
    %cst_145 = arith.constant dense<0.000000e+00> : vector<17x20xf32>
    %178 = tpu.matmul %175, %177, %cst_145 {dimension_numbers = #tpu.dot_dimension_numbers<[1], [0], [0], [1], [0, 0, 1, 1], [], []>} : vector<17x512xf32>, vector<512x20xf32>, vector<17x20xf32> -> vector<17x20xf32>
    %179 = arith.addf %166, %178 : vector<17x20xf32>
    %180 = vector.broadcast %28 : vector<1x20xf32> to vector<17x20xf32>
    %181 = arith.addf %179, %180 : vector<17x20xf32>
    %182 = arith.addf %128, %181 : vector<17x20xf32>
    %cst_146 = arith.constant dense<0.000000e+00> : vector<17xf32>
    %183 = vector.multi_reduction <add>, %182, %cst_146 [1] : vector<17x20xf32> to vector<17xf32>
    %184 = vector.shape_cast %183 : vector<17xf32> to vector<17x1xf32>
    %cst_147 = arith.constant 2.000000e+01 : f32
    %185 = vector.broadcast %cst_147 : f32 to vector<17x1xf32>
    %186 = arith.divf %184, %185 : vector<17x1xf32>
    %187 = vector.broadcast %186 : vector<17x1xf32> to vector<17x20xf32>
    %188 = arith.subf %182, %187 : vector<17x20xf32>
    %189 = arith.mulf %188, %188 : vector<17x20xf32>
    %cst_148 = arith.constant dense<0.000000e+00> : vector<17xf32>
    %190 = vector.multi_reduction <add>, %189, %cst_148 [1] : vector<17x20xf32> to vector<17xf32>
    %191 = vector.shape_cast %190 : vector<17xf32> to vector<17x1xf32>
    %cst_149 = arith.constant 2.000000e+01 : f32
    %192 = vector.broadcast %cst_149 : f32 to vector<17x1xf32>
    %193 = arith.divf %191, %192 : vector<17x1xf32>
    %cst_150 = arith.constant 9.99999974E-6 : f32
    %194 = vector.broadcast %cst_150 : f32 to vector<17x1xf32>
    %195 = arith.addf %193, %194 : vector<17x1xf32>
    %196 = math.rsqrt %195 : vector<17x1xf32>
    %197 = vector.broadcast %196 : vector<17x1xf32> to vector<17x20xf32>
    %198 = arith.mulf %188, %197 : vector<17x20xf32>
    %199 = vector.broadcast %24 : vector<1x20xf32> to vector<17x20xf32>
    %200 = arith.mulf %198, %199 : vector<17x20xf32>
    %201 = vector.broadcast %26 : vector<1x20xf32> to vector<17x20xf32>
    %202 = arith.addf %200, %201 : vector<17x20xf32>
    %c0_151 = arith.constant 0 : index
    %c0_152 = arith.constant 0 : index
    %c0_153 = arith.constant 0 : index
    %203 = vector.load %arg26[%c0_151, %c0_152, %c0_153] : memref<2x17x20xf32, #tpu.memory_space<vmem>>, vector<1x17x20xf32>
    %204 = vector.shape_cast %203 : vector<1x17x20xf32> to vector<17x20xf32>
    %205 = vector.shape_cast %202 : vector<17x20xf32> to vector<1x17x20xf32>
    tpu.vector_store %arg26[%c0_151, %c0_152, %c0_153], %205 {strides = array<i32>} : memref<2x17x20xf32, #tpu.memory_space<vmem>>, vector<1x17x20xf32>,
    %c1_154 = arith.constant 1 : index
    %c0_155 = arith.constant 0 : index
    %c0_156 = arith.constant 0 : index
    %206 = vector.load %arg27[%c1_154, %c0_155, %c0_156] : memref<2x17x20xf32, #tpu.memory_space<vmem>>, vector<1x17x20xf32>
    %207 = vector.shape_cast %206 : vector<1x17x20xf32> to vector<17x20xf32>
    %c0_157 = arith.constant 0 : index
    %c0_158 = arith.constant 0 : index
    %c0_159 = arith.constant 0 : index
    %208 = vector.load %arg28[%c0_157, %c0_158, %c0_159] : memref<2x17x20xf32, #tpu.memory_space<vmem>>, vector<1x17x20xf32>
    %209 = vector.shape_cast %208 : vector<1x17x20xf32> to vector<17x20xf32>
    %210 = arith.mulf %207, %209 : vector<17x20xf32>
    %cst_160 = arith.constant dense<0.000000e+00> : vector<17x10xf32>
    %211 = tpu.matmul %210, %29, %cst_160 {dimension_numbers = #tpu.dot_dimension_numbers<[1], [0], [0], [1], [0, 0, 1, 1], [], []>} : vector<17x20xf32>, vector<20x10xf32>, vector<17x10xf32> -> vector<17x10xf32>
    %c1_161 = arith.constant 1 : index
    %c0_162 = arith.constant 0 : index
    %c0_163 = arith.constant 0 : index
    %212 = vector.load %arg28[%c1_161, %c0_162, %c0_163] : memref<2x17x20xf32, #tpu.memory_space<vmem>>, vector<1x17x20xf32>
    %213 = vector.shape_cast %212 : vector<1x17x20xf32> to vector<17x20xf32>
    %214 = arith.mulf %207, %213 : vector<17x20xf32>
    %cst_164 = arith.constant dense<0.000000e+00> : vector<17x10xf32>
    %215 = tpu.matmul %214, %29, %cst_164 {dimension_numbers = #tpu.dot_dimension_numbers<[1], [0], [0], [1], [0, 0, 1, 1], [], []>} : vector<17x20xf32>, vector<20x10xf32>, vector<17x10xf32> -> vector<17x10xf32>
    %216 = arith.maximumf %211, %215 : vector<17x10xf32>
    %217 = arith.subf %211, %216 : vector<17x10xf32>
    %218 = math.exp %217 : vector<17x10xf32>
    %219 = arith.subf %215, %216 : vector<17x10xf32>
    %220 = math.exp %219 : vector<17x10xf32>
    %221 = arith.addf %218, %220 : vector<17x10xf32>
    %222 = tpu.reciprocal %221 {approx = true} : vector<17x10xf32> -> vector<17x10xf32>
    %223 = arith.mulf %218, %222 : vector<17x10xf32>
    %cst_165 = arith.constant dense<0.000000e+00> : vector<17x20xf32>
    %224 = tpu.matmul %223, %30, %cst_165 {dimension_numbers = #tpu.dot_dimension_numbers<[1], [0], [0], [1], [0, 0, 1, 1], [], []>} : vector<17x10xf32>, vector<10x20xf32>, vector<17x20xf32> -> vector<17x20xf32>
    %c0_166 = arith.constant 0 : index
    %c0_167 = arith.constant 0 : index
    %c0_168 = arith.constant 0 : index
    %225 = vector.load %arg29[%c0_166, %c0_167, %c0_168] : memref<2x17x20xf32, #tpu.memory_space<vmem>>, vector<1x17x20xf32>
    %226 = vector.shape_cast %225 : vector<1x17x20xf32> to vector<17x20xf32>
    %227 = arith.mulf %224, %226 : vector<17x20xf32>
    %228 = arith.mulf %220, %222 : vector<17x10xf32>
    %cst_169 = arith.constant dense<0.000000e+00> : vector<17x20xf32>
    %229 = tpu.matmul %228, %30, %cst_169 {dimension_numbers = #tpu.dot_dimension_numbers<[1], [0], [0], [1], [0, 0, 1, 1], [], []>} : vector<17x10xf32>, vector<10x20xf32>, vector<17x20xf32> -> vector<17x20xf32>
    %c1_170 = arith.constant 1 : index
    %c0_171 = arith.constant 0 : index
    %c0_172 = arith.constant 0 : index
    %230 = vector.load %arg29[%c1_170, %c0_171, %c0_172] : memref<2x17x20xf32, #tpu.memory_space<vmem>>, vector<1x17x20xf32>
    %231 = vector.shape_cast %230 : vector<1x17x20xf32> to vector<17x20xf32>
    %232 = arith.mulf %229, %231 : vector<17x20xf32>
    %233 = arith.addf %227, %232 : vector<17x20xf32>
    %cst_173 = arith.constant dense<0.000000e+00> : vector<17x20xf32>
    %234 = tpu.matmul %233, %16, %cst_173 {dimension_numbers = #tpu.dot_dimension_numbers<[1], [0], [0], [1], [0, 0, 1, 1], [], []>} : vector<17x20xf32>, vector<20x20xf32>, vector<17x20xf32> -> vector<17x20xf32>
    %235 = vector.broadcast %18 : vector<1x20xf32> to vector<17x20xf32>
    %236 = arith.addf %234, %235 : vector<17x20xf32>
    %c1_174 = arith.constant 1 : index
    %c0_175 = arith.constant 0 : index
    %c0_176 = arith.constant 0 : index
    %237 = vector.load %arg26[%c1_174, %c0_175, %c0_176] : memref<2x17x20xf32, #tpu.memory_space<vmem>>, vector<1x17x20xf32>
    %238 = vector.shape_cast %237 : vector<1x17x20xf32> to vector<17x20xf32>
    %239 = arith.addf %238, %236 : vector<17x20xf32>
    %cst_177 = arith.constant dense<0.000000e+00> : vector<17xf32>
    %240 = vector.multi_reduction <add>, %239, %cst_177 [1] : vector<17x20xf32> to vector<17xf32>
    %241 = vector.shape_cast %240 : vector<17xf32> to vector<17x1xf32>
    %cst_178 = arith.constant 2.000000e+01 : f32
    %242 = vector.broadcast %cst_178 : f32 to vector<17x1xf32>
    %243 = arith.divf %241, %242 : vector<17x1xf32>
    %244 = vector.broadcast %243 : vector<17x1xf32> to vector<17x20xf32>
    %245 = arith.subf %239, %244 : vector<17x20xf32>
    %246 = arith.mulf %245, %245 : vector<17x20xf32>
    %cst_179 = arith.constant dense<0.000000e+00> : vector<17xf32>
    %247 = vector.multi_reduction <add>, %246, %cst_179 [1] : vector<17x20xf32> to vector<17xf32>
    %248 = vector.shape_cast %247 : vector<17xf32> to vector<17x1xf32>
    %cst_180 = arith.constant 2.000000e+01 : f32
    %249 = vector.broadcast %cst_180 : f32 to vector<17x1xf32>
    %250 = arith.divf %248, %249 : vector<17x1xf32>
    %cst_181 = arith.constant 9.99999974E-6 : f32
    %251 = vector.broadcast %cst_181 : f32 to vector<17x1xf32>
    %252 = arith.addf %250, %251 : vector<17x1xf32>
    %253 = math.rsqrt %252 : vector<17x1xf32>
    %254 = vector.broadcast %253 : vector<17x1xf32> to vector<17x20xf32>
    %255 = arith.mulf %245, %254 : vector<17x20xf32>
    %256 = vector.broadcast %20 : vector<1x20xf32> to vector<17x20xf32>
    %257 = arith.mulf %255, %256 : vector<17x20xf32>
    %258 = vector.broadcast %22 : vector<1x20xf32> to vector<17x20xf32>
    %259 = arith.addf %257, %258 : vector<17x20xf32>
    %c0_182 = arith.constant 0 : index
    %c0_183 = arith.constant 0 : index
    %c0_184 = arith.constant 0 : index
    %260 = vector.load %arg17[%c0_182, %c0_183, %c0_184] : memref<1x20x2048xf32, #tpu.memory_space<vmem>>, vector<1x20x512xf32>
    %261 = vector.shape_cast %260 : vector<1x20x512xf32> to vector<20x512xf32>
    %c0_185 = arith.constant 0 : index
    %c0_186 = arith.constant 0 : index
    %c0_187 = arith.constant 0 : index
    %262 = vector.load %arg18[%c0_185, %c0_186, %c0_187] : memref<1x1x2048xf32, #tpu.memory_space<vmem>>, vector<1x1x512xf32>
    %263 = vector.shape_cast %262 : vector<1x1x512xf32> to vector<1x512xf32>
    %cst_188 = arith.constant dense<0.000000e+00> : vector<17x512xf32>
    %264 = tpu.matmul %259, %261, %cst_188 {dimension_numbers = #tpu.dot_dimension_numbers<[1], [0], [0], [1], [0, 0, 1, 1], [], []>} : vector<17x20xf32>, vector<20x512xf32>, vector<17x512xf32> -> vector<17x512xf32>
    %265 = vector.broadcast %263 : vector<1x512xf32> to vector<17x512xf32>
    %266 = arith.addf %264, %265 : vector<17x512xf32>
    %cst_189 = arith.constant 0.000000e+00 : f32
    %267 = vector.broadcast %cst_189 : f32 to vector<17x512xf32>
    %268 = arith.maximumf %266, %267 : vector<17x512xf32>
    %c0_190 = arith.constant 0 : index
    %c0_191 = arith.constant 0 : index
    %c0_192 = arith.constant 0 : index
    %269 = vector.load %arg19[%c0_190, %c0_191, %c0_192] : memref<1x2048x20xf32, #tpu.memory_space<vmem>>, vector<1x512x20xf32>
    %270 = vector.shape_cast %269 : vector<1x512x20xf32> to vector<512x20xf32>
    %cst_193 = arith.constant dense<0.000000e+00> : vector<17x20xf32>
    %271 = tpu.matmul %268, %270, %cst_193 {dimension_numbers = #tpu.dot_dimension_numbers<[1], [0], [0], [1], [0, 0, 1, 1], [], []>} : vector<17x512xf32>, vector<512x20xf32>, vector<17x20xf32> -> vector<17x20xf32>
    %c0_194 = arith.constant 0 : index
    %c0_195 = arith.constant 0 : index
    %c512_196 = arith.constant 512 : index
    %272 = vector.load %arg17[%c0_194, %c0_195, %c512_196] : memref<1x20x2048xf32, #tpu.memory_space<vmem>>, vector<1x20x512xf32>
    %273 = vector.shape_cast %272 : vector<1x20x512xf32> to vector<20x512xf32>
    %c0_197 = arith.constant 0 : index
    %c0_198 = arith.constant 0 : index
    %c512_199 = arith.constant 512 : index
    %274 = vector.load %arg18[%c0_197, %c0_198, %c512_199] : memref<1x1x2048xf32, #tpu.memory_space<vmem>>, vector<1x1x512xf32>
    %275 = vector.shape_cast %274 : vector<1x1x512xf32> to vector<1x512xf32>
    %cst_200 = arith.constant dense<0.000000e+00> : vector<17x512xf32>
    %276 = tpu.matmul %259, %273, %cst_200 {dimension_numbers = #tpu.dot_dimension_numbers<[1], [0], [0], [1], [0, 0, 1, 1], [], []>} : vector<17x20xf32>, vector<20x512xf32>, vector<17x512xf32> -> vector<17x512xf32>
    %277 = vector.broadcast %275 : vector<1x512xf32> to vector<17x512xf32>
    %278 = arith.addf %276, %277 : vector<17x512xf32>
    %cst_201 = arith.constant 0.000000e+00 : f32
    %279 = vector.broadcast %cst_201 : f32 to vector<17x512xf32>
    %280 = arith.maximumf %278, %279 : vector<17x512xf32>
    %c0_202 = arith.constant 0 : index
    %c512_203 = arith.constant 512 : index
    %c0_204 = arith.constant 0 : index
    %281 = vector.load %arg19[%c0_202, %c512_203, %c0_204] : memref<1x2048x20xf32, #tpu.memory_space<vmem>>, vector<1x512x20xf32>
    %282 = vector.shape_cast %281 : vector<1x512x20xf32> to vector<512x20xf32>
    %cst_205 = arith.constant dense<0.000000e+00> : vector<17x20xf32>
    %283 = tpu.matmul %280, %282, %cst_205 {dimension_numbers = #tpu.dot_dimension_numbers<[1], [0], [0], [1], [0, 0, 1, 1], [], []>} : vector<17x512xf32>, vector<512x20xf32>, vector<17x20xf32> -> vector<17x20xf32>
    %284 = arith.addf %271, %283 : vector<17x20xf32>
    %c0_206 = arith.constant 0 : index
    %c0_207 = arith.constant 0 : index
    %c1024_208 = arith.constant 1024 : index
    %285 = vector.load %arg17[%c0_206, %c0_207, %c1024_208] : memref<1x20x2048xf32, #tpu.memory_space<vmem>>, vector<1x20x512xf32>
    %286 = vector.shape_cast %285 : vector<1x20x512xf32> to vector<20x512xf32>
    %c0_209 = arith.constant 0 : index
    %c0_210 = arith.constant 0 : index
    %c1024_211 = arith.constant 1024 : index
    %287 = vector.load %arg18[%c0_209, %c0_210, %c1024_211] : memref<1x1x2048xf32, #tpu.memory_space<vmem>>, vector<1x1x512xf32>
    %288 = vector.shape_cast %287 : vector<1x1x512xf32> to vector<1x512xf32>
    %cst_212 = arith.constant dense<0.000000e+00> : vector<17x512xf32>
    %289 = tpu.matmul %259, %286, %cst_212 {dimension_numbers = #tpu.dot_dimension_numbers<[1], [0], [0], [1], [0, 0, 1, 1], [], []>} : vector<17x20xf32>, vector<20x512xf32>, vector<17x512xf32> -> vector<17x512xf32>
    %290 = vector.broadcast %288 : vector<1x512xf32> to vector<17x512xf32>
    %291 = arith.addf %289, %290 : vector<17x512xf32>
    %cst_213 = arith.constant 0.000000e+00 : f32
    %292 = vector.broadcast %cst_213 : f32 to vector<17x512xf32>
    %293 = arith.maximumf %291, %292 : vector<17x512xf32>
    %c0_214 = arith.constant 0 : index
    %c1024_215 = arith.constant 1024 : index
    %c0_216 = arith.constant 0 : index
    %294 = vector.load %arg19[%c0_214, %c1024_215, %c0_216] : memref<1x2048x20xf32, #tpu.memory_space<vmem>>, vector<1x512x20xf32>
    %295 = vector.shape_cast %294 : vector<1x512x20xf32> to vector<512x20xf32>
    %cst_217 = arith.constant dense<0.000000e+00> : vector<17x20xf32>
    %296 = tpu.matmul %293, %295, %cst_217 {dimension_numbers = #tpu.dot_dimension_numbers<[1], [0], [0], [1], [0, 0, 1, 1], [], []>} : vector<17x512xf32>, vector<512x20xf32>, vector<17x20xf32> -> vector<17x20xf32>
    %297 = arith.addf %284, %296 : vector<17x20xf32>
    %c0_218 = arith.constant 0 : index
    %c0_219 = arith.constant 0 : index
    %c1536_220 = arith.constant 1536 : index
    %298 = vector.load %arg17[%c0_218, %c0_219, %c1536_220] : memref<1x20x2048xf32, #tpu.memory_space<vmem>>, vector<1x20x512xf32>
    %299 = vector.shape_cast %298 : vector<1x20x512xf32> to vector<20x512xf32>
    %c0_221 = arith.constant 0 : index
    %c0_222 = arith.constant 0 : index
    %c1536_223 = arith.constant 1536 : index
    %300 = vector.load %arg18[%c0_221, %c0_222, %c1536_223] : memref<1x1x2048xf32, #tpu.memory_space<vmem>>, vector<1x1x512xf32>
    %301 = vector.shape_cast %300 : vector<1x1x512xf32> to vector<1x512xf32>
    %cst_224 = arith.constant dense<0.000000e+00> : vector<17x512xf32>
    %302 = tpu.matmul %259, %299, %cst_224 {dimension_numbers = #tpu.dot_dimension_numbers<[1], [0], [0], [1], [0, 0, 1, 1], [], []>} : vector<17x20xf32>, vector<20x512xf32>, vector<17x512xf32> -> vector<17x512xf32>
    %303 = vector.broadcast %301 : vector<1x512xf32> to vector<17x512xf32>
    %304 = arith.addf %302, %303 : vector<17x512xf32>
    %cst_225 = arith.constant 0.000000e+00 : f32
    %305 = vector.broadcast %cst_225 : f32 to vector<17x512xf32>
    %306 = arith.maximumf %304, %305 : vector<17x512xf32>
    %c0_226 = arith.constant 0 : index
    %c1536_227 = arith.constant 1536 : index
    %c0_228 = arith.constant 0 : index
    %307 = vector.load %arg19[%c0_226, %c1536_227, %c0_228] : memref<1x2048x20xf32, #tpu.memory_space<vmem>>, vector<1x512x20xf32>
    %308 = vector.shape_cast %307 : vector<1x512x20xf32> to vector<512x20xf32>
    %cst_229 = arith.constant dense<0.000000e+00> : vector<17x20xf32>
    %309 = tpu.matmul %306, %308, %cst_229 {dimension_numbers = #tpu.dot_dimension_numbers<[1], [0], [0], [1], [0, 0, 1, 1], [], []>} : vector<17x512xf32>, vector<512x20xf32>, vector<17x20xf32> -> vector<17x20xf32>
    %310 = arith.addf %297, %309 : vector<17x20xf32>
    %311 = vector.broadcast %28 : vector<1x20xf32> to vector<17x20xf32>
    %312 = arith.addf %310, %311 : vector<17x20xf32>
    %313 = arith.addf %259, %312 : vector<17x20xf32>
    %cst_230 = arith.constant dense<0.000000e+00> : vector<17xf32>
    %314 = vector.multi_reduction <add>, %313, %cst_230 [1] : vector<17x20xf32> to vector<17xf32>
    %315 = vector.shape_cast %314 : vector<17xf32> to vector<17x1xf32>
    %cst_231 = arith.constant 2.000000e+01 : f32
    %316 = vector.broadcast %cst_231 : f32 to vector<17x1xf32>
    %317 = arith.divf %315, %316 : vector<17x1xf32>
    %318 = vector.broadcast %317 : vector<17x1xf32> to vector<17x20xf32>
    %319 = arith.subf %313, %318 : vector<17x20xf32>
    %320 = arith.mulf %319, %319 : vector<17x20xf32>
    %cst_232 = arith.constant dense<0.000000e+00> : vector<17xf32>
    %321 = vector.multi_reduction <add>, %320, %cst_232 [1] : vector<17x20xf32> to vector<17xf32>
    %322 = vector.shape_cast %321 : vector<17xf32> to vector<17x1xf32>
    %cst_233 = arith.constant 2.000000e+01 : f32
    %323 = vector.broadcast %cst_233 : f32 to vector<17x1xf32>
    %324 = arith.divf %322, %323 : vector<17x1xf32>
    %cst_234 = arith.constant 9.99999974E-6 : f32
    %325 = vector.broadcast %cst_234 : f32 to vector<17x1xf32>
    %326 = arith.addf %324, %325 : vector<17x1xf32>
    %327 = math.rsqrt %326 : vector<17x1xf32>
    %328 = vector.broadcast %327 : vector<17x1xf32> to vector<17x20xf32>
    %329 = arith.mulf %319, %328 : vector<17x20xf32>
    %330 = vector.broadcast %24 : vector<1x20xf32> to vector<17x20xf32>
    %331 = arith.mulf %329, %330 : vector<17x20xf32>
    %332 = vector.broadcast %26 : vector<1x20xf32> to vector<17x20xf32>
    %333 = arith.addf %331, %332 : vector<17x20xf32>
    %c1_235 = arith.constant 1 : index
    %c0_236 = arith.constant 0 : index
    %c0_237 = arith.constant 0 : index
    %334 = vector.load %arg26[%c1_235, %c0_236, %c0_237] : memref<2x17x20xf32, #tpu.memory_space<vmem>>, vector<1x17x20xf32>
    %335 = vector.shape_cast %334 : vector<1x17x20xf32> to vector<17x20xf32>
    %336 = vector.shape_cast %333 : vector<17x20xf32> to vector<1x17x20xf32>
    tpu.vector_store %arg26[%c1_235, %c0_236, %c0_237], %336 {strides = array<i32>} : memref<2x17x20xf32, #tpu.memory_space<vmem>>, vector<1x17x20xf32>,
    %c5_i32 = arith.constant 5 : i32
    %337 = arith.cmpi eq, %arg0, %c5_i32 : i32
    %338 = arith.extui %337 : i1 to i32
    %c0_i32_238 = arith.constant 0 : i32
    %339 = arith.cmpi ne, %338, %c0_i32_238 : i32
    scf.if %339 {
      %c0_239 = arith.constant 0 : index
      %c0_240 = arith.constant 0 : index
      %340 = vector.load %arg23[%c0_239, %c0_240] : memref<20x10xf32, #tpu.memory_space<vmem>>, vector<20x10xf32>
      %c0_241 = arith.constant 0 : index
      %c0_242 = arith.constant 0 : index
      %341 = vector.load %arg24[%c0_241, %c0_242] : memref<1x10xf32, #tpu.memory_space<vmem>>, vector<1x10xf32>
      %c0_243 = arith.constant 0 : index
      %c0_244 = arith.constant 0 : index
      %c0_245 = arith.constant 0 : index
      %342 = vector.load %arg26[%c0_243, %c0_244, %c0_245] : memref<2x17x20xf32, #tpu.memory_space<vmem>>, vector<1x1x20xf32>
      %343 = vector.shape_cast %342 : vector<1x1x20xf32> to vector<1x20xf32>
      %cst_246 = arith.constant dense<0.000000e+00> : vector<1x10xf32>
      %344 = tpu.matmul %343, %340, %cst_246 {dimension_numbers = #tpu.dot_dimension_numbers<[1], [0], [0], [1], [0, 0, 1, 1], [], []>} : vector<1x20xf32>, vector<20x10xf32>, vector<1x10xf32> -> vector<1x10xf32>
      %345 = arith.addf %344, %341 : vector<1x10xf32>
      %c0_247 = arith.constant 0 : index
      %c0_248 = arith.constant 0 : index
      %346 = vector.load %arg25[%c0_247, %c0_248] : memref<2x10xf32, #tpu.memory_space<vmem>>, vector<1x10xf32>
      tpu.vector_store %arg25[%c0_247, %c0_248], %345 {strides = array<i32>} : memref<2x10xf32, #tpu.memory_space<vmem>>, vector<1x10xf32>,
      %c1_249 = arith.constant 1 : index
      %c0_250 = arith.constant 0 : index
      %c0_251 = arith.constant 0 : index
      %347 = vector.load %arg26[%c1_249, %c0_250, %c0_251] : memref<2x17x20xf32, #tpu.memory_space<vmem>>, vector<1x1x20xf32>
      %348 = vector.shape_cast %347 : vector<1x1x20xf32> to vector<1x20xf32>
      %cst_252 = arith.constant dense<0.000000e+00> : vector<1x10xf32>
      %349 = tpu.matmul %348, %340, %cst_252 {dimension_numbers = #tpu.dot_dimension_numbers<[1], [0], [0], [1], [0, 0, 1, 1], [], []>} : vector<1x20xf32>, vector<20x10xf32>, vector<1x10xf32> -> vector<1x10xf32>
      %350 = arith.addf %349, %341 : vector<1x10xf32>
      %c1_253 = arith.constant 1 : index
      %c0_254 = arith.constant 0 : index
      %351 = vector.load %arg25[%c1_253, %c0_254] : memref<2x10xf32, #tpu.memory_space<vmem>>, vector<1x10xf32>
      tpu.vector_store %arg25[%c1_253, %c0_254], %350 {strides = array<i32>} : memref<2x10xf32, #tpu.memory_space<vmem>>, vector<1x10xf32>,
    } else {
    }
    return
  }
  func.func @transform_0(%arg0: i32) -> (i32, i32) {
    %c0_i32 = arith.constant 0 : i32
    %c0_i32_0 = arith.constant 0 : i32
    %c0_i32_1 = arith.constant 0 : i32
    return %c0_i32, %c0_i32_0 : i32, i32
  }
  func.func @transform_1(%arg0: i32) -> (i32, i32) {
    %c0_i32 = arith.constant 0 : i32
    %c0_i32_0 = arith.constant 0 : i32
    %c0_i32_1 = arith.constant 0 : i32
    return %c0_i32, %c0_i32_0 : i32, i32
  }
  func.func @transform_2(%arg0: i32) -> (i32, i32) {
    %c0_i32 = arith.constant 0 : i32
    %c0_i32_0 = arith.constant 0 : i32
    %c0_i32_1 = arith.constant 0 : i32
    return %c0_i32, %c0_i32_0 : i32, i32
  }
  func.func @transform_3(%arg0: i32) -> (i32, i32) {
    %c0_i32 = arith.constant 0 : i32
    %c0_i32_0 = arith.constant 0 : i32
    %c0_i32_1 = arith.constant 0 : i32
    return %c0_i32, %c0_i32_0 : i32, i32
  }
  func.func @transform_4(%arg0: i32) -> (i32, i32) {
    %c0_i32 = arith.constant 0 : i32
    %c0_i32_0 = arith.constant 0 : i32
    %c0_i32_1 = arith.constant 0 : i32
    return %c0_i32, %c0_i32_0 : i32, i32
  }
  func.func @transform_5(%arg0: i32) -> (i32, i32) {
    %c0_i32 = arith.constant 0 : i32
    %c0_i32_0 = arith.constant 0 : i32
    %c0_i32_1 = arith.constant 0 : i32
    return %c0_i32, %c0_i32_0 : i32, i32
  }
  func.func @transform_6(%arg0: i32) -> (i32, i32, i32) {
    %c0_i32 = arith.constant 0 : i32
    %c0_i32_0 = arith.constant 0 : i32
    %c0_i32_1 = arith.constant 0 : i32
    return %arg0, %c0_i32, %c0_i32_0 : i32, i32, i32
  }
  func.func @transform_7(%arg0: i32) -> (i32, i32, i32) {
    %c0_i32 = arith.constant 0 : i32
    %c0_i32_0 = arith.constant 0 : i32
    %c0_i32_1 = arith.constant 0 : i32
    return %arg0, %c0_i32, %c0_i32_0 : i32, i32, i32
  }
  func.func @transform_8(%arg0: i32) -> (i32, i32, i32) {
    %c0_i32 = arith.constant 0 : i32
    %c0_i32_0 = arith.constant 0 : i32
    %c0_i32_1 = arith.constant 0 : i32
    return %arg0, %c0_i32, %c0_i32_0 : i32, i32, i32
  }
  func.func @transform_9(%arg0: i32) -> (i32, i32, i32) {
    %c0_i32 = arith.constant 0 : i32
    %c0_i32_0 = arith.constant 0 : i32
    %c0_i32_1 = arith.constant 0 : i32
    return %arg0, %c0_i32, %c0_i32_0 : i32, i32, i32
  }
  func.func @transform_10(%arg0: i32) -> (i32, i32, i32) {
    %c0_i32 = arith.constant 0 : i32
    %c0_i32_0 = arith.constant 0 : i32
    %c0_i32_1 = arith.constant 0 : i32
    return %arg0, %c0_i32, %c0_i32_0 : i32, i32, i32
  }
  func.func @transform_11(%arg0: i32) -> (i32, i32, i32) {
    %c0_i32 = arith.constant 0 : i32
    %c0_i32_0 = arith.constant 0 : i32
    %c0_i32_1 = arith.constant 0 : i32
    return %arg0, %c0_i32, %c0_i32_0 : i32, i32, i32
  }
  func.func @transform_12(%arg0: i32) -> (i32, i32, i32) {
    %c0_i32 = arith.constant 0 : i32
    %c0_i32_0 = arith.constant 0 : i32
    %c0_i32_1 = arith.constant 0 : i32
    return %arg0, %c0_i32, %c0_i32_0 : i32, i32, i32
  }
  func.func @transform_13(%arg0: i32) -> (i32, i32, i32) {
    %c0_i32 = arith.constant 0 : i32
    %c0_i32_0 = arith.constant 0 : i32
    %c0_i32_1 = arith.constant 0 : i32
    return %arg0, %c0_i32, %c0_i32_0 : i32, i32, i32
  }
  func.func @transform_14(%arg0: i32) -> (i32, i32, i32) {
    %c0_i32 = arith.constant 0 : i32
    %c0_i32_0 = arith.constant 0 : i32
    %c0_i32_1 = arith.constant 0 : i32
    return %arg0, %c0_i32, %c0_i32_0 : i32, i32, i32
  }
  func.func @transform_15(%arg0: i32) -> (i32, i32, i32) {
    %c0_i32 = arith.constant 0 : i32
    %c0_i32_0 = arith.constant 0 : i32
    %c0_i32_1 = arith.constant 0 : i32
    return %arg0, %c0_i32, %c0_i32_0 : i32, i32, i32
  }
  func.func @transform_16(%arg0: i32) -> (i32, i32, i32) {
    %c0_i32 = arith.constant 0 : i32
    %c0_i32_0 = arith.constant 0 : i32
    %c0_i32_1 = arith.constant 0 : i32
    return %arg0, %c0_i32, %c0_i32_0 : i32, i32, i32
  }
  func.func @transform_17(%arg0: i32) -> (i32, i32, i32) {
    %c0_i32 = arith.constant 0 : i32
    %c0_i32_0 = arith.constant 0 : i32
    %c0_i32_1 = arith.constant 0 : i32
    return %arg0, %c0_i32, %c0_i32_0 : i32, i32, i32
  }
  func.func @transform_18(%arg0: i32) -> (i32, i32, i32) {
    %c0_i32 = arith.constant 0 : i32
    %c0_i32_0 = arith.constant 0 : i32
    %c0_i32_1 = arith.constant 0 : i32
    return %arg0, %c0_i32, %c0_i32_0 : i32, i32, i32
  }
  func.func @transform_19(%arg0: i32) -> (i32, i32, i32) {
    %c0_i32 = arith.constant 0 : i32
    %c0_i32_0 = arith.constant 0 : i32
    %c0_i32_1 = arith.constant 0 : i32
    return %arg0, %c0_i32, %c0_i32_0 : i32, i32, i32
  }
  func.func @transform_20(%arg0: i32) -> (i32, i32, i32) {
    %c0_i32 = arith.constant 0 : i32
    %c0_i32_0 = arith.constant 0 : i32
    %c0_i32_1 = arith.constant 0 : i32
    return %arg0, %c0_i32, %c0_i32_0 : i32, i32, i32
  }
  func.func @transform_21(%arg0: i32) -> (i32, i32, i32) {
    %c0_i32 = arith.constant 0 : i32
    %c0_i32_0 = arith.constant 0 : i32
    %c0_i32_1 = arith.constant 0 : i32
    return %arg0, %c0_i32, %c0_i32_0 : i32, i32, i32
  }
  func.func @transform_22(%arg0: i32) -> (i32, i32) {
    %c0_i32 = arith.constant 0 : i32
    %c0_i32_0 = arith.constant 0 : i32
    %c0_i32_1 = arith.constant 0 : i32
    return %c0_i32, %c0_i32_0 : i32, i32
  }
  func.func @transform_23(%arg0: i32) -> (i32, i32) {
    %c0_i32 = arith.constant 0 : i32
    %c0_i32_0 = arith.constant 0 : i32
    %c0_i32_1 = arith.constant 0 : i32
    return %c0_i32, %c0_i32_0 : i32, i32
  }
  func.func @transform_24(%arg0: i32) -> (i32, i32) {
    %c0_i32 = arith.constant 0 : i32
    %c0_i32_0 = arith.constant 0 : i32
    %c0_i32_1 = arith.constant 0 : i32
    return %c0_i32, %c0_i32_0 : i32, i32
  }
}

</mosaic_0001>

<bundles_post_ra>
// kernel: mini_model_forward.1
= control target key start
LH: loop header
LB: loop body
LE: loop exit
PB: predicated region body
PF: predicated region fallthrough
CT: control target
= control target key end

     0   :  { %s10678_s0 = inlined_call_operand.vmem [shape: f32[32,16], index: 0, kind: input, shape index: {}]   ;;  %s10679_s1 = inlined_call_operand.vmem [shape: f32[16,20], index: 1, kind: input, shape index: {}]   ;;  %s10680_s2 = inlined_call_operand.vmem [shape: f32[2,20], index: 2, kind: input, shape index: {}]   ;;  %s10681_s3 = inlined_call_operand.vmem [shape: f32[17,20], index: 3, kind: input, shape index: {}]   ;;  %s10682_s4 = inlined_call_operand.vmem [shape: f32[20,10], index: 4, kind: input, shape index: {}]   ;;  %s10683_s5 = inlined_call_operand.vmem [shape: f32[10,20], index: 5, kind: input, shape index: {}]   ;;  %s10684_s6 = inlined_call_operand.vmem [shape: f32[6,20,20], index: 6, kind: input, shape index: {}]   ;;  %s10685_s7 = inlined_call_operand.vmem [shape: f32[6,1,20], index: 7, kind: input, shape index: {}]   ;;  %s10686_s8 = inlined_call_operand.vmem [shape: f32[6,20,20], index: 8, kind: input, shape index: {}]   ;;  %s10687_s9 = inlined_call_operand.vmem [shape: f32[6,1,20], index: 9, kind: input, shape index: {}]   ;;  %s10688_s10 = inlined_call_operand.vmem [shape: f32[6,20,20], index: 10, kind: input, shape index: {}]   ;;  %s10689_s11 = inlined_call_operand.vmem [shape: f32[6,1,20], index: 11, kind: input, shape index: {}]   ;;  %s10690_s12 = inlined_call_operand.vmem [shape: f32[6,20,20], index: 12, kind: input, shape index: {}]   ;;  %s10691_s13 = inlined_call_operand.vmem [shape: f32[6,1,20], index: 13, kind: input, shape index: {}]   ;;  %s10692_s14 = inlined_call_operand.vmem [shape: f32[6,1,20], index: 14, kind: input, shape index: {}]   ;;  %s10693_s15 = inlined_call_operand.vmem [shape: f32[6,1,20], index: 15, kind: input, shape index: {}]   ;;  %s10694_s16 = inlined_call_operand.vmem [shape: f32[6,20,2048], index: 16, kind: input, shape index: {}]   ;;  %s10695_s17 = inlined_call_operand.vmem [shape: f32[6,1,2048], index: 17, kind: input, shape index: {}]   ;;  %s10696_s18 = inlined_call_operand.vmem [shape: f32[6,2048,20], index: 18, kind: input, shape index: {}]   ;;  %s10697_s19 = inlined_call_operand.vmem [shape: f32[6,1,20], index: 19, kind: input, shape index: {}]   ;;  %s10698_s20 = inlined_call_operand.vmem [shape: f32[6,1,20], index: 20, kind: input, shape index: {}]   ;;  %s10699_s21 = inlined_call_operand.vmem [shape: f32[6,1,20], index: 21, kind: input, shape index: {}]   ;;  %s10700_s22 = inlined_call_operand.vmem [shape: f32[20,10], index: 22, kind: input, shape index: {}]   ;;  %s10701_s23 = inlined_call_operand.vmem [shape: f32[1,10], index: 23, kind: input, shape index: {}]   ;;  %s10702_s24 = inlined_call_operand.hbm [shape: f32[2,10], index: 24, kind: output, shape index: {}]  }
   0x1   :  { %10715 = sst [smem:[#allocation13_spill]] %s10678_s0 }
   0x2   :  { %10716 = sst [smem:[#allocation14_spill]] %s10679_s1 }
   0x3   :  { %10717 = sst [smem:[#allocation15_spill]] %s10680_s2 }
   0x4   :  { %10718 = sst [smem:[#allocation16_spill]] %s10681_s3 }
   0x5   :  { %10719 = sst [smem:[#allocation17_spill]] %s10682_s4 }
   0x6   :  { %10720 = sst [smem:[#allocation18_spill]] %s10683_s5 }
   0x7   :  { %10721 = sst [smem:[#allocation19_spill]] %s10684_s6 }
   0x8   :  { %10722 = sst [smem:[#allocation20_spill]] %s10685_s7 }
   0x9   :  { %10723 = sst [smem:[#allocation21_spill]] %s10686_s8 }
   0xa   :  { %10724 = sst [smem:[#allocation22_spill]] %s10688_s10 }
   0xb   :  { %10725 = sst [smem:[#allocation23_spill]] %s10690_s12 }
   0xc   :  { %10726 = sst [smem:[#allocation24_spill]] %s10691_s13 }
   0xd   :  { %10727 = sst [smem:[#allocation25_spill]] %s10692_s14 }
   0xe   :  { %10728 = sst [smem:[#allocation26_spill]] %s10693_s15 }
   0xf   :  { %10729 = sst [smem:[#allocation27_spill]] %s10694_s16 }
  0x10   :  { %10730 = sst [smem:[#allocation28_spill]] %s10695_s17 }
  0x11   :  { %10731 = sst [smem:[#allocation29_spill]] %s10700_s22 }
  0x12   :  { %10732 = sst [smem:[#allocation30_spill]] %s10701_s23 }
  0x13   :  { %10733 = sst [smem:[#allocation31_spill]] %s10702_s24 }
  0x14   :  { %29 = vsyncpa [#allocation7], 0  ;;  %s9048_s5 = smov 0  }
  0x15 LB: > { %10734 = sst [smem:[#allocation9_spill]] %s8913_s5  ;;  %s9054_s26 = sadd.s32 4294967295, %s8913_s5   ;;  %s8913_s5 = sphi %s9048_s5, %s35_s5  }
  0x16   : > { %10735 = sst [smem:[#allocation10_spill]] %s9054_s26  ;;  %p6948_p0 = scmp.ge.s32.totalorder %s8913_s5, 1 }
  0x17   : > { %p789_p1 = scmp.lt.s32.totalorder %s8913_s5, 7 }
  0x19   : > { %p790_p2 = pnand %p6948_p0, %p789_p1 }
  0x1b   : > { %793 = sbr.rel (%p790_p2) target bundleno = 4771 (0x12a3), region = 116 }
  0x22   : > { %p906_p3 = scmp.lt.s32.totalorder %s9054_s26, 5  ;;  %s10737_s24 = sld [smem:[#allocation19_spill]] }
  0x23   : > { %s10738_s6 = sld [smem:[#allocation21_spill]]  ;;  %s10739_s10 = sld [smem:[#allocation22_spill]] }
  0x24   : > { %s9060_s27 = scalar_select %p906_p3, %s9054_s26, 5 }
  0x25   : > { %s10740_s12 = sld [smem:[#allocation23_spill]]  ;;  %s10741_s13 = sld [smem:[#allocation24_spill]] }
  0x26   : > { %s8787_s28 = smul.u32 24, %s9060_s27  ;;  %s10742_s14 = sld [smem:[#allocation25_spill]] }
  0x27   : > { %s10744_s15 = sld [smem:[#allocation26_spill]]  ;;  %s8788_s7 = smul.u32 384, %s9060_s27 }
  0x28   : > { %s9078_s23 = scalar_lea.vmem %s10737_s24, %s8787_s28  ;;  %s7124_s3 = sshll.u32 %s9060_s27, 11 }
  0x29   : > { %s9083_s2 = scalar_lea.vmem %s10738_s6, %s8787_s28  ;;  %s9088_s30 = scalar_lea.vmem %s10739_s10, %s8787_s28 }
  0x2a   : > { %s6954_s10 = sshll.u32 %s9060_s27, 4  ;;  %s10746_s16 = sld [smem:[#allocation27_spill]] }
  0x2b   : > { %s9093_s8 = scalar_lea.vmem %s10740_s12, %s8787_s28  ;;  %s9099_s24 = scalar_lea.vmem %s10741_s13, %s9060_s27 }
  0x2c   : > { %s9105_s22 = scalar_lea.vmem %s10742_s14, %s9060_s27  ;;  %s10747_s17 = sld [smem:[#allocation28_spill]] }
  0x2d   : > { %10743 = sst [smem:[#allocation11_spill]] %s9105_s22  ;;  %s9111_s29 = scalar_lea.vmem %s10744_s15, %s9060_s27 }
  0x2e   : > { %10745 = sst [smem:[#allocation12_spill]] %s9111_s29  ;;  %s9129_s14 = scalar_lea.vmem %s10696_s18, %s7124_s3 }
  0x2f   : > { %s9135_s15 = scalar_lea.vmem %s10697_s19, %s9060_s27  ;;  %s966_s4 = scalar_lea.vmem %s10699_s21, %s9060_s27 }
  0x30   : > { %s9119_s12 = scalar_lea.vmem %s10746_s16, %s8788_s7  ;;  %s963_s7 = scalar_lea.vmem %s10698_s20, %s9060_s27 }
  0x32   : > { %s9124_s13 = scalar_lea.vmem %s10747_s17, %s6954_s10  ;;  %s10748_s10 = sld [smem:[#allocation10_spill]] }
  0x38   : > { %p6957_p4 = scmp.ne.s32.totalorder %s10748_s10, 0 }
  0x39   : > { %s10749_s3 = sld [smem:[#allocation14_spill]] (!%p6957_p4)  ;;  %s10750_s17 = sld [smem:[#allocation13_spill]] (!%p6957_p4)  ;;  %vm977_vm0 = vcmask (!%p6957_p4), 130048   ;;  %vm1080_vm1 = vcmask (!%p6957_p4), 155648   ;;  %vm1102_vm2 = vcmask (!%p6957_p4), 156673   ;;  %vm1085_vm3 = vcmask (!%p6957_p4), 1046528  }
  0x3a   : > { %970 = sbr.rel (%p6957_p4) target bundleno = 286 (0x11e), region = 120  ;;  %s10751_s1 = sld [smem:[#allocation16_spill]] (!%p6957_p4)  ;;  %vm1095_vm4 = vcmask (!%p6957_p4), 162816  }
  0x3b   : > { %s10752_s22 = sld [smem:[#allocation15_spill]] (!%p6957_p4) }
  0x3f   : > { %v975_v0 = vld [vmem:[%s10749_s3] sm:$0xff] (!%p6957_p4)  ;;  %v976_v1 = vld [vmem:[%s10749_s3 + $0x8] sm:$0xff] (!%p6957_p4)  ;;  %v973_v4 = vld [vmem:[%s10750_s17 + $0x10] sm:$0xff] (!%p6957_p4) }
  0x40   : > { %v971_v2 = vld [vmem:[%s10750_s17] sm:$0xff] (!%p6957_p4)  ;;  %v8147_v3 = vpack.c.bf16 (!%p6957_p4), %v976_v1, %v975_v0  ;;  %7894 = vmatprep.mubr.msk.f32.mxu1 (!%p6957_p4), %vm977_vm0, %v973_v4  ;;  %v972_v5 = vld [vmem:[%s10750_s17 + $0x8] sm:$0xff] (!%p6957_p4)  ;;  %v974_v6 = vld [vmem:[%s10750_s17 + $0x18] sm:$0xff] (!%p6957_p4) }
  0x41   : > { %7891 = vmatprep.mubr.msk.f32.mxu0 %vm977_vm0, %v971_v2  ;;  %v1075_v7 = vld [vmem:[%s10751_s1] sm:$0xff]  ;;  %v1076_v12 = vld [vmem:[%s10751_s1 + $0x8] sm:$0xff]  ;;  %v1077_v13 = vld [vmem:[%s10751_s1 + $0x10] sm:$0x1] }
  0x42   : > { %8148 = vmatprep.subr.bf16.mxu0 %v8147_v3  ;;  %8785 = vmatprep.subr.bf16.mxu1 %v8147_v3  ;;  %v1098_v8 = vrot.slane %v1075_v7, 7  ;;  %v1078_v9 = vld [vmem:[%s10752_s22] sm:$0x3]  ;;  %v1087_v14 = vrot.slane %v1076_v12, 1  ;;  %v1089_v15 = vrot.slane %v1077_v13, 1  ;;  %v1086_v16 = vrot.slane %v1075_v7, 1 }
  0x43   : > { %8150 = vmatpush3.bf16.msra.mxu0 %v8147_v3  ;;  %8786 = vmatpush3.bf16.msra.mxu1 %v8147_v3  ;;  %v1079_v10 = vadd.f32 %v1078_v9, %v1075_v7 }
  0x44   : > { %v1100_v11 = vadd.f32 %v1098_v8, %v1078_v9  ;;  %v1090_v17 = vsel %vm1085_vm3, %v1087_v14, %v1089_v15  ;;  %v1088_v18 = vsel %vm1085_vm3, %v1086_v16, %v1087_v14 }
  0x45   : > { %1081 = vst.msk [vmem:[#allocation2] sm:$0x1] %vm1080_vm1, %v1079_v10 }
  0x46   : > { %7892 = vmatmul.mubr.msk.f32.vlgmr.msra.gmra.mrb[0].mxu0 %vm977_vm0, %v972_v5  ;;  %7895 = vmatmul.mubr.msk.f32.vlgmr.msra.gmra.mrb[0].mxu1 %vm977_vm0, %v974_v6  ;;  %1103 = vst.msk [vmem:[#allocation2 + $0x17] sm:$0x2] %vm1102_vm2, %v1100_v11 }
 0x119   : > { %v7893_v19 = vpop.f32.mrb[0].mxu0  ;;  %v7896_v20 = vpop.f32.mrb[0].mxu1 }
 0x11a   : > { %v1094_v21 = vadd.f32 %v7893_v19, %v1090_v17  ;;  %v1105_v22 = vadd.f32 %v7896_v20, %v1090_v17  ;;  %v1056_v23 = vpop.f32.mrb[1].mxu0  ;;  %v1066_v24 = vpop.f32.mrb[1].mxu1 }
 0x11b   : > { %v1093_v25 = vadd.f32 %v1088_v18, %v1056_v23  ;;  %v1104_v26 = vadd.f32 %v1088_v18, %v1066_v24 }
 0x11c   : > { %1097 = vst.msk [vmem:[#allocation2 + $0x9] sm:$0xff] %vm1095_vm4, %v1094_v21  ;;  %1107 = vst.msk [vmem:[#allocation2 + $0x21] sm:$0xff] %vm1095_vm4, %v1105_v22 }
 0x11d   : > { %1096 = vst.msk [vmem:[#allocation2 + $0x1] sm:$0xff] %vm1095_vm4, %v1093_v25  ;;  %1106 = vst.msk [vmem:[#allocation2 + $0x19] sm:$0xff] %vm1095_vm4, %v1104_v26 }
 0x11e PF: > { %v1108_v27 = vld [vmem:[%s9078_s23] sm:$0xff]  ;;  %v1109_v28 = vld [vmem:[%s9078_s23 + $0x8] sm:$0xff]  ;;  %v8915_v30 = vmov 0.0|0.0   ;;  %vm8916_vm5 = vmmov 0   ;;  %v8917_v34 = vmov 0.0   ;;  %vm1153_vm6 = vcmask 1043456   ;;  %s10757_s5 = scalar_lea.vmem %s10689_s11, %s9060_s27 }
 0x11f   : > { %v1112_v29 = vld [vmem:[%s9083_s2] sm:$0xff]  ;;  %8151 = vmatprep.subr.bf16.mxu0 %v8915_v30  ;;  %v8152_v31 = vpack.c.bf16 %v1109_v28, %v1108_v27  ;;  %8154 = vmatprep.subr.bf16.mxu1 %v8915_v30  ;;  %v1113_v32 = vld [vmem:[%s9083_s2 + $0x8] sm:$0xff]  ;;  %v1110_v37 = vld [vmem:[%s9078_s23 + $0x10] sm:$0xf]  ;;  %vm1143_vm7 = vcmask 162816   ;;  %s10754_s29 = sld [smem:[#allocation20_spill]]  ;;  %s10756_s23 = scalar_lea.vmem %s10687_s9, %s9060_s27 }
 0x120   : > { %v8155_v33 = vpack.c.bf16 %v1113_v32, %v1112_v29  ;;  %7903 = vmatprep.mubr.msk.f32.mxu0 %vm8916_vm5, %v8917_v34  ;;  %7918 = vmatprep.mubr.msk.f32.mxu1 %vm8916_vm5, %v8917_v34  ;;  %v1116_v35 = vld [vmem:[%s9088_s30] sm:$0xff]  ;;  %v1117_v36 = vld [vmem:[%s9088_s30 + $0x8] sm:$0xff]  ;;  %v1114_v40 = vld [vmem:[%s9083_s2 + $0x10] sm:$0xf]  ;;  %vm1242_vm8 = vcmask 155648   ;;  %s10758_s6 = sld [smem:[#allocation18_spill]] }
 0x121   : > { %8153 = vmatpush3.bf16.msra.mxu0 %v8152_v31  ;;  %v8158_v39 = vpack.c.bf16 %v1117_v36, %v1116_v35  ;;  %v1118_v42 = vld [vmem:[%s9088_s30 + $0x10] sm:$0xf]  ;;  %s10753_s30 = sld [smem:[#allocation17_spill]]  ;;  %v9304_v53 = vld [vmem:[%s10756_s23] ss:$0 sm:$0xff]  ;;  %vm1932_vm9 = vcmask 1041408  }
 0x122   : > { %8156 = vmatpush3.bf16.msra.mxu1 %v8155_v33  ;;  %7901 = vmatprep.subr.mxu0 %v8917_v34  ;;  %v9320_v7 = vld [vmem:[%s10757_s5] ss:$0 sm:$0xff]  ;;  %vm8918_vm10 = vmmov 1   ;;  %vm1922_vm12 = vcmask 80896   ;;  %s10762_s25 = sld [smem:[#allocation12_spill]] }
 0x123   : > { %7916 = vmatprep.subr.mxu1 %v8917_v34  ;;  %v1136_v43 = vld [vmem:[#allocation2 + $0x10] sm:$0x1]  ;;  %v1431_v46 = vld [vmem:[#allocation2 + $0x28] sm:$0x1]  ;;  %vm9375_vm11 = vmpackc.low %vm1932_vm9, %vm8918_vm10 }
 0x124   : > { %v9190_v38 = vld [vmem:[#allocation2] sm:$0xff]  ;;  %v9199_v41 = vld [vmem:[#allocation2 + $0x8] sm:$0xff]  ;;  %v1429_v44 = vld [vmem:[#allocation2 + $0x18] sm:$0xff] }
 0x125   : > { %7902 = vmatpush3.msk.msra.mxu0 %vm1153_vm6, %v1110_v37  ;;  %v1430_v45 = vld [vmem:[#allocation2 + $0x20] sm:$0xff]  ;;  %s10755_s28 = scalar_lea.vmem %s10754_s29, %s9060_s27  ;;  %s10763_s27 = sld [smem:[#allocation10_spill]] }
 0x126   : > { %7904 = vmatmul.mubr.msk.f32.vlgmr.msra.gmra.mrb[0].mxu0 %vm1143_vm7, %v9190_v38  ;;  %8157 = vmatprep.subr.bf16.mxu0 %v8915_v30  ;;  %v9297_v51 = vld [vmem:[%s10755_s28] ss:$0 sm:$0xff]  ;;  %s10761_s28 = sld [smem:[#allocation11_spill]] }
 0x127   : > { %7917 = vmatpush3.msk.msra.mxu1 %vm1153_vm6, %v1114_v40  ;;  %8159 = vmatpush3.bf16.msra.mxu0 %v8158_v39  ;;  %v1129_v47 = vld [vmem:[%s10753_s30] sm:$0xff]  ;;  %v1130_v48 = vld [vmem:[%s10753_s30 + $0x8] sm:$0xff]  ;;  %v1131_v50 = vld [vmem:[%s10753_s30 + $0x10] sm:$0xf] }
 0x128   : > { %7919 = vmatmul.mubr.msk.f32.vlgmr.msra.gmra.mrb[0].mxu1 %vm1143_vm7, %v9190_v38  ;;  %7906 = vmatprep.mubr.msk.f32.mxu0 %vm8916_vm5, %v8917_v34  ;;  %v9279_v49 = vpack.c.bf16 %v1130_v48, %v1129_v47 }
 0x129   : > { %7921 = vmatprep.mubr.msk.f32.mxu1 %vm8916_vm5, %v8917_v34  ;;  %7931 = vmatprep.subr.mxu0 %v8917_v34 }
 0x12a   : > { %7907 = vmatmul.mubr.msk.f32.gmra.mrb[2].mxu0 %vm1143_vm7, %v9199_v41  ;;  %8160 = vmatprep.subr.bf16.mxu1 %v8915_v30 }
 0x12b   : > { %7909 = vmatprep.mubr.msk.f32.mxu0 %vm8916_vm5, %v8917_v34  ;;  %7932 = vmatpush3.msk.msra.mxu0 %vm1153_vm6, %v1118_v42  ;;  %p7115_p5 = scmp.ne.s32.totalorder %s10763_s27, 5 }
 0x12c   : > { %7922 = vmatmul.mubr.msk.f32.gmra.mrb[2].mxu1 %vm1143_vm7, %v9199_v41  ;;  %8163 = vmatprep.subr.bf16.mxu0 %v8915_v30  ;;  %vm8920_vm13 = vmmov (!%p7115_p5), 0   ;;  %s10765_s22 = sld [smem:[#allocation30_spill]] (!%p7115_p5)  ;;  %vm6669_vm14 = vcmask (!%p7115_p5), 73728  }
 0x12d   : > { %7924 = vmatprep.mubr.msk.f32.mxu1 %vm8916_vm5, %v8917_v34  ;;  %8162 = vmatpush3.bf16.msra.mxu1 %v8152_v31 }
 0x12e   : > { %7910 = vmatmul.mubr.msk.f32.gmra.mrb[4].mxu0 %vm1143_vm7, %v1136_v43  ;;  %7946 = vmatprep.subr.mxu1 %v8917_v34 }
 0x12f   : > { %7933 = vmatprep.mubr.msk.f32.mxu0 %vm8916_vm5, %v8917_v34 }
 0x130   : > { %7925 = vmatmul.mubr.msk.f32.gmra.mrb[4].mxu1 %vm1143_vm7, %v1136_v43 }
 0x131   : > { %7947 = vmatpush3.msk.msra.mxu1 %vm1153_vm6, %v1110_v37  ;;  %7948 = vmatprep.mubr.msk.f32.mxu1 %vm8916_vm5, %v8917_v34 }
 0x132   : > { %7934 = vmatmul.mubr.msk.f32.vlgmr.msra.gmra.mrb[6].mxu0 %vm1143_vm7, %v9190_v38  ;;  %8166 = vmatprep.subr.bf16.mxu1 %v8915_v30 }
 0x133   : > { %8165 = vmatpush3.bf16.msra.mxu0 %v8155_v33  ;;  %7936 = vmatprep.mubr.msk.f32.mxu0 %vm8916_vm5, %v8917_v34 }
 0x134   : > { %7961 = vmatprep.subr.mxu0 %v8917_v34  ;;  %7949 = vmatmul.mubr.msk.f32.vlgmr.msra.gmra.mrb[6].mxu1 %vm1143_vm7, %v1429_v44 }
 0x135   : > { %7951 = vmatprep.mubr.msk.f32.mxu1 %vm8916_vm5, %v8917_v34  ;;  %8168 = vmatpush3.bf16.msra.mxu1 %v8158_v39 }
 0x136   : > { %7937 = vmatmul.mubr.msk.f32.gmra.mrb[8].mxu0 %vm1143_vm7, %v9199_v41  ;;  %7976 = vmatprep.subr.mxu1 %v8917_v34 }
 0x137   : > { %7939 = vmatprep.mubr.msk.f32.mxu0 %vm8916_vm5, %v8917_v34  ;;  %7962 = vmatpush3.msk.msra.mxu0 %vm1153_vm6, %v1114_v40 }
 0x138   : > { %7952 = vmatmul.mubr.msk.f32.gmra.mrb[8].mxu1 %vm1143_vm7, %v1430_v45  ;;  %8169 = vmatprep.subr.bf16.mxu0 %v8915_v30 }
 0x139   : > { %7954 = vmatprep.mubr.msk.f32.mxu1 %vm8916_vm5, %v8917_v34  ;;  %7977 = vmatpush3.msk.msra.mxu1 %vm1153_vm6, %v1118_v42 }
 0x13a   : > { %7940 = vmatmul.mubr.msk.f32.gmra.mrb[10].mxu0 %vm1143_vm7, %v1136_v43  ;;  %8172 = vmatprep.subr.bf16.mxu1 %v8915_v30 }
 0x13b   : > { %7963 = vmatprep.mubr.msk.f32.mxu0 %vm8916_vm5, %v8917_v34 }
 0x13c   : > { %7955 = vmatmul.mubr.msk.f32.gmra.mrb[10].mxu1 %vm1143_vm7, %v1431_v46 }
 0x13d   : > { %7978 = vmatprep.mubr.msk.f32.mxu1 %vm8916_vm5, %v8917_v34 }
 0x13e   : > { %7964 = vmatmul.mubr.msk.f32.vlgmr.msra.gmra.mrb[12].mxu0 %vm1143_vm7, %v1429_v44 }
 0x13f   : > { %7966 = vmatprep.mubr.msk.f32.mxu0 %vm8916_vm5, %v8917_v34  ;;  %8171 = vmatpush3.bf16.msra.mxu0 %v9279_v49 }
 0x140   : > { %7979 = vmatmul.mubr.msk.f32.vlgmr.msra.gmra.mrb[12].mxu1 %vm1143_vm7, %v1429_v44  ;;  %7991 = vmatprep.subr.mxu0 %v8917_v34 }
 0x141   : > { %7981 = vmatprep.mubr.msk.f32.mxu1 %vm8916_vm5, %v8917_v34  ;;  %8174 = vmatpush3.bf16.msra.mxu1 %v9279_v49 }
 0x142   : > { %7967 = vmatmul.mubr.msk.f32.gmra.mrb[14].mxu0 %vm1143_vm7, %v1430_v45  ;;  %8006 = vmatprep.subr.mxu1 %v8917_v34 }
 0x143   : > { %7969 = vmatprep.mubr.msk.f32.mxu0 %vm8916_vm5, %v8917_v34  ;;  %7992 = vmatpush3.msk.msra.mxu0 %vm1153_vm6, %v1131_v50 }
 0x144   : > { %7982 = vmatmul.mubr.msk.f32.gmra.mrb[14].mxu1 %vm1143_vm7, %v1430_v45  ;;  %8175 = vmatprep.subr.bf16.mxu0 %v8915_v30 }
 0x145   : > { %7984 = vmatprep.mubr.msk.f32.mxu1 %vm8916_vm5, %v8917_v34  ;;  %8007 = vmatpush3.msk.msra.mxu1 %vm1153_vm6, %v1131_v50 }
 0x146   : > { %7970 = vmatmul.mubr.msk.f32.gmra.mrb[16].mxu0 %vm1143_vm7, %v1431_v46  ;;  %8179 = vmatprep.subr.bf16.mxu1 %v8915_v30 }
 0x147   : > { %7993 = vmatprep.mubr.msk.f32.mxu0 %vm8916_vm5, %v8917_v34 }
 0x148   : > { %7985 = vmatmul.mubr.msk.f32.gmra.mrb[16].mxu1 %vm1143_vm7, %v1431_v46 }
 0x149   : > { %8008 = vmatprep.mubr.msk.f32.mxu1 %vm8916_vm5, %v8917_v34 }
 0x1f9   : > { %v1223_v52 = vpop.f32.mrb[0].mxu0 }
 0x1fa   : > { %v1224_v54 = vadd.f32 %v9297_v51, %v1223_v52  ;;  %v7905_v55 = vpop.f32.mrb[1].mxu0 }
 0x1fb   : > { %v1319_v56 = vpop.f32.mrb[0].mxu1 }
 0x1fc   : > { %v1237_v57 = vmul.f32 0.70710677, %v1224_v54  ;;  %v1320_v58 = vadd.f32 %v9304_v53, %v1319_v56  ;;  %v7920_v59 = vpop.f32.mrb[1].mxu1 }
 0x1fd   : > { %v1228_v60 = vpop.f32.mrb[2].mxu0 }
 0x1fe   : > { %1240 = vst.msk [vmem:[#allocation3] sm:$0xff] %vm1143_vm7, %v1237_v57  ;;  %1333 = vst.msk [vmem:[#allocation4] sm:$0xff] %vm1143_vm7, %v1320_v58  ;;  %v1229_v61 = vadd.f32 %v9297_v51, %v1228_v60  ;;  %v7908_v62 = vpop.f32.mrb[3].mxu0 }
 0x1ff   : > { %v1324_v63 = vpop.f32.mrb[2].mxu1 }
 0x200   : > { %v1238_v0 = vmul.f32 0.70710677, %v1229_v61  ;;  %v1325_v1 = vadd.f32 %v9304_v53, %v1324_v63  ;;  %v7923_v2 = vpop.f32.mrb[3].mxu1 }
 0x201   : > { %v1233_v3 = vpop.f32.mrb[4].mxu0 }
 0x202   : > { %1241 = vst.msk [vmem:[#allocation3 + $0x8] sm:$0xff] %vm1143_vm7, %v1238_v0  ;;  %1334 = vst.msk [vmem:[#allocation4 + $0x8] sm:$0xff] %vm1143_vm7, %v1325_v1  ;;  %v1234_v4 = vadd.f32 %v9297_v51, %v1233_v3  ;;  %v7911_v5 = vpop.f32.mrb[5].mxu0 }
 0x203   : > { %v1329_v6 = vpop.f32.mrb[4].mxu1 }
 0x204   : > { %v1239_v8 = vmul.f32 0.70710677, %v1234_v4  ;;  %v1330_v9 = vadd.f32 %v9304_v53, %v1329_v6  ;;  %v7926_v10 = vpop.f32.mrb[5].mxu1  ;;  %v1132_v6 = vld [vmem:[%s10758_s6] sm:$0xff] }
 0x205   : > { %v1411_v11 = vpop.f32.mrb[6].mxu0  ;;  %v1696_v12 = vld [vmem:[#allocation3] sm:$0xff]  ;;  %v1699_v13 = vld [vmem:[#allocation4] sm:$0xff] }
 0x206   : > { %1243 = vst.msk [vmem:[#allocation3 + $0x10] sm:$0x1] %vm1242_vm8, %v1239_v8  ;;  %1335 = vst.msk [vmem:[#allocation4 + $0x10] sm:$0x1] %vm1242_vm8, %v1330_v9  ;;  %v1412_v14 = vadd.f32 %v9320_v7, %v1411_v11  ;;  %v7935_v15 = vpop.f32.mrb[7].mxu0  ;;  %v1702_v16 = vmul.f32 %v1699_v13, %v1696_v12 }
 0x207   : > { %v1507_v17 = vpop.f32.mrb[6].mxu1  ;;  %v1133_v8 = vld [vmem:[%s10758_s6 + $0x8] sm:$0x3] }
 0x208   : > { %1425 = vst.msk [vmem:[#allocation5] sm:$0xff] %vm1143_vm7, %v1412_v14  ;;  %7994 = vmatmul.mubr.msk.f32.vlgmr.msra.gmra.mrb[18].mxu0 %vm1143_vm7, %v1702_v16  ;;  %v1508_v18 = vadd.f32 %v9297_v51, %v1507_v17  ;;  %v7950_v19 = vpop.f32.mrb[7].mxu1  ;;  %v9373_v9 = vpack.c.bf16 %v1133_v8, %v1132_v6 }
 0x209   : > { %v1416_v20 = vpop.f32.mrb[8].mxu0  ;;  %7996 = vmatprep.mubr.msk.f32.mxu0 %vm8916_vm5, %v8917_v34  ;;  %v1697_v21 = vld [vmem:[#allocation3 + $0x8] sm:$0xff]  ;;  %v1700_v22 = vld [vmem:[#allocation4 + $0x8] sm:$0xff] }
 0x20a   : > { %v1417_v23 = vadd.f32 %v9320_v7, %v1416_v20  ;;  %v7938_v24 = vpop.f32.mrb[9].mxu0  ;;  %v1703_v25 = vmul.f32 %v1700_v22, %v1697_v21  ;;  %v1521_v26 = vmul.f32 0.70710677, %v1508_v18  ;;  %8178 = vmatpush3.bf16.msk.msra.mxu0 %vm9375_vm11, %v9373_v9 }
 0x20b   : > { %v1512_v27 = vpop.f32.mrb[8].mxu1  ;;  %8183 = vmatprep.subr.bf16.mxu0 %v8915_v30 }
 0x20c   : > { %1426 = vst.msk [vmem:[#allocation5 + $0x8] sm:$0xff] %vm1143_vm7, %v1417_v23  ;;  %7997 = vmatmul.mubr.msk.f32.gmra.mrb[20].mxu0 %vm1143_vm7, %v1703_v25  ;;  %1525 = vst.msk [vmem:[#allocation3 + $0x18] sm:$0xff] %vm1143_vm7, %v1521_v26  ;;  %v1513_v28 = vadd.f32 %v9297_v51, %v1512_v27  ;;  %v7953_v29 = vpop.f32.mrb[9].mxu1 }
 0x20d   : > { %v1421_v31 = vpop.f32.mrb[10].mxu0  ;;  %7999 = vmatprep.mubr.msk.f32.mxu0 %vm8916_vm5, %v8917_v34  ;;  %v1698_v32 = vld [vmem:[#allocation3 + $0x10] sm:$0x1]  ;;  %v1701_v33 = vld [vmem:[#allocation4 + $0x10] sm:$0x1] }
 0x20e   : > { %v1422_v35 = vadd.f32 %v9320_v7, %v1421_v31  ;;  %v7941_v36 = vpop.f32.mrb[11].mxu0  ;;  %v1704_v37 = vmul.f32 %v1701_v33, %v1698_v32  ;;  %v1522_v39 = vmul.f32 0.70710677, %v1513_v28 }
 0x20f   : > { %v1517_v40 = vpop.f32.mrb[10].mxu1 }
 0x210   : > { %1427 = vst.msk [vmem:[#allocation5 + $0x10] sm:$0x1] %vm1242_vm8, %v1422_v35  ;;  %8000 = vmatmul.mubr.msk.f32.gmra.mrb[22].mxu0 %vm1143_vm7, %v1704_v37  ;;  %v1518_v42 = vadd.f32 %v9297_v51, %v1517_v40  ;;  %v7956_v43 = vpop.f32.mrb[11].mxu1 }
 0x211   : > { %1526 = vst.msk [vmem:[#allocation3 + $0x20] sm:$0xff] %vm1143_vm7, %v1522_v39  ;;  %v1594_v44 = vpop.f32.mrb[12].mxu0  ;;  %8021 = vmatprep.mubr.msk.f32.mxu0 %vm8916_vm5, %v8917_v34 }
 0x212   : > { %v1595_v45 = vadd.f32 %v9304_v53, %v1594_v44  ;;  %v7965_v46 = vpop.f32.mrb[13].mxu0  ;;  %v1523_v47 = vmul.f32 0.70710677, %v1518_v42 }
 0x214   : > { %1609 = vst.msk [vmem:[#allocation4 + $0x18] sm:$0xff] %vm1143_vm7, %v1595_v45 }
 0x215   : > { %1527 = vst.msk [vmem:[#allocation3 + $0x28] sm:$0x1] %vm1242_vm8, %v1523_v47  ;;  %v1599_v48 = vpop.f32.mrb[14].mxu0 }
 0x216   : > { %v1600_v50 = vadd.f32 %v9304_v53, %v1599_v48  ;;  %v7968_v52 = vpop.f32.mrb[15].mxu0 }
 0x217   : > { %v1120_v52 = vld [vmem:[%s9093_s8] sm:$0xff] }
 0x218   : > { %1610 = vst.msk [vmem:[#allocation4 + $0x20] sm:$0xff] %vm1143_vm7, %v1600_v50 }
 0x219   : > { %v1604_v51 = vpop.f32.mrb[16].mxu0 }
 0x21a   : > { %v1605_v54 = vadd.f32 %v9304_v53, %v1604_v51  ;;  %v7971_v55 = vpop.f32.mrb[17].mxu0  ;;  %v1678_v53 = vpop.f32.mrb[12].mxu1  ;;  %v1121_v51 = vld [vmem:[%s9093_s8 + $0x8] sm:$0xff] }
 0x21b   : > { %v1797_v56 = vld [vmem:[#allocation4 + $0x18] sm:$0xff]  ;;  %v1679_v62 = vadd.f32 %v9320_v7, %v1678_v53  ;;  %v7980_v63 = vpop.f32.mrb[13].mxu1 }
 0x21c   : > { %1611 = vst.msk [vmem:[#allocation4 + $0x28] sm:$0x1] %vm1242_vm8, %v1605_v54  ;;  %v1800_v57 = vmul.f32 %v1797_v56, %v1696_v12  ;;  %v1683_v0 = vpop.f32.mrb[14].mxu1  ;;  %v1122_v63 = vld [vmem:[%s9093_s8 + $0x10] sm:$0xf] }
 0x21d   : > { %1693 = vst.msk [vmem:[#allocation5 + $0x18] sm:$0xff] %vm1143_vm7, %v1679_v62  ;;  %v1684_v1 = vadd.f32 %v9320_v7, %v1683_v0  ;;  %v7983_v2 = vpop.f32.mrb[15].mxu1 }
 0x21e   : > { %8009 = vmatmul.mubr.msk.f32.vlgmr.msra.gmra.mrb[18].mxu1 %vm1143_vm7, %v1800_v57  ;;  %v1688_v3 = vpop.f32.mrb[16].mxu1  ;;  %v9388_v57 = vpack.c.bf16 %v1121_v51, %v1120_v52 }
 0x21f   : > { %8011 = vmatprep.mubr.msk.f32.mxu1 %vm8916_vm5, %v8917_v34  ;;  %v1798_v58 = vld [vmem:[#allocation4 + $0x20] sm:$0xff]  ;;  %1694 = vst.msk [vmem:[#allocation5 + $0x20] sm:$0xff] %vm1143_vm7, %v1684_v1  ;;  %v1689_v4 = vadd.f32 %v9320_v7, %v1688_v3  ;;  %v7986_v5 = vpop.f32.mrb[17].mxu1  ;;  %8182 = vmatpush3.bf16.msk.msra.mxu1 %vm9375_vm11, %v9373_v9  ;;  %v2016_v1 = vld [vmem:[#allocation5] sm:$0xff] }
 0x220   : > { %v1801_v59 = vmul.f32 %v1798_v58, %v1697_v21 }
 0x221   : > { %1695 = vst.msk [vmem:[#allocation5 + $0x28] sm:$0x1] %vm1242_vm8, %v1689_v4 }
 0x222   : > { %8012 = vmatmul.mubr.msk.f32.gmra.mrb[20].mxu1 %vm1143_vm7, %v1801_v59 }
 0x223   : > { %8014 = vmatprep.mubr.msk.f32.mxu1 %vm8916_vm5, %v8917_v34  ;;  %v1799_v60 = vld [vmem:[#allocation4 + $0x28] sm:$0x1] }
 0x224   : > { %v1802_v61 = vmul.f32 %v1799_v60, %v1698_v32  ;;  %v2114_v3 = vld [vmem:[#allocation5 + $0x18] sm:$0xff] }
 0x226   : > { %8015 = vmatmul.mubr.msk.f32.gmra.mrb[22].mxu1 %vm1143_vm7, %v1802_v61 }
 0x227   : > { %8034 = vmatprep.mubr.msk.f32.mxu1 %vm8916_vm5, %v8917_v34 }
 0x2db   : > { %v1783_v7 = vpop.f32.mrb[18].mxu0 }
 0x2dc   : > { %v7995_v11 = vpop.f32.mrb[19].mxu0 }
 0x2df   : > { %v1788_v12 = vpop.f32.mrb[20].mxu0 }
 0x2e0   : > { %v7998_v13 = vpop.f32.mrb[21].mxu0 }
 0x2e3   : > { %v1793_v14 = vpop.f32.mrb[22].mxu0 }
 0x2e4   : > { %v8001_v15 = vpop.f32.mrb[23].mxu0 }
 0x2f1   : > { %v1878_v16 = vpop.f32.mrb[18].mxu1 }
 0x2f2   : > { %v1892_v17 = vmax.f32 %v1783_v7, %v1878_v16  ;;  %v8010_v18 = vpop.f32.mrb[19].mxu1 }
 0x2f4   : > { %v1895_v19 = vsub.f32 %v1783_v7, %v1892_v17  ;;  %v1904_v20 = vsub.f32 %v1878_v16, %v1892_v17 }
 0x2f5   : > { %v1883_v21 = vpop.f32.mrb[20].mxu1 }
 0x2f6   : > { %v1898_v22 = vmul.f32 1.442695, %v1895_v19  ;;  %v1907_v23 = vmul.f32 1.442695, %v1904_v20  ;;  %v1893_v24 = vmax.f32 %v1788_v12, %v1883_v21  ;;  %v8013_v25 = vpop.f32.mrb[21].mxu1 }
 0x2f8   : > { %8811 = vpow2.f32 %v1898_v22  ;;  %v1896_v26 = vsub.f32 %v1788_v12, %v1893_v24  ;;  %v1905_v27 = vsub.f32 %v1883_v21, %v1893_v24  ;;  %v2017_v12 = vld [vmem:[#allocation5 + $0x8] sm:$0xff]  ;;  %v2018_v21 = vld [vmem:[#allocation5 + $0x10] sm:$0x1] }
 0x2f9   : > { %8813 = vpow2.f32 %v1907_v23  ;;  %v1888_v28 = vpop.f32.mrb[22].mxu1  ;;  %v2116_v23 = vld [vmem:[#allocation5 + $0x28] sm:$0x1] }
 0x2fa   : > { %v1900_v29 = vmul.f32 1.442695, %v1896_v26  ;;  %v1909_v31 = vmul.f32 1.442695, %v1905_v27  ;;  %v1894_v32 = vmax.f32 %v1793_v14, %v1888_v28  ;;  %v8016_v33 = vpop.f32.mrb[23].mxu1 }
 0x2fc   : > { %8815 = vpow2.f32 %v1900_v29  ;;  %v1897_v35 = vsub.f32 %v1793_v14, %v1894_v32  ;;  %v1906_v36 = vsub.f32 %v1888_v28, %v1894_v32  ;;  %v2115_v14 = vld [vmem:[#allocation5 + $0x20] sm:$0xff]  ;;  %v7005_v29 = vld [vmem:[%s9099_s24] ss:$0 sm:$0xff] }
 0x2fd   : > { %8817 = vpow2.f32 %v1909_v31 }
 0x2fe   : > { %v1902_v37 = vmul.f32 1.442695, %v1897_v35  ;;  %v1911_v39 = vmul.f32 1.442695, %v1906_v36 }
 0x300   : > { %8819 = vpow2.f32 %v1902_v37 }
 0x301   : > { %8821 = vpow2.f32 %v1911_v39 }
 0x302   : > { %v8812_v40 = vpop.eup %8811 }
 0x303   : > { %v8814_v42 = vpop.eup %8813 }
 0x304   : > { %v1913_v43 = vadd.f32 %v8814_v42, %v8812_v40 }
 0x306   : > { %v8816_v44 = vpop.eup %8815  ;;  %8823 = vrcp.f32 %v1913_v43 }
 0x307   : > { %v8818_v45 = vpop.eup %8817 }
 0x308   : > { %v1914_v46 = vadd.f32 %v8818_v45, %v8816_v44 }
 0x30a   : > { %v8820_v47 = vpop.eup %8819  ;;  %8825 = vrcp.f32 %v1914_v46 }
 0x30b   : > { %v8822_v48 = vpop.eup %8821 }
 0x30c   : > { %v1915_v50 = vadd.f32 %v8822_v48, %v8820_v47 }
 0x30e   : > { %8827 = vrcp.f32 %v1915_v50 }
 0x310   : > { %v8824_v54 = vpop.eup %8823 }
 0x311   : > { %v1919_v55 = vmul.f32 %v8824_v54, %v8812_v40  ;;  %v2022_v56 = vmul.f32 %v8824_v54, %v8814_v42 }
 0x313   : > { %8022 = vmatmul.mubr.msk.f32.vlgmr.msra.gmra.mrb[24].mxu0 %vm1922_vm12, %v1919_v55  ;;  %8035 = vmatmul.mubr.msk.f32.vlgmr.msra.gmra.mrb[24].mxu1 %vm1922_vm12, %v2022_v56 }
 0x314   : > { %v8826_v58 = vpop.eup %8825  ;;  %8024 = vmatprep.mubr.msk.f32.mxu0 %vm8916_vm5, %v8917_v34  ;;  %8037 = vmatprep.mubr.msk.f32.mxu1 %vm8916_vm5, %v8917_v34 }
 0x315   : > { %v1920_v59 = vmul.f32 %v8826_v58, %v8816_v44  ;;  %v2023_v60 = vmul.f32 %v8826_v58, %v8818_v45  ;;  %8185 = vmatpush3.bf16.msra.mxu0 %v9388_v57  ;;  %v2223_v44 = vld [vmem:[#allocation2 + $0x10] sm:$0x1] }
 0x316   : > { %8047 = vmatprep.subr.mxu0 %v8917_v34 }
 0x317   : > { %8025 = vmatmul.mubr.msk.f32.gmra.mrb[26].mxu0 %vm1922_vm12, %v1920_v59  ;;  %8038 = vmatmul.mubr.msk.f32.gmra.mrb[26].mxu1 %vm1922_vm12, %v2023_v60 }
 0x318   : > { %v8828_v61 = vpop.eup %8827  ;;  %8027 = vmatprep.mubr.msk.f32.mxu0 %vm8916_vm5, %v8917_v34  ;;  %8040 = vmatprep.mubr.msk.f32.mxu1 %vm8916_vm5, %v8917_v34 }
 0x319   : > { %v1921_v53 = vmul.f32 %v8828_v61, %v8820_v47  ;;  %v2024_v62 = vmul.f32 %v8828_v61, %v8822_v48  ;;  %8048 = vmatpush3.msk.msra.mxu0 %vm1153_vm6, %v1122_v63 }
 0x31b   : > { %8028 = vmatmul.mubr.msk.f32.gmra.mrb[28].mxu0 %vm1922_vm12, %v1921_v53  ;;  %8041 = vmatmul.mubr.msk.f32.gmra.mrb[28].mxu1 %vm1922_vm12, %v2024_v62 }
 0x31c   : > { %8049 = vmatprep.mubr.msk.f32.mxu0 %vm8916_vm5, %v8917_v34  ;;  %2404 = vmatprep.mubr.f32.mxu1 %v8917_v34 }
 0x3e6   : > { %v2002_v0 = vpop.f32.mrb[24].mxu0  ;;  %v2100_v2 = vpop.f32.mrb[24].mxu1 }
 0x3e7   : > { %v2019_v4 = vmul.f32 %v2016_v1, %v2002_v0  ;;  %v2117_v5 = vmul.f32 %v2114_v3, %v2100_v2  ;;  %v8023_v6 = vpop.f32.mrb[25].mxu0  ;;  %v8036_v8 = vpop.f32.mrb[25].mxu1  ;;  %v2286_v1 = vld [vmem:[%s9119_s12 + $0x8] sm:$0xff]  ;;  %v2288_v3 = vld [vmem:[%s9119_s12 + $0x18] sm:$0xff] }
 0x3e8   : > { %v2290_v2 = vld [vmem:[%s9119_s12 + $0x88] sm:$0xff]  ;;  %v2285_v6 = vld [vmem:[%s9119_s12] sm:$0xff] }
 0x3e9   : > { %v2120_v7 = vadd.f32 %v2117_v5, %v2019_v4  ;;  %v8186_v4 = vpack.c.bf16 %v2290_v2, %v2286_v1  ;;  %v2292_v5 = vld [vmem:[%s9119_s12 + $0x98] sm:$0xff]  ;;  %v2289_v8 = vld [vmem:[%s9119_s12 + $0x80] sm:$0xff] }
 0x3ea   : > { %v2007_v11 = vpop.f32.mrb[26].mxu0  ;;  %v2105_v13 = vpop.f32.mrb[26].mxu1 }
 0x3eb   : > { %v2020_v15 = vmul.f32 %v2017_v12, %v2007_v11  ;;  %v2118_v16 = vmul.f32 %v2115_v14, %v2105_v13  ;;  %v8026_v17 = vpop.f32.mrb[27].mxu0  ;;  %v8039_v18 = vpop.f32.mrb[27].mxu1  ;;  %8050 = vmatmul.mubr.msk.f32.vlgmr.msra.gmra.mrb[30].mxu0 %vm1143_vm7, %v2120_v7  ;;  %v8190_v7 = vpack.c.bf16 %v2292_v5, %v2288_v3  ;;  %v8188_v11 = vpack.c.bf16 %v2289_v8, %v2285_v6  ;;  %v2287_v12 = vld [vmem:[%s9119_s12 + $0x10] sm:$0xff]  ;;  %v2807_v5 = vld [vmem:[%s9129_s14 + $0x208] sm:$0xff]  ;;  %v2838_v6 = vld [vmem:[%s9129_s14 + $0x300] sm:$0xff] }
 0x3ec   : > { %8052 = vmatprep.mubr.msk.f32.mxu0 %vm8916_vm5, %v8917_v34  ;;  %v2291_v13 = vld [vmem:[%s9119_s12 + $0x90] sm:$0xff]  ;;  %8187 = vmatprep.subr.bf16.mxu1 %v8186_v4  ;;  %v2293_v17 = vld [vmem:[%s9119_s12 + $0x100] sm:$0xf]  ;;  %v2839_v8 = vld [vmem:[%s9129_s14 + $0x308] sm:$0xff] }
 0x3ed   : > { %v2121_v19 = vadd.f32 %v2118_v16, %v2020_v15  ;;  %v8192_v14 = vpack.c.bf16 %v2291_v13, %v2287_v12  ;;  %8191 = vmatprep.subr.bf16.mxu0 %v8190_v7  ;;  %8189 = vmatpush1.bf16.msra.mxu1 %v8188_v11  ;;  %v2294_v15 = vld [vmem:[%s9119_s12 + $0x108] sm:$0xf]  ;;  %v2296_v16 = vld [vmem:[%s9119_s12 + $0x118] sm:$0xf]  ;;  %v2295_v18 = vld [vmem:[%s9119_s12 + $0x110] sm:$0xf] }
 0x3ee   : > { %v2012_v20 = vpop.f32.mrb[28].mxu0  ;;  %v2110_v22 = vpop.f32.mrb[28].mxu1  ;;  %7012 = vmatprep.subr.msk.mxu1 %vm1153_vm6, %v2294_v15  ;;  %v2806_v4 = vld [vmem:[%s9129_s14 + $0x200] sm:$0xff]  ;;  %v2824_v7 = vld [vmem:[%s9129_s14 + $0x290] sm:$0xff]  ;;  %v2825_v11 = vld [vmem:[%s9129_s14 + $0x298] sm:$0xff]  ;;  %v8236_v15 = vpack.c.bf16 %v2839_v8, %v2838_v6 }
 0x3ef   : > { %v2021_v24 = vmul.f32 %v2018_v21, %v2012_v20  ;;  %v2119_v25 = vmul.f32 %v2116_v23, %v2110_v22  ;;  %v8029_v26 = vpop.f32.mrb[29].mxu0  ;;  %v8042_v27 = vpop.f32.mrb[29].mxu1  ;;  %8053 = vmatmul.mubr.msk.f32.gmra.mrb[32].mxu0 %vm1143_vm7, %v2121_v19  ;;  %v2583_v19 = vld [vmem:[%s9119_s12 + $0x28] sm:$0xff]  ;;  %v2585_v21 = vld [vmem:[%s9119_s12 + $0x38] sm:$0xff]  ;;  %v2856_v12 = vld [vmem:[%s9129_s14 + $0x390] sm:$0xff] }
 0x3f0   : > { %8055 = vmatprep.mubr.msk.f32.mxu0 %vm8916_vm5, %v8917_v34  ;;  %8193 = vmatpush1.bf16.msra.mxu0 %v8192_v14  ;;  %v2587_v20 = vld [vmem:[%s9119_s12 + $0xa8] sm:$0xff]  ;;  %v2589_v23 = vld [vmem:[%s9119_s12 + $0xb8] sm:$0xff]  ;;  %v8204_v14 = vpack.c.bf16 %v2807_v5, %v2806_v4  ;;  %v2864_v5 = vld [vmem:[%s9129_s14 + $0x3d0] sm:$0xff] }
 0x3f1   : > { %v2122_v28 = vadd.f32 %v2119_v25, %v2021_v24  ;;  %7017 = vmatprep.subr.msk.mxu0 %vm1153_vm6, %v2296_v16  ;;  %7013 = vmatpush1.msk.msra.mxu1 %vm1153_vm6, %v2293_v17  ;;  %v8194_v22 = vpack.c.bf16 %v2587_v20, %v2583_v19  ;;  %v8198_v24 = vpack.c.bf16 %v2589_v23, %v2585_v21  ;;  %v2857_v13 = vld [vmem:[%s9129_s14 + $0x398] sm:$0xff]  ;;  %v2808_v16 = vld [vmem:[%s9129_s14 + $0x210] sm:$0xff]  ;;  %v2827_v23 = vld [vmem:[%s9129_s14 + $0x2a8] sm:$0xff] }
 0x3f2   : > { %v2809_v17 = vld [vmem:[%s9129_s14 + $0x218] sm:$0xff]  ;;  %v8238_v19 = vpack.c.bf16 %v2857_v13, %v2856_v12  ;;  %v2840_v20 = vld [vmem:[%s9129_s14 + $0x310] sm:$0xff] }
 0x3f3   : > { %8056 = vmatmul.mubr.msk.f32.gmra.mrb[34].mxu0 %vm1143_vm7, %v2122_v28  ;;  %8195 = vmatprep.subr.bf16.mxu1 %v8194_v22  ;;  %v2841_v21 = vld [vmem:[%s9129_s14 + $0x318] sm:$0xff]  ;;  %v2826_v22 = vld [vmem:[%s9129_s14 + $0x2a0] sm:$0xff] }
 0x3f4   : > { %2487 = vmatprep.mubr.f32.mxu0 %v8917_v34  ;;  %7018 = vmatpush1.msk.msra.mxu0 %vm1153_vm6, %v2295_v18  ;;  %v8206_v18 = vpack.c.bf16 %v2825_v11, %v2824_v7  ;;  %v2833_v4 = vld [vmem:[%s9129_s14 + $0x2d8] sm:$0xff]  ;;  %v2816_v7 = vld [vmem:[%s9129_s14 + $0x250] sm:$0xff] }
 0x3f5   : > { %8199 = vmatprep.subr.bf16.mxu0 %v8198_v24  ;;  %v2858_v24 = vld [vmem:[%s9129_s14 + $0x3a0] sm:$0xff]  ;;  %v2865_v8 = vld [vmem:[%s9129_s14 + $0x3d8] sm:$0xff] }
 0x3f6   : > { %v2817_v11 = vld [vmem:[%s9129_s14 + $0x258] sm:$0xff]  ;;  %v8254_v12 = vpack.c.bf16 %v2865_v8, %v2864_v5 }
 0x3f7   : > { %v8224_v13 = vpack.c.bf16 %v2817_v11, %v2816_v7 }
 0x4be   : > { %v2207_v31 = vpop.f32.mrb[30].mxu0 }
 0x4bf   : > { %v2208_v32 = vadd.f32 %v7005_v29, %v2207_v31  ;;  %v8051_v33 = vpop.f32.mrb[31].mxu0 }
 0x4c1   : > { %v2224_v35 = vadd.f32 %v2208_v32, %v9190_v38 }
 0x4c2   : > { %v2212_v36 = vpop.f32.mrb[32].mxu0 }
 0x4c3   : > { %v2213_v37 = vadd.f32 %v7005_v29, %v2212_v36  ;;  %v8054_v39 = vpop.f32.mrb[33].mxu0  ;;  %v2227_v40 = vsel %vm1143_vm7, %v2224_v35, 0.0 }
 0x4c4   : > { %2228 = vadd.xlane.f32.xlu0 %v2227_v40  ;;  %v2582_v39 = vld [vmem:[%s9119_s12 + $0x20] sm:$0xff] }
 0x4c5   : > { %v2225_v42 = vadd.f32 %v2213_v37, %v9199_v41  ;;  %v7010_v37 = vld [vmem:[%s10761_s28] ss:$0 sm:$0xff] }
 0x4c6   : > { %v2217_v43 = vpop.f32.mrb[34].mxu0 }
 0x4c7   : > { %v2218_v45 = vadd.f32 %v7005_v29, %v2217_v43  ;;  %v8057_v46 = vpop.f32.mrb[35].mxu0  ;;  %v2230_v47 = vsel %vm1143_vm7, %v2225_v42, 0.0  ;;  %v2584_v43 = vld [vmem:[%s9119_s12 + $0x30] sm:$0xff] }
 0x4c8   : > { %2231 = vadd.xlane.f32.xlu0 %v2230_v47 }
 0x4c9   : > { %v2226_v48 = vadd.f32 %v2223_v44, %v2218_v45  ;;  %v2588_v44 = vld [vmem:[%s9119_s12 + $0xb0] sm:$0xff]  ;;  %v7011_v45 = vld [vmem:[%s10762_s25] ss:$0 sm:$0xff] }
 0x4cb   : > { %v2233_v50 = vsel %vm1242_vm8, %v2226_v48, 0.0 }
 0x4cc   : > { %2234 = vadd.xlane.f32.xlu1 %v2233_v50  ;;  %v8200_v50 = vpack.c.bf16 %v2588_v44, %v2584_v43  ;;  %v2812_v44 = vld [vmem:[%s9129_s14 + $0x230] sm:$0xff] }
 0x551   : > { %v2229_v38 = vpop.xlane.xlu0 %2228 }
 0x552   : > { %v2237_v52 = vmul.f32 0.05, %v2229_v38 }
 0x554   : > { %v9425_v51 = vsub.f32 %v2224_v35, %v2237_v52 }
 0x555   : > { %v2232_v54 = vpop.xlane.xlu0 %2231 }
 0x556   : > { %v2238_v55 = vmul.f32 0.05, %v2232_v54  ;;  %v2243_v41 = vmul.f32 %v9425_v51, %v9425_v51  ;;  %v2591_v54 = vld [vmem:[%s9119_s12 + $0x128] sm:$0xf] }
 0x558   : > { %v9429_v56 = vsub.f32 %v2225_v42, %v2238_v55  ;;  %v2246_v58 = vsel %vm1143_vm7, %v2243_v41, 0.0  ;;  %v2586_v42 = vld [vmem:[%s9119_s12 + $0xa0] sm:$0xff]  ;;  %v2593_v55 = vld [vmem:[%s9119_s12 + $0x138] sm:$0xf] }
 0x559   : > { %2247 = vadd.xlane.f32.xlu1 %v2246_v58  ;;  %v2235_v59 = vpop.xlane.xlu1 %2234  ;;  %v2822_v41 = vld [vmem:[%s9129_s14 + $0x280] sm:$0xff]  ;;  %v2823_v58 = vld [vmem:[%s9129_s14 + $0x288] sm:$0xff] }
 0x55a   : > { %v2239_v60 = vmul.f32 0.05, %v2235_v59  ;;  %v2244_v61 = vmul.f32 %v9429_v56, %v9429_v56  ;;  %v2854_v59 = vld [vmem:[%s9129_s14 + $0x380] sm:$0xff]  ;;  %v8202_v1 = vpack.c.bf16 %v2823_v58, %v2822_v41  ;;  %v2831_v41 = vld [vmem:[%s9129_s14 + $0x2c8] sm:$0xff] }
 0x55c   : > { %v9434_v53 = vsub.f32 %v2226_v48, %v2239_v60  ;;  %v2249_v62 = vsel %vm1143_vm7, %v2244_v61, 0.0  ;;  %v8196_v48 = vpack.c.bf16 %v2586_v42, %v2582_v39  ;;  %v2855_v60 = vld [vmem:[%s9129_s14 + $0x388] sm:$0xff]  ;;  %v2860_v39 = vld [vmem:[%s9129_s14 + $0x3b0] sm:$0xff] }
 0x55d   : > { %2250 = vadd.xlane.f32.xlu0 %v2249_v62  ;;  %v8234_v2 = vpack.c.bf16 %v2855_v60, %v2854_v59  ;;  %v2863_v59 = vld [vmem:[%s9129_s14 + $0x3c8] sm:$0xff]  ;;  %v2814_v60 = vld [vmem:[%s9129_s14 + $0x240] sm:$0xff] }
 0x55e   : > { %v2245_v63 = vmul.f32 %v9434_v53, %v9434_v53 }
 0x560   : > { %v2252_v0 = vsel %vm1242_vm8, %v2245_v63, 0.0  ;;  %v2590_v63 = vld [vmem:[%s9119_s12 + $0x120] sm:$0xf] }
 0x561   : > { %2253 = vadd.xlane.f32.xlu1 %v2252_v0  ;;  %v2592_v0 = vld [vmem:[%s9119_s12 + $0x130] sm:$0xf] }
 0x5e6   : > { %v2248_v25 = vpop.xlane.xlu1 %2247 }
 0x5e7   : > { %v2255_v26 = vmul.f32 0.05, %v2248_v25  ;;  %v2859_v25 = vld [vmem:[%s9129_s14 + $0x3a8] sm:$0xff] }
 0x5e9   : > { %v2258_v27 = vadd.f32 1e-05, %v2255_v26  ;;  %v8208_v26 = vpack.c.bf16 %v2809_v17, %v2808_v16  ;;  %v2834_v17 = vld [vmem:[%s9129_s14 + $0x2e0] sm:$0xff] }
 0x5ea   : > { %v2251_v28 = vpop.xlane.xlu0 %2250 }
 0x5eb   : > { %8829 = vrsqrt.f32 %v2258_v27  ;;  %v2256_v29 = vmul.f32 0.05, %v2251_v28  ;;  %v8240_v27 = vpack.c.bf16 %v2841_v21, %v2840_v20  ;;  %v2810_v28 = vld [vmem:[%s9129_s14 + $0x220] sm:$0xff]  ;;  %v2867_v21 = vld [vmem:[%s9129_s14 + $0x3e8] sm:$0xff] }
 0x5ed   : > { %v2259_v31 = vadd.f32 1e-05, %v2256_v29  ;;  %v2811_v29 = vld [vmem:[%s9129_s14 + $0x228] sm:$0xff] }
 0x5ee   : > { %v2254_v32 = vpop.xlane.xlu1 %2253  ;;  %v8212_v42 = vpack.c.bf16 %v2811_v29, %v2810_v28  ;;  %v2836_v29 = vld [vmem:[%s9129_s14 + $0x2f0] sm:$0xff] }
 0x5ef   : > { %8831 = vrsqrt.f32 %v2259_v31  ;;  %v2257_v33 = vmul.f32 0.05, %v2254_v32  ;;  %v8210_v31 = vpack.c.bf16 %v2827_v23, %v2826_v22  ;;  %v8242_v32 = vpack.c.bf16 %v2859_v25, %v2858_v24  ;;  %v2818_v22 = vld [vmem:[%s9129_s14 + $0x260] sm:$0xff]  ;;  %v2819_v23 = vld [vmem:[%s9129_s14 + $0x268] sm:$0xff] }
 0x5f0   : > { %v8228_v25 = vpack.c.bf16 %v2819_v23, %v2818_v22 }
 0x5f1   : > { %v2260_v35 = vadd.f32 1e-05, %v2257_v33  ;;  %v2842_v33 = vld [vmem:[%s9129_s14 + $0x320] sm:$0xff] }
 0x5f3   : > { %8833 = vrsqrt.f32 %v2260_v35  ;;  %v2843_v35 = vld [vmem:[%s9129_s14 + $0x328] sm:$0xff] }
 0x5f4   : > { %v8244_v43 = vpack.c.bf16 %v2843_v35, %v2842_v33  ;;  %v2869_v35 = vld [vmem:[%s9129_s14 + $0x3f8] sm:$0xff] }
 0x5f5   : > { %v8830_v36 = vpop.eup %8829 }
 0x5f6   : > { %v2264_v40 = vmul.f32 %v8830_v36, %v9425_v51  ;;  %v2828_v36 = vld [vmem:[%s9129_s14 + $0x2b0] sm:$0xff] }
 0x5f8   : > { %v2273_v46 = vmul.f32 %v7010_v37, %v2264_v40  ;;  %v2861_v40 = vld [vmem:[%s9129_s14 + $0x3b8] sm:$0xff] }
 0x5f9   : > { %v8832_v47 = vpop.eup %8831 }
 0x5fa   : > { %v9467_v38 = vadd.f32 %v7011_v45, %v2273_v46  ;;  %v2265_v52 = vmul.f32 %v8832_v47, %v9429_v56  ;;  %v8246_v46 = vpack.c.bf16 %v2861_v40, %v2860_v39  ;;  %v2813_v47 = vld [vmem:[%s9129_s14 + $0x238] sm:$0xff] }
 0x5fc   : > { %v2274_v51 = vmul.f32 %v7010_v37, %v2265_v52  ;;  %7014 = vmatmul.mubr.msk.f32.vlgmr.msra.gmra.mrb[30].mxu1 %vm1143_vm7, %v9467_v38  ;;  %7019 = vmatmul.mubr.msk.f32.vlgmr.msra.gmra.mrb[36].mxu0 %vm1143_vm7, %v9467_v38  ;;  %v8216_v52 = vpack.c.bf16 %v2813_v47, %v2812_v44  ;;  %v2566_v47 = vld [vmem:[%s9129_s14 + $0x180] sm:$0xff] }
 0x5fd   : > { %v8834_v61 = vpop.eup %8833  ;;  %8197 = vmatpush1.bf16.msra.mxu1 %v8196_v48  ;;  %8201 = vmatpush1.bf16.msra.mxu0 %v8200_v50  ;;  %v2844_v48 = vld [vmem:[%s9129_s14 + $0x330] sm:$0xff]  ;;  %v2845_v50 = vld [vmem:[%s9129_s14 + $0x338] sm:$0xff] }
 0x5fe   : > { %v9480_v62 = vadd.f32 %v7011_v45, %v2274_v51  ;;  %v2266_v56 = vmul.f32 %v8834_v61, %v9434_v53  ;;  %2410 = vmatprep.mubr.f32.mxu1 %v8917_v34  ;;  %2493 = vmatprep.mubr.f32.mxu0 %v8917_v34  ;;  %v2862_v51 = vld [vmem:[%s9129_s14 + $0x3c0] sm:$0xff]  ;;  %v2815_v61 = vld [vmem:[%s9129_s14 + $0x248] sm:$0xff] }
 0x5ff   : > { %7022 = vmatprep.subr.msk.mxu1 %vm1153_vm6, %v2591_v54  ;;  %7027 = vmatprep.subr.msk.mxu0 %vm1153_vm6, %v2593_v55  ;;  %v8248_v54 = vpack.c.bf16 %v2845_v50, %v2844_v48  ;;  %v2830_v55 = vld [vmem:[%s9129_s14 + $0x2c0] sm:$0xff]  ;;  %v2567_v50 = vld [vmem:[%s9129_s14 + $0x188] sm:$0xff] }
 0x600   : > { %v2275_v3 = vmul.f32 %v7010_v37, %v2266_v56  ;;  %7015 = vmatmul.mubr.msk.f32.gmra.mrb[32].mxu1 %vm1143_vm7, %v9480_v62  ;;  %7020 = vmatmul.mubr.msk.f32.gmra.mrb[38].mxu0 %vm1143_vm7, %v9480_v62  ;;  %v2829_v37 = vld [vmem:[%s9129_s14 + $0x2b8] sm:$0xff]  ;;  %v8218_v58 = vpack.c.bf16 %v2831_v41, %v2830_v55  ;;  %v8250_v56 = vpack.c.bf16 %v2863_v59, %v2862_v51 }
 0x601   : > { %2416 = vmatprep.mubr.f32.mxu1 %v8917_v34  ;;  %2499 = vmatprep.mubr.f32.mxu0 %v8917_v34 }
 0x602   : > { %v9495_v53 = vadd.f32 %v7011_v45, %v2275_v3  ;;  %7023 = vmatpush1.msk.msra.mxu1 %vm1153_vm6, %v2590_v63  ;;  %7028 = vmatpush1.msk.msra.mxu0 %vm1153_vm6, %v2592_v0  ;;  %v8214_v45 = vpack.c.bf16 %v2829_v37, %v2828_v36  ;;  %v8220_v63 = vpack.c.bf16 %v2815_v61, %v2814_v60  ;;  %v2846_v0 = vld [vmem:[%s9129_s14 + $0x340] sm:$0xff]  ;;  %v2832_v3 = vld [vmem:[%s9129_s14 + $0x2d0] sm:$0xff]  ;;  %v2821_v37 = vld [vmem:[%s9129_s14 + $0x278] sm:$0xff] }
 0x603   : > { %8203 = vmatprep.subr.bf16.mxu1 %v8202_v1  ;;  %8235 = vmatprep.subr.bf16.mxu0 %v8234_v2  ;;  %v2847_v1 = vld [vmem:[%s9129_s14 + $0x348] sm:$0xff]  ;;  %v8222_v6 = vpack.c.bf16 %v2833_v4, %v2832_v3  ;;  %v2820_v36 = vld [vmem:[%s9129_s14 + $0x270] sm:$0xff] }
 0x604   : > { %7016 = vmatmul.mubr.msk.f32.gmra.mrb[34].mxu1 %vm1143_vm7, %v9495_v53  ;;  %7021 = vmatmul.mubr.msk.f32.gmra.mrb[40].mxu0 %vm1143_vm7, %v9495_v53  ;;  %v8252_v2 = vpack.c.bf16 %v2847_v1, %v2846_v0  ;;  %v8232_v40 = vpack.c.bf16 %v2821_v37, %v2820_v36  ;;  %v2594_v0 = vld [vmem:[%s9124_s13 + $0x4] sm:$0xf]  ;;  %v9649_v37 = vld [vmem:[%s9129_s14 + $0x18] sm:$0xff] }
 0x605   : > { %2692 = vmatprep.mubr.f32.mxu1 %v8917_v34  ;;  %2775 = vmatprep.mubr.f32.mxu0 %v8917_v34 }
 0x608   : > { %7024 = vmatmul.mubr.msk.f32.vlgmr.msra.gmra.mrb[36].mxu1 %vm1143_vm7, %v9467_v38  ;;  %7029 = vmatmul.mubr.msk.f32.vlgmr.msra.gmra.mrb[42].mxu0 %vm1143_vm7, %v9467_v38 }
 0x609   : > { %2698 = vmatprep.mubr.f32.mxu1 %v8917_v34  ;;  %2781 = vmatprep.mubr.f32.mxu0 %v8917_v34 }
 0x60a   : > { %8205 = vmatpush3.bf16.msra.mxu1 %v8204_v14  ;;  %8237 = vmatpush3.bf16.msra.mxu0 %v8236_v15  ;;  %v2848_v14 = vld [vmem:[%s9129_s14 + $0x350] sm:$0xff]  ;;  %v2849_v15 = vld [vmem:[%s9129_s14 + $0x358] sm:$0xff] }
 0x60b   : > { %8207 = vmatprep.subr.bf16.mxu1 %v8206_v18  ;;  %8239 = vmatprep.subr.bf16.mxu0 %v8238_v19  ;;  %v8256_v16 = vpack.c.bf16 %v2849_v15, %v2848_v14  ;;  %v2835_v18 = vld [vmem:[%s9129_s14 + $0x2e8] sm:$0xff]  ;;  %v2866_v19 = vld [vmem:[%s9129_s14 + $0x3e0] sm:$0xff] }
 0x60c   : > { %7025 = vmatmul.mubr.msk.f32.gmra.mrb[38].mxu1 %vm1143_vm7, %v9480_v62  ;;  %7030 = vmatmul.mubr.msk.f32.gmra.mrb[44].mxu0 %vm1143_vm7, %v9480_v62  ;;  %v8226_v20 = vpack.c.bf16 %v2835_v18, %v2834_v17  ;;  %v8258_v24 = vpack.c.bf16 %v2867_v21, %v2866_v19  ;;  %v2518_v15 = vld [vmem:[%s9129_s14] sm:$0xff]  ;;  %v2536_v21 = vld [vmem:[%s9129_s14 + $0x90] sm:$0xff] }
 0x60d   : > { %2704 = vmatprep.mubr.f32.mxu1 %v8917_v34  ;;  %2787 = vmatprep.mubr.f32.mxu0 %v8917_v34  ;;  %v2550_v19 = vld [vmem:[%s9129_s14 + $0x100] sm:$0xff] }
 0x60e   : > { %8209 = vmatpush3.bf16.msra.mxu1 %v8208_v26  ;;  %8241 = vmatpush3.bf16.msra.mxu0 %v8240_v27  ;;  %v2850_v26 = vld [vmem:[%s9129_s14 + $0x360] sm:$0xff]  ;;  %v2851_v27 = vld [vmem:[%s9129_s14 + $0x368] sm:$0xff] }
 0x60f   : > { %8211 = vmatprep.subr.bf16.mxu1 %v8210_v31  ;;  %8243 = vmatprep.subr.bf16.mxu0 %v8242_v32  ;;  %v8260_v28 = vpack.c.bf16 %v2851_v27, %v2850_v26  ;;  %v2837_v31 = vld [vmem:[%s9129_s14 + $0x2f8] sm:$0xff]  ;;  %v2868_v32 = vld [vmem:[%s9129_s14 + $0x3f0] sm:$0xff] }
 0x610   : > { %7026 = vmatmul.mubr.msk.f32.gmra.mrb[40].mxu1 %vm1143_vm7, %v9495_v53  ;;  %7031 = vmatmul.mubr.msk.f32.gmra.mrb[46].mxu0 %vm1143_vm7, %v9495_v53  ;;  %v8230_v33 = vpack.c.bf16 %v2837_v31, %v2836_v29  ;;  %v8262_v39 = vpack.c.bf16 %v2869_v35, %v2868_v32  ;;  %v2537_v26 = vld [vmem:[%s9129_s14 + $0x98] sm:$0xff]  ;;  %v2568_v27 = vld [vmem:[%s9129_s14 + $0x190] sm:$0xff]  ;;  %v9641_v29 = vld [vmem:[%s9124_s13] sm:$0xf] }
 0x612   : > { %8213 = vmatpush3.bf16.msra.mxu1 %v8212_v42  ;;  %8245 = vmatpush3.bf16.msra.mxu0 %v8244_v43  ;;  %v2852_v42 = vld [vmem:[%s9129_s14 + $0x370] sm:$0xff]  ;;  %v2853_v43 = vld [vmem:[%s9129_s14 + $0x378] sm:$0xff] }
 0x613   : > { %8215 = vmatprep.subr.bf16.mxu1 %v8214_v45  ;;  %8247 = vmatprep.subr.bf16.mxu0 %v8246_v46  ;;  %v8264_v44 = vpack.c.bf16 %v2853_v43, %v2852_v42  ;;  %v2534_v45 = vld [vmem:[%s9129_s14 + $0x80] sm:$0xff]  ;;  %v2535_v46 = vld [vmem:[%s9129_s14 + $0x88] sm:$0xff] }
 0x614   : > { %v8266_v48 = vpack.c.bf16 %v2535_v46, %v2534_v45  ;;  %v8270_v46 = vpack.c.bf16 %v2537_v26, %v2536_v21 }
 0x616   : > { %8217 = vmatpush3.bf16.msra.mxu1 %v8216_v52  ;;  %8249 = vmatpush3.bf16.msra.mxu0 %v8248_v54  ;;  %v8298_v52 = vpack.c.bf16 %v2567_v50, %v2566_v47  ;;  %v2299_v54 = vlaneseq  ;;  %v2539_v50 = vld [vmem:[%s9129_s14 + $0xa8] sm:$0xff] }
 0x617   : > { %8219 = vmatprep.subr.bf16.mxu1 %v8218_v58  ;;  %8251 = vmatprep.subr.bf16.mxu0 %v8250_v56 }
 0x618   : > { %v2300_v59 = vshrl.u32 %v2299_v54, 7 }
 0x61a   : > { %8221 = vmatpush3.bf16.msra.mxu1 %v8220_v63  ;;  %8253 = vmatpush3.bf16.msra.mxu0 %v8252_v2  ;;  %v9602_v1 = vsub.s32 0, %v2300_v59  ;;  %v9604_v2 = vsub.s32 2, %v2300_v59  ;;  %v9606_v3 = vsub.s32 1, %v2300_v59  ;;  %v9608_v4 = vsub.s32 3, %v2300_v59 }
 0x61b   : > { %8223 = vmatprep.subr.bf16.mxu1 %v8222_v6  ;;  %8255 = vmatprep.subr.bf16.mxu0 %v8254_v12 }
 0x61c   : > { %v9619_v11 = vrot.slane %v2594_v0, %v9602_v1  ;;  %v9622_v12 = vrot.slane %v2594_v0, %v9604_v2  ;;  %v9628_v14 = vrot.slane %v2594_v0, %v9608_v4 }
 0x61e   : > { %8225 = vmatpush3.bf16.msra.mxu1 %v8224_v13  ;;  %8257 = vmatpush3.bf16.msra.mxu0 %v8256_v16  ;;  %v9625_v13 = vrot.slane %v2594_v0, %v9606_v3  ;;  %v2519_v16 = vld [vmem:[%s9129_s14 + $0x8] sm:$0xff] }
 0x61f   : > { %8227 = vmatprep.subr.bf16.mxu1 %v8226_v20  ;;  %8259 = vmatprep.subr.bf16.mxu0 %v8258_v24  ;;  %v2551_v20 = vld [vmem:[%s9129_s14 + $0x108] sm:$0xff]  ;;  %v8268_v35 = vpack.c.bf16 %v2519_v16, %v2518_v15 }
 0x620   : > { %v8300_v36 = vpack.c.bf16 %v2551_v20, %v2550_v19  ;;  %v9663_v19 = vrot.slane %v9641_v29, %v9606_v3 }
 0x622   : > { %8229 = vmatpush3.bf16.msra.mxu1 %v8228_v25  ;;  %8261 = vmatpush3.bf16.msra.mxu0 %v8260_v28  ;;  %v2569_v28 = vld [vmem:[%s9129_s14 + $0x198] sm:$0xff] }
 0x623   : > { %8231 = vmatprep.subr.bf16.mxu1 %v8230_v33  ;;  %8263 = vmatprep.subr.bf16.mxu0 %v8262_v39  ;;  %v9646_v33 = vld [vmem:[%s9129_s14 + $0x10] sm:$0xff]  ;;  %v8302_v47 = vpack.c.bf16 %v2569_v28, %v2568_v27 }
 0x624   : > { %v9652_v39 = vld [vmem:[%s9129_s14 + $0x110] sm:$0xff] }
 0x626   : > { %8233 = vmatpush3.bf16.msra.mxu1 %v8232_v40  ;;  %8265 = vmatpush3.bf16.msra.mxu0 %v8264_v44  ;;  %v2553_v40 = vld [vmem:[%s9129_s14 + $0x118] sm:$0xff] }
 0x627   : > { %8267 = vmatprep.subr.bf16.mxu1 %v8266_v48  ;;  %8299 = vmatprep.subr.bf16.mxu0 %v8298_v52  ;;  %v2538_v48 = vld [vmem:[%s9129_s14 + $0xa0] sm:$0xff] }
 0x6cf   : > { %v9585_v55 = vpop.f32.mrb[30].mxu1  ;;  %v9587_v41 = vpop.f32.mrb[36].mxu0 }
 0x6d0   : > { %v9589_v51 = vpop.f32.mrb[31].mxu1  ;;  %v9591_v58 = vpop.f32.mrb[37].mxu0 }
 0x6d3   : > { %v9593_v60 = vpop.f32.mrb[32].mxu1  ;;  %v9595_v61 = vpop.f32.mrb[38].mxu0 }
 0x6d4   : > { %v9597_v56 = vpop.f32.mrb[33].mxu1  ;;  %v9599_v63 = vpop.f32.mrb[39].mxu0 }
 0x6d7   : > { %v9610_v5 = vpop.f32.mrb[34].mxu1  ;;  %v9612_v6 = vpop.f32.mrb[40].mxu0 }
 0x6d8   : > { %v9614_v8 = vpop.f32.mrb[35].mxu1  ;;  %v9616_v7 = vpop.f32.mrb[41].mxu0 }
 0x6db   : > { %v2694_v17 = vpop.f32.mrb[36].mxu1  ;;  %v2777_v18 = vpop.f32.mrb[42].mxu0 }
 0x6dc   : > { %v2695_v22 = vadd.f32 %v2694_v17, %v9619_v11  ;;  %v2778_v23 = vadd.f32 %v2777_v18, %v9622_v12  ;;  %v2696_v24 = vpop.f32.mrb[37].mxu1  ;;  %v2779_v25 = vpop.f32.mrb[43].mxu0  ;;  %v2570_v17 = vld [vmem:[%s9129_s14 + $0x1a0] sm:$0xff]  ;;  %v2571_v18 = vld [vmem:[%s9129_s14 + $0x1a8] sm:$0xff] }
 0x6dd   : > { %v2697_v31 = vadd.f32 %v2696_v24, %v9625_v13  ;;  %v2780_v32 = vadd.f32 %v2779_v25, %v9628_v14  ;;  %v8304_v24 = vpack.c.bf16 %v2553_v40, %v9652_v39  ;;  %v2555_v39 = vld [vmem:[%s9129_s14 + $0x128] sm:$0xff] }
 0x6de   : > { %v2794_v52 = vmax.f32 %v2695_v22, 0.0  ;;  %v2796_v54 = vmax.f32 %v2778_v23, 0.0  ;;  %v9669_v22 = vrot.slane %v9641_v29, %v9608_v4  ;;  %v8272_v23 = vpack.c.bf16 %v9649_v37, %v9646_v33 }
 0x6df   : > { %v2795_v42 = vmax.f32 %v2697_v31, 0.0  ;;  %v2797_v43 = vmax.f32 %v2780_v32, 0.0  ;;  %v2700_v44 = vpop.f32.mrb[38].mxu1  ;;  %v2783_v45 = vpop.f32.mrb[44].mxu0  ;;  %v8274_v31 = vpack.c.bf16 %v2539_v50, %v2538_v48  ;;  %v8306_v32 = vpack.c.bf16 %v2571_v18, %v2570_v17  ;;  %v2556_v17 = vld [vmem:[%s9129_s14 + $0x130] sm:$0xff]  ;;  %v2557_v18 = vld [vmem:[%s9129_s14 + $0x138] sm:$0xff] }
 0x6e0   : > { %v2701_v59 = vadd.f32 %v2700_v44, %v9619_v11  ;;  %v2784_v0 = vadd.f32 %v2783_v45, %v9622_v12  ;;  %v2702_v15 = vpop.f32.mrb[39].mxu1  ;;  %v2785_v16 = vpop.f32.mrb[45].mxu0  ;;  %v2492_v50 = vadd.f32 %v9591_v58, %v9669_v22 }
 0x6e1   : > { %v2703_v20 = vadd.f32 %v2702_v15, %v9625_v13  ;;  %v2786_v21 = vadd.f32 %v2785_v16, %v9628_v14  ;;  %2934 = vmatprep.mubr.f32.mxu1 %v2795_v42  ;;  %3014 = vmatprep.mubr.f32.mxu0 %v2797_v43  ;;  %v2522_v42 = vld [vmem:[%s9129_s14 + $0x20] sm:$0xff]  ;;  %v2523_v43 = vld [vmem:[%s9129_s14 + $0x28] sm:$0xff]  ;;  %v2525_v15 = vld [vmem:[%s9129_s14 + $0x38] sm:$0xff] }
 0x6e2   : > { %2935 = vmatmul.mubr.f32.vlgmr.msra.gmra.mrb[42].mxu1 %v2794_v52  ;;  %3015 = vmatmul.mubr.f32.vlgmr.msra.gmra.mrb[48].mxu0 %v2796_v54  ;;  %v2798_v44 = vmax.f32 %v2701_v59, 0.0  ;;  %v2800_v45 = vmax.f32 %v2784_v0, 0.0  ;;  %v8276_v59 = vpack.c.bf16 %v2523_v43, %v2522_v42  ;;  %v2526_v42 = vld [vmem:[%s9129_s14 + $0x40] sm:$0xff]  ;;  %v2527_v43 = vld [vmem:[%s9129_s14 + $0x48] sm:$0xff] }
 0x6e3   : > { %v2799_v25 = vmax.f32 %v2703_v20, 0.0  ;;  %v2801_v26 = vmax.f32 %v2786_v21, 0.0  ;;  %8269 = vmatpush3.bf16.msra.mxu1 %v8268_v35  ;;  %8301 = vmatpush3.bf16.msra.mxu0 %v8300_v36  ;;  %v2706_v27 = vpop.f32.mrb[40].mxu1  ;;  %v2789_v28 = vpop.f32.mrb[46].mxu0  ;;  %v2554_v36 = vld [vmem:[%s9129_s14 + $0x120] sm:$0xff] }
 0x6e4   : > { %v2707_v52 = vadd.f32 %v2706_v27, %v9619_v11  ;;  %v2790_v33 = vadd.f32 %v2789_v28, %v9622_v12  ;;  %v2708_v37 = vpop.f32.mrb[41].mxu1  ;;  %v2791_v35 = vpop.f32.mrb[47].mxu0  ;;  %8271 = vmatprep.subr.bf16.mxu1 %v8270_v46  ;;  %8303 = vmatprep.subr.bf16.mxu0 %v8302_v47  ;;  %v2540_v11 = vld [vmem:[%s9129_s14 + $0xb0] sm:$0xff]  ;;  %v2409_v12 = vadd.f32 %v9589_v51, %v9663_v19  ;;  %v2541_v46 = vld [vmem:[%s9129_s14 + $0xb8] sm:$0xff]  ;;  %v2542_v20 = vld [vmem:[%s9129_s14 + $0xc0] sm:$0xff]  ;;  %v2509_v28 = vmax.f32 %v2492_v50, 0.0 }
 0x6e5   : > { %v2709_v40 = vadd.f32 %v2708_v37, %v9625_v13  ;;  %v2792_v48 = vadd.f32 %v2791_v35, %v9628_v14  ;;  %2939 = vmatprep.mubr.f32.mxu1 %v2799_v25  ;;  %3019 = vmatprep.mubr.f32.mxu0 %v2801_v26  ;;  %v2572_v47 = vld [vmem:[%s9129_s14 + $0x1b0] sm:$0xff]  ;;  %v2573_v13 = vld [vmem:[%s9129_s14 + $0x1b8] sm:$0xff]  ;;  %v8308_v0 = vpack.c.bf16 %v2555_v39, %v2554_v36  ;;  %v2574_v25 = vld [vmem:[%s9129_s14 + $0x1c0] sm:$0xff] }
 0x6e6   : > { %2940 = vmatmul.mubr.f32.gmra.mrb[44].mxu1 %v2798_v44  ;;  %3020 = vmatmul.mubr.f32.gmra.mrb[50].mxu0 %v2800_v45  ;;  %v2524_v51 = vld [vmem:[%s9129_s14 + $0x30] sm:$0xff]  ;;  %v2802_v58 = vmax.f32 %v2707_v52, 0.0  ;;  %v2804_v16 = vmax.f32 %v2790_v33, 0.0  ;;  %v8278_v21 = vpack.c.bf16 %v2541_v46, %v2540_v11  ;;  %v2575_v26 = vld [vmem:[%s9129_s14 + $0x1c8] sm:$0xff]  ;;  %v2507_v27 = vmax.f32 %v2409_v12, 0.0  ;;  %v2558_v52 = vld [vmem:[%s9129_s14 + $0x140] sm:$0xff] }
 0x6e7   : > { %v2803_v14 = vmax.f32 %v2709_v40, 0.0  ;;  %v2805_v54 = vmax.f32 %v2792_v48, 0.0  ;;  %8273 = vmatpush3.bf16.msra.mxu1 %v8272_v23  ;;  %8305 = vmatpush3.bf16.msra.mxu0 %v8304_v24  ;;  %v8310_v23 = vpack.c.bf16 %v2573_v13, %v2572_v47  ;;  %v2543_v24 = vld [vmem:[%s9129_s14 + $0xc8] sm:$0xff]  ;;  %v8314_v45 = vpack.c.bf16 %v2575_v26, %v2574_v25  ;;  %v2544_v37 = vld [vmem:[%s9129_s14 + $0xd0] sm:$0xff]  ;;  %v2545_v35 = vld [vmem:[%s9129_s14 + $0xd8] sm:$0xff] }
 0x6e8   : > { %8275 = vmatprep.subr.bf16.mxu1 %v8274_v31  ;;  %8307 = vmatprep.subr.bf16.mxu0 %v8306_v32  ;;  %v8280_v31 = vpack.c.bf16 %v2525_v15, %v2524_v51  ;;  %v8312_v32 = vpack.c.bf16 %v2557_v18, %v2556_v17  ;;  %v8282_v44 = vpack.c.bf16 %v2543_v24, %v2542_v20  ;;  %v2559_v33 = vld [vmem:[%s9129_s14 + $0x148] sm:$0xff]  ;;  %v2576_v36 = vld [vmem:[%s9129_s14 + $0x1d0] sm:$0xff]  ;;  %v2577_v39 = vld [vmem:[%s9129_s14 + $0x1d8] sm:$0xff] }
 0x6e9   : > { %2944 = vmatprep.mubr.f32.mxu1 %v2803_v14  ;;  %3024 = vmatprep.mubr.f32.mxu0 %v2805_v54  ;;  %v8284_v40 = vpack.c.bf16 %v2527_v43, %v2526_v42  ;;  %v8316_v48 = vpack.c.bf16 %v2559_v33, %v2558_v52  ;;  %v2528_v11 = vld [vmem:[%s9129_s14 + $0x50] sm:$0xff]  ;;  %v2529_v12 = vld [vmem:[%s9129_s14 + $0x58] sm:$0xff]  ;;  %v8286_v50 = vpack.c.bf16 %v2545_v35, %v2544_v37  ;;  %v2546_v14 = vld [vmem:[%s9129_s14 + $0xe0] sm:$0xff] }
 0x6ea   : > { %2945 = vmatmul.mubr.f32.gmra.mrb[46].mxu1 %v2802_v58  ;;  %3025 = vmatmul.mubr.f32.gmra.mrb[52].mxu0 %v2804_v16  ;;  %v8318_v46 = vpack.c.bf16 %v2577_v39, %v2576_v36  ;;  %v2560_v47 = vld [vmem:[%s9129_s14 + $0x150] sm:$0xff]  ;;  %v2561_v13 = vld [vmem:[%s9129_s14 + $0x158] sm:$0xff]  ;;  %v2547_v54 = vld [vmem:[%s9129_s14 + $0xe8] sm:$0xff]  ;;  %v8288_v51 = vpack.c.bf16 %v2529_v12, %v2528_v11 }
 0x6eb   : > { %8277 = vmatpush3.bf16.msra.mxu1 %v8276_v59  ;;  %8309 = vmatpush3.bf16.msra.mxu0 %v8308_v0  ;;  %v2578_v59 = vld [vmem:[%s9129_s14 + $0x1e0] sm:$0xff]  ;;  %v2579_v0 = vld [vmem:[%s9129_s14 + $0x1e8] sm:$0xff]  ;;  %v8320_v15 = vpack.c.bf16 %v2561_v13, %v2560_v47  ;;  %v8290_v17 = vpack.c.bf16 %v2547_v54, %v2546_v14  ;;  %v2549_v24 = vld [vmem:[%s9129_s14 + $0xf8] sm:$0xff]  ;;  %v2415_v54 = vadd.f32 %v9597_v56, %v9663_v19 }
 0x6ec   : > { %3094 = vmatprep.mubr.f32.mxu1 %v2507_v27  ;;  %3174 = vmatprep.mubr.f32.mxu0 %v2509_v28  ;;  %v2530_v58 = vld [vmem:[%s9129_s14 + $0x60] sm:$0xff]  ;;  %v2531_v16 = vld [vmem:[%s9129_s14 + $0x68] sm:$0xff]  ;;  %v8322_v18 = vpack.c.bf16 %v2579_v0, %v2578_v59  ;;  %v2580_v25 = vld [vmem:[%s9129_s14 + $0x1f0] sm:$0xff]  ;;  %v2302_v27 = vrot.slane %v9641_v29, %v9602_v1  ;;  %v2498_v59 = vadd.f32 %v9599_v63, %v9669_v22 }
 0x6ed   : > { %8279 = vmatprep.subr.bf16.mxu1 %v8278_v21  ;;  %8311 = vmatprep.subr.bf16.mxu0 %v8310_v23  ;;  %v2562_v20 = vld [vmem:[%s9129_s14 + $0x160] sm:$0xff]  ;;  %v2563_v21 = vld [vmem:[%s9129_s14 + $0x168] sm:$0xff]  ;;  %v2548_v23 = vld [vmem:[%s9129_s14 + $0xf0] sm:$0xff]  ;;  %v8292_v28 = vpack.c.bf16 %v2531_v16, %v2530_v58  ;;  %v2511_v16 = vmax.f32 %v2415_v54, 0.0  ;;  %v2421_v56 = vadd.f32 %v9614_v8, %v9663_v19  ;;  %v2504_v63 = vadd.f32 %v9616_v7, %v9669_v22 }
 0x6ee   : > { %v2581_v26 = vld [vmem:[%s9129_s14 + $0x1f8] sm:$0xff]  ;;  %v2564_v43 = vld [vmem:[%s9129_s14 + $0x170] sm:$0xff]  ;;  %v3191_v37 = vld [vmem:[%s9119_s12 + $0x48] sm:$0xff] }
 0x6ef   : > { %8281 = vmatpush3.bf16.msra.mxu1 %v8280_v31  ;;  %8313 = vmatpush3.bf16.msra.mxu0 %v8312_v32  ;;  %v8324_v31 = vpack.c.bf16 %v2563_v21, %v2562_v20  ;;  %v2532_v32 = vld [vmem:[%s9129_s14 + $0x70] sm:$0xff]  ;;  %v2533_v42 = vld [vmem:[%s9129_s14 + $0x78] sm:$0xff]  ;;  %v8326_v52 = vpack.c.bf16 %v2581_v26, %v2580_v25  ;;  %v3195_v35 = vld [vmem:[%s9119_s12 + $0xc8] sm:$0xff]  ;;  %v2419_v21 = vadd.f32 %v9610_v5, %v2302_v27  ;;  %v2515_v8 = vmax.f32 %v2421_v56, 0.0 }
 0x6f0   : > { %8283 = vmatprep.subr.bf16.mxu1 %v8282_v44  ;;  %8315 = vmatprep.subr.bf16.mxu0 %v8314_v45  ;;  %v2310_v44 = vrot.slane %v9641_v29, %v9604_v2  ;;  %v8294_v45 = vpack.c.bf16 %v2549_v24, %v2548_v23  ;;  %v2565_v33 = vld [vmem:[%s9129_s14 + $0x178] sm:$0xff]  ;;  %v8330_v11 = vpack.c.bf16 %v3195_v35, %v3191_v37  ;;  %v3190_v12 = vld [vmem:[%s9119_s12 + $0x40] sm:$0xff]  ;;  %v3192_v13 = vld [vmem:[%s9119_s12 + $0x50] sm:$0xff]  ;;  %v2517_v19 = vmax.f32 %v2504_v63, 0.0 }
 0x6f1   : > { %v3193_v36 = vld [vmem:[%s9119_s12 + $0x58] sm:$0xff]  ;;  %v2407_v29 = vadd.f32 %v9585_v55, %v2302_v27  ;;  %v3194_v47 = vld [vmem:[%s9119_s12 + $0xc0] sm:$0xff]  ;;  %v3196_v14 = vld [vmem:[%s9119_s12 + $0xd0] sm:$0xff]  ;;  %v2514_v24 = vmax.f32 %v2419_v21, 0.0 }
 0x6f2   : > { %v3197_v39 = vld [vmem:[%s9119_s12 + $0xd8] sm:$0xff]  ;;  %v8332_v0 = vpack.c.bf16 %v3194_v47, %v3190_v12  ;;  %v8336_v55 = vpack.c.bf16 %v3196_v14, %v3192_v13  ;;  %v2496_v58 = vadd.f32 %v9595_v61, %v2310_v44  ;;  %v2502_v23 = vadd.f32 %v9612_v6, %v2310_v44  ;;  %v3198_v7 = vld [vmem:[%s9119_s12 + $0x140] sm:$0xf]  ;;  %v3200_v22 = vld [vmem:[%s9119_s12 + $0x150] sm:$0xf] }
 0x6f3   : > { %8285 = vmatpush3.bf16.msra.mxu1 %v8284_v40  ;;  %8317 = vmatpush3.bf16.msra.mxu0 %v8316_v48  ;;  %v8296_v40 = vpack.c.bf16 %v2533_v42, %v2532_v32  ;;  %v8328_v48 = vpack.c.bf16 %v2565_v33, %v2564_v43  ;;  %v3201_v20 = vld [vmem:[%s9119_s12 + $0x158] sm:$0xf]  ;;  %v3430_v5 = vld [vmem:[%s9129_s14 + $0x480] sm:$0xff]  ;;  %v3431_v6 = vld [vmem:[%s9129_s14 + $0x488] sm:$0xff] }
 0x6f4   : > { %8287 = vmatprep.subr.bf16.mxu1 %v8286_v50  ;;  %8319 = vmatprep.subr.bf16.mxu0 %v8318_v46  ;;  %v2490_v50 = vadd.f32 %v9587_v41, %v2310_v44  ;;  %v8334_v46 = vpack.c.bf16 %v3197_v39, %v3193_v36  ;;  %v2512_v61 = vmax.f32 %v2496_v58, 0.0  ;;  %v2516_v25 = vmax.f32 %v2502_v23, 0.0  ;;  %v3462_v26 = vld [vmem:[%s9129_s14 + $0x580] sm:$0xff]  ;;  %v3415_v32 = vld [vmem:[%s9129_s14 + $0x408] sm:$0xff]  ;;  %v3433_v37 = vld [vmem:[%s9129_s14 + $0x498] sm:$0xff] }
 0x6f5   : > { %v3446_v44 = vld [vmem:[%s9129_s14 + $0x500] sm:$0xff]  ;;  %v3464_v35 = vld [vmem:[%s9129_s14 + $0x590] sm:$0xff]  ;;  %v3465_v36 = vld [vmem:[%s9129_s14 + $0x598] sm:$0xff] }
 0x6f6   : > { %v2508_v41 = vmax.f32 %v2490_v50, 0.0  ;;  %v3448_v12 = vld [vmem:[%s9129_s14 + $0x510] sm:$0xff]  ;;  %v3449_v50 = vld [vmem:[%s9129_s14 + $0x518] sm:$0xff]  ;;  %v3435_v47 = vld [vmem:[%s9129_s14 + $0x4a8] sm:$0xff] }
 0x6f7   : > { %8289 = vmatpush3.bf16.msra.mxu1 %v8288_v51  ;;  %8321 = vmatpush3.bf16.msra.mxu0 %v8320_v15  ;;  %v2506_v51 = vmax.f32 %v2407_v29, 0.0  ;;  %v2413_v15 = vadd.f32 %v9593_v60, %v2302_v27  ;;  %v8338_v27 = vpack.c.bf16 %v3431_v6, %v3430_v5  ;;  %v8376_v13 = vpack.c.bf16 %v3449_v50, %v3448_v12  ;;  %v3466_v54 = vld [vmem:[%s9129_s14 + $0x5a0] sm:$0xff]  ;;  %v3468_v56 = vld [vmem:[%s9129_s14 + $0x5b0] sm:$0xff]  ;;  %v3421_v21 = vld [vmem:[%s9129_s14 + $0x438] sm:$0xff] }
 0x6f8   : > { %8291 = vmatprep.subr.bf16.mxu1 %v8290_v17  ;;  %8323 = vmatprep.subr.bf16.mxu0 %v8322_v18  ;;  %v2513_v17 = vmax.f32 %v2498_v59, 0.0  ;;  %v3199_v18 = vld [vmem:[%s9119_s12 + $0x148] sm:$0xf]  ;;  %v3452_v23 = vld [vmem:[%s9129_s14 + $0x530] sm:$0xff] }
 0x6f9   : > { %v2510_v60 = vmax.f32 %v2413_v15, 0.0  ;;  %v3467_v59 = vld [vmem:[%s9129_s14 + $0x5a8] sm:$0xff] }
 0x6fa   : > { %v3451_v15 = vld [vmem:[%s9129_s14 + $0x528] sm:$0xff] }
 0x6fb   : > { %8293 = vmatpush3.bf16.msra.mxu1 %v8292_v28  ;;  %8325 = vmatpush3.bf16.msra.mxu0 %v8324_v31  ;;  %v3463_v28 = vld [vmem:[%s9129_s14 + $0x588] sm:$0xff]  ;;  %v3414_v31 = vld [vmem:[%s9129_s14 + $0x400] sm:$0xff] }
 0x6fc   : > { %8295 = vmatprep.subr.bf16.mxu1 %v8294_v45  ;;  %8327 = vmatprep.subr.bf16.mxu0 %v8326_v52  ;;  %v8370_v42 = vpack.c.bf16 %v3463_v28, %v3462_v26  ;;  %v8340_v43 = vpack.c.bf16 %v3415_v32, %v3414_v31  ;;  %v3447_v45 = vld [vmem:[%s9129_s14 + $0x508] sm:$0xff]  ;;  %v3432_v52 = vld [vmem:[%s9129_s14 + $0x490] sm:$0xff]  ;;  %v3422_v26 = vld [vmem:[%s9129_s14 + $0x440] sm:$0xff] }
 0x6fd   : > { %v8372_v33 = vpack.c.bf16 %v3447_v45, %v3446_v44  ;;  %v8342_v39 = vpack.c.bf16 %v3433_v37, %v3432_v52  ;;  %v3471_v6 = vld [vmem:[%s9129_s14 + $0x5c8] sm:$0xff]  ;;  %v3454_v32 = vld [vmem:[%s9129_s14 + $0x540] sm:$0xff]  ;;  %v3440_v44 = vld [vmem:[%s9129_s14 + $0x4d0] sm:$0xff] }
 0x6fe   : > { %v3441_v45 = vld [vmem:[%s9129_s14 + $0x4d8] sm:$0xff]  ;;  %v3472_v52 = vld [vmem:[%s9129_s14 + $0x5d0] sm:$0xff]  ;;  %v3443_v50 = vld [vmem:[%s9129_s14 + $0x4e8] sm:$0xff] }
 0x6ff   : > { %8297 = vmatpush3.bf16.msra.mxu1 %v8296_v40  ;;  %8329 = vmatpush3.bf16.msra.mxu0 %v8328_v48  ;;  %v8374_v40 = vpack.c.bf16 %v3465_v36, %v3464_v35  ;;  %v3416_v48 = vld [vmem:[%s9129_s14 + $0x410] sm:$0xff]  ;;  %v3473_v37 = vld [vmem:[%s9129_s14 + $0x5d8] sm:$0xff] }
 0x700   : > { %8331 = vmatprep.subr.bf16.mxu1 %v8330_v11  ;;  %8335 = vmatprep.subr.bf16.mxu0 %v8334_v46  ;;  %v3417_v11 = vld [vmem:[%s9129_s14 + $0x418] sm:$0xff]  ;;  %v3434_v46 = vld [vmem:[%s9129_s14 + $0x4a0] sm:$0xff]  ;;  %v3424_v35 = vld [vmem:[%s9129_s14 + $0x450] sm:$0xff] }
 0x701   : > { %v8344_v29 = vpack.c.bf16 %v3417_v11, %v3416_v48  ;;  %v8346_v14 = vpack.c.bf16 %v3435_v47, %v3434_v46  ;;  %v3425_v36 = vld [vmem:[%s9129_s14 + $0x458] sm:$0xff]  ;;  %v3456_v48 = vld [vmem:[%s9129_s14 + $0x550] sm:$0xff]  ;;  %v3474_v46 = vld [vmem:[%s9129_s14 + $0x5e0] sm:$0xff] }
 0x702   : > { %3095 = vmatmul.mubr.f32.vlgmr.msra.gmra.mrb[48].mxu1 %v2506_v51  ;;  %3175 = vmatmul.mubr.f32.vlgmr.msra.gmra.mrb[54].mxu0 %v2508_v41  ;;  %v3419_v51 = vld [vmem:[%s9129_s14 + $0x428] sm:$0xff]  ;;  %v3450_v41 = vld [vmem:[%s9129_s14 + $0x520] sm:$0xff]  ;;  %v3457_v11 = vld [vmem:[%s9129_s14 + $0x558] sm:$0xff] }
 0x703   : > { %3099 = vmatprep.mubr.f32.mxu1 %v2511_v16  ;;  %3179 = vmatprep.mubr.f32.mxu0 %v2513_v17  ;;  %v3436_v16 = vld [vmem:[%s9129_s14 + $0x4b0] sm:$0xff]  ;;  %v3437_v17 = vld [vmem:[%s9129_s14 + $0x4b8] sm:$0xff]  ;;  %v8380_v63 = vpack.c.bf16 %v3451_v15, %v3450_v41  ;;  %v8392_v12 = vpack.c.bf16 %v3457_v11, %v3456_v48 }
 0x704   : > { %8333 = vmatpush1.bf16.msra.mxu1 %v8332_v0  ;;  %8337 = vmatpush1.bf16.msra.mxu0 %v8336_v55  ;;  %v3418_v0 = vld [vmem:[%s9129_s14 + $0x420] sm:$0xff]  ;;  %v8378_v55 = vpack.c.bf16 %v3467_v59, %v3466_v54  ;;  %v3427_v54 = vld [vmem:[%s9129_s14 + $0x468] sm:$0xff]  ;;  %v3444_v15 = vld [vmem:[%s9129_s14 + $0x4f0] sm:$0xff] }
 0x705   : > { %7032 = vmatprep.subr.msk.mxu1 %vm1153_vm6, %v3199_v18  ;;  %7037 = vmatprep.subr.msk.mxu0 %vm1153_vm6, %v3201_v20  ;;  %v8348_v58 = vpack.c.bf16 %v3419_v51, %v3418_v0  ;;  %v8350_v18 = vpack.c.bf16 %v3437_v17, %v3436_v16  ;;  %v3469_v20 = vld [vmem:[%s9129_s14 + $0x5b8] sm:$0xff]  ;;  %v3459_v51 = vld [vmem:[%s9129_s14 + $0x568] sm:$0xff]  ;;  %v3476_v16 = vld [vmem:[%s9129_s14 + $0x5f0] sm:$0xff] }
 0x706   : > { %3100 = vmatmul.mubr.f32.gmra.mrb[50].mxu1 %v2510_v60  ;;  %3180 = vmatmul.mubr.f32.gmra.mrb[56].mxu0 %v2512_v61  ;;  %v8382_v60 = vpack.c.bf16 %v3469_v20, %v3468_v56  ;;  %v3420_v61 = vld [vmem:[%s9129_s14 + $0x430] sm:$0xff]  ;;  %v3477_v56 = vld [vmem:[%s9129_s14 + $0x5f8] sm:$0xff] }
 0x707   : > { %3104 = vmatprep.mubr.f32.mxu1 %v2515_v8  ;;  %3184 = vmatprep.mubr.f32.mxu0 %v2517_v19  ;;  %v8352_v8 = vpack.c.bf16 %v3421_v21, %v3420_v61  ;;  %v3453_v19 = vld [vmem:[%s9129_s14 + $0x538] sm:$0xff]  ;;  %v8398_v20 = vpack.c.bf16 %v3477_v56, %v3476_v16  ;;  %v3460_v61 = vld [vmem:[%s9129_s14 + $0x570] sm:$0xff]  ;;  %v3202_v16 = vld [vmem:[%s9124_s13 + $0x8] sm:$0xf] }
 0x708   : > { %7033 = vmatpush1.msk.msra.mxu1 %vm1153_vm6, %v3198_v7  ;;  %7038 = vmatpush1.msk.msra.mxu0 %vm1153_vm6, %v3200_v22  ;;  %v8384_v7 = vpack.c.bf16 %v3453_v19, %v3452_v23  ;;  %v3438_v22 = vld [vmem:[%s9129_s14 + $0x4c0] sm:$0xff]  ;;  %v3461_v21 = vld [vmem:[%s9129_s14 + $0x578] sm:$0xff]  ;;  %v3646_v19 = vld [vmem:[%s9119_s12 + $0xe8] sm:$0xff] }
 0x709   : > { %8339 = vmatprep.subr.bf16.mxu1 %v8338_v27  ;;  %8371 = vmatprep.subr.bf16.mxu0 %v8370_v42  ;;  %v3423_v27 = vld [vmem:[%s9129_s14 + $0x448] sm:$0xff]  ;;  %v8400_v23 = vpack.c.bf16 %v3461_v21, %v3460_v61  ;;  %v3215_v61 = vrot.slane %v3202_v16, %v9604_v2  ;;  %v3211_v21 = vrot.slane %v3202_v16, %v9606_v3 }
 0x70a   : > { %3105 = vmatmul.mubr.f32.gmra.mrb[52].mxu1 %v2514_v24  ;;  %3185 = vmatmul.mubr.f32.gmra.mrb[58].mxu0 %v2516_v25  ;;  %v3439_v24 = vld [vmem:[%s9129_s14 + $0x4c8] sm:$0xff]  ;;  %v3470_v25 = vld [vmem:[%s9129_s14 + $0x5c0] sm:$0xff]  ;;  %v8356_v31 = vpack.c.bf16 %v3423_v27, %v3422_v26 }
 0x70b   : > { %3300 = vmatprep.mubr.f32.mxu1 %v8917_v34  ;;  %3383 = vmatprep.mubr.f32.mxu0 %v8917_v34  ;;  %v8354_v5 = vpack.c.bf16 %v3439_v24, %v3438_v22  ;;  %v8386_v28 = vpack.c.bf16 %v3471_v6, %v3470_v25  ;;  %v3455_v42 = vld [vmem:[%s9129_s14 + $0x548] sm:$0xff]  ;;  %v3648_v24 = vld [vmem:[%s9119_s12 + $0xf8] sm:$0xff] }
 0x70e   : > { %7034 = vmatmul.mubr.msk.f32.vlgmr.msra.gmra.mrb[54].mxu1 %vm1143_vm7, %v9467_v38  ;;  %7039 = vmatmul.mubr.msk.f32.vlgmr.msra.gmra.mrb[60].mxu0 %vm1143_vm7, %v9467_v38 }
 0x70f   : > { %3306 = vmatprep.mubr.f32.mxu1 %v8917_v34  ;;  %3389 = vmatprep.mubr.f32.mxu0 %v8917_v34 }
 0x710   : > { %8341 = vmatpush3.bf16.msra.mxu1 %v8340_v43  ;;  %8373 = vmatpush3.bf16.msra.mxu0 %v8372_v33  ;;  %v8388_v43 = vpack.c.bf16 %v3455_v42, %v3454_v32  ;;  %v8358_v33 = vpack.c.bf16 %v3441_v45, %v3440_v44 }
 0x711   : > { %8343 = vmatprep.subr.bf16.mxu1 %v8342_v39  ;;  %8375 = vmatprep.subr.bf16.mxu0 %v8374_v40  ;;  %v8390_v39 = vpack.c.bf16 %v3473_v37, %v3472_v52  ;;  %v8360_v40 = vpack.c.bf16 %v3425_v36, %v3424_v35 }
 0x712   : > { %7035 = vmatmul.mubr.msk.f32.gmra.mrb[56].mxu1 %vm1143_vm7, %v9480_v62  ;;  %7040 = vmatmul.mubr.msk.f32.gmra.mrb[62].mxu0 %vm1143_vm7, %v9480_v62 }
 0x713   : > { %3312 = vmatprep.mubr.f32.mxu1 %v8917_v34  ;;  %3395 = vmatprep.mubr.f32.mxu0 %v8917_v34 }
 0x714   : > { %8345 = vmatpush3.bf16.msra.mxu1 %v8344_v29  ;;  %8377 = vmatpush3.bf16.msra.mxu0 %v8376_v13  ;;  %v3442_v29 = vld [vmem:[%s9129_s14 + $0x4e0] sm:$0xff]  ;;  %v3475_v13 = vld [vmem:[%s9129_s14 + $0x5e8] sm:$0xff] }
 0x715   : > { %8347 = vmatprep.subr.bf16.mxu1 %v8346_v14  ;;  %8379 = vmatprep.subr.bf16.mxu0 %v8378_v55  ;;  %v8362_v47 = vpack.c.bf16 %v3443_v50, %v3442_v29  ;;  %v3426_v14 = vld [vmem:[%s9129_s14 + $0x460] sm:$0xff]  ;;  %v8394_v59 = vpack.c.bf16 %v3475_v13, %v3474_v46 }
 0x716   : > { %7036 = vmatmul.mubr.msk.f32.gmra.mrb[58].mxu1 %vm1143_vm7, %v9495_v53  ;;  %7041 = vmatmul.mubr.msk.f32.gmra.mrb[64].mxu0 %vm1143_vm7, %v9495_v53  ;;  %v8364_v0 = vpack.c.bf16 %v3427_v54, %v3426_v14  ;;  %v3458_v55 = vld [vmem:[%s9129_s14 + $0x560] sm:$0xff] }
 0x717   : > { %v8396_v41 = vpack.c.bf16 %v3459_v51, %v3458_v55 }
 0x718   : > { %8349 = vmatpush3.bf16.msra.mxu1 %v8348_v58  ;;  %8381 = vmatpush3.bf16.msra.mxu0 %v8380_v63  ;;  %v3445_v58 = vld [vmem:[%s9129_s14 + $0x4f8] sm:$0xff]  ;;  %v3428_v63 = vld [vmem:[%s9129_s14 + $0x470] sm:$0xff] }
 0x719   : > { %8351 = vmatprep.subr.bf16.mxu1 %v8350_v18  ;;  %8383 = vmatprep.subr.bf16.mxu0 %v8382_v60  ;;  %v8366_v17 = vpack.c.bf16 %v3445_v58, %v3444_v15  ;;  %v3429_v18 = vld [vmem:[%s9129_s14 + $0x478] sm:$0xff] }
 0x71a   : > { %v8368_v60 = vpack.c.bf16 %v3429_v18, %v3428_v63 }
 0x71c   : > { %8353 = vmatpush3.bf16.msra.mxu1 %v8352_v8  ;;  %8385 = vmatpush3.bf16.msra.mxu0 %v8384_v7  ;;  %v3642_v8 = vld [vmem:[%s9119_s12 + $0x68] sm:$0xff]  ;;  %v3644_v7 = vld [vmem:[%s9119_s12 + $0x78] sm:$0xff] }
 0x71d   : > { %8355 = vmatprep.subr.bf16.mxu1 %v8354_v5  ;;  %8387 = vmatprep.subr.bf16.mxu0 %v8386_v28  ;;  %v8402_v22 = vpack.c.bf16 %v3646_v19, %v3642_v8  ;;  %v8406_v25 = vpack.c.bf16 %v3648_v24, %v3644_v7  ;;  %v3219_v7 = vrot.slane %v3202_v16, %v9608_v4 }
 0x720   : > { %8357 = vmatpush3.bf16.msra.mxu1 %v8356_v31  ;;  %8389 = vmatpush3.bf16.msra.mxu0 %v8388_v43 }
 0x721   : > { %8359 = vmatprep.subr.bf16.mxu1 %v8358_v33  ;;  %8391 = vmatprep.subr.bf16.mxu0 %v8390_v39 }
 0x724   : > { %8361 = vmatpush3.bf16.msra.mxu1 %v8360_v40  ;;  %8393 = vmatpush3.bf16.msra.mxu0 %v8392_v12 }
 0x725   : > { %8363 = vmatprep.subr.bf16.mxu1 %v8362_v47  ;;  %8395 = vmatprep.subr.bf16.mxu0 %v8394_v59 }
 0x728   : > { %8365 = vmatpush3.bf16.msra.mxu1 %v8364_v0  ;;  %8397 = vmatpush3.bf16.msra.mxu0 %v8396_v41 }
 0x729   : > { %8367 = vmatprep.subr.bf16.mxu1 %v8366_v17  ;;  %8399 = vmatprep.subr.bf16.mxu0 %v8398_v20 }
 0x72c   : > { %8369 = vmatpush3.bf16.msra.mxu1 %v8368_v60  ;;  %8401 = vmatpush3.bf16.msra.mxu0 %v8400_v23  ;;  %v3207_v60 = vrot.slane %v3202_v16, %v9602_v1 }
 0x72d   : > { %8403 = vmatprep.subr.bf16.mxu1 %v8402_v22  ;;  %8407 = vmatprep.subr.bf16.mxu0 %v8406_v25 }
 0x7b5   : > { %v7227_v5 = vpop.f32.mrb[42].mxu1  ;;  %v7268_v6 = vpop.f32.mrb[48].mxu0 }
 0x7b6   : > { %v7228_v26 = vpop.f32.mrb[43].mxu1  ;;  %v7269_v27 = vpop.f32.mrb[49].mxu0 }
 0x7b7   : > { %v7229_v28 = vadd.f32 %v7228_v26, %v7227_v5  ;;  %v7270_v31 = vadd.f32 %v7269_v27, %v7268_v6  ;;  %v3641_v5 = vld [vmem:[%s9119_s12 + $0x60] sm:$0xff] }
 0x7b9   : > { %v3017_v32 = vadd.f32 %v7270_v31, %v7229_v28  ;;  %v7230_v42 = vpop.f32.mrb[44].mxu1  ;;  %v7271_v43 = vpop.f32.mrb[50].mxu0  ;;  %v3645_v31 = vld [vmem:[%s9119_s12 + $0xe0] sm:$0xff] }
 0x7ba   : > { %v7231_v44 = vpop.f32.mrb[45].mxu1  ;;  %v7272_v45 = vpop.f32.mrb[51].mxu0 }
 0x7bb   : > { %v7232_v52 = vadd.f32 %v7231_v44, %v7230_v42  ;;  %v7273_v33 = vadd.f32 %v7272_v45, %v7271_v43  ;;  %v3647_v42 = vld [vmem:[%s9119_s12 + $0xf0] sm:$0xff] }
 0x7bd   : > { %v3022_v37 = vadd.f32 %v7273_v33, %v7232_v52  ;;  %v7233_v35 = vpop.f32.mrb[46].mxu1  ;;  %v7274_v36 = vpop.f32.mrb[52].mxu0 }
 0x7be   : > { %v7234_v39 = vpop.f32.mrb[47].mxu1  ;;  %v7275_v40 = vpop.f32.mrb[53].mxu0 }
 0x7bf   : > { %v7235_v48 = vadd.f32 %v7234_v39, %v7233_v35  ;;  %v7276_v11 = vadd.f32 %v7275_v40, %v7274_v36  ;;  %v8404_v36 = vpack.c.bf16 %v3645_v31, %v3641_v5  ;;  %v3881_v40 = vld [vmem:[%s9129_s14 + $0x680] sm:$0xff]  ;;  %v3898_v31 = vld [vmem:[%s9129_s14 + $0x708] sm:$0xff] }
 0x7c1   : > { %v3027_v12 = vadd.f32 %v7276_v11, %v7235_v48  ;;  %v3882_v48 = vld [vmem:[%s9129_s14 + $0x688] sm:$0xff] }
 0x7d5   : > { %v7309_v29 = vpop.f32.mrb[48].mxu1  ;;  %v7350_v50 = vpop.f32.mrb[54].mxu0 }
 0x7d6   : > { %v7310_v46 = vpop.f32.mrb[49].mxu1  ;;  %v7351_v47 = vpop.f32.mrb[55].mxu0 }
 0x7d7   : > { %v7311_v13 = vadd.f32 %v7310_v46, %v7309_v29  ;;  %v7352_v14 = vadd.f32 %v7351_v47, %v7350_v50 }
 0x7d9   : > { %v3097_v54 = vadd.f32 %v7311_v13, %v3017_v32  ;;  %v7312_v59 = vpop.f32.mrb[50].mxu1  ;;  %v7353_v0 = vpop.f32.mrb[56].mxu0  ;;  %v3643_v32 = vld [vmem:[%s9119_s12 + $0x70] sm:$0xff]  ;;  %v3913_v13 = vld [vmem:[%s9129_s14 + $0x780] sm:$0xff] }
 0x7da   : > { %v7313_v55 = vpop.f32.mrb[51].mxu1  ;;  %v7354_v51 = vpop.f32.mrb[57].mxu0  ;;  %v8408_v39 = vpack.c.bf16 %v3647_v42, %v3643_v32  ;;  %v3883_v32 = vld [vmem:[%s9129_s14 + $0x690] sm:$0xff]  ;;  %v3884_v42 = vld [vmem:[%s9129_s14 + $0x698] sm:$0xff] }
 0x7db   : > { %v9846_v41 = vadd.f32 %v7352_v14, %v3097_v54  ;;  %v7314_v15 = vadd.f32 %v7313_v55, %v7312_v59  ;;  %v7355_v58 = vadd.f32 %v7354_v51, %v7353_v0  ;;  %v3914_v14 = vld [vmem:[%s9129_s14 + $0x788] sm:$0xff]  ;;  %v3652_v55 = vld [vmem:[%s9119_s12 + $0x178] sm:$0xf] }
 0x7dc   : > { %v3650_v0 = vld [vmem:[%s9119_s12 + $0x168] sm:$0xf] }
 0x7dd   : > { %v3102_v17 = vadd.f32 %v7314_v15, %v3022_v37  ;;  %v7315_v56 = vpop.f32.mrb[52].mxu1  ;;  %v7356_v63 = vpop.f32.mrb[58].mxu0 }
 0x7de   : > { %v7316_v18 = vpop.f32.mrb[53].mxu1  ;;  %v7357_v20 = vpop.f32.mrb[59].mxu0 }
 0x7df   : > { %v9852_v23 = vadd.f32 %v7355_v58, %v3102_v17  ;;  %v7317_v8 = vadd.f32 %v7316_v18, %v7315_v56  ;;  %v7358_v19 = vadd.f32 %v7357_v20, %v7356_v63  ;;  %v3649_v17 = vld [vmem:[%s9119_s12 + $0x160] sm:$0xf]  ;;  %v8410_v56 = vpack.c.bf16 %v3882_v48, %v3881_v40  ;;  %v3899_v40 = vld [vmem:[%s9129_s14 + $0x710] sm:$0xff]  ;;  %v3900_v48 = vld [vmem:[%s9129_s14 + $0x718] sm:$0xff] }
 0x7e0   : > { %v8442_v63 = vpack.c.bf16 %v3914_v14, %v3913_v13  ;;  %v3869_v13 = vld [vmem:[%s9129_s14 + $0x620] sm:$0xff]  ;;  %v3870_v14 = vld [vmem:[%s9129_s14 + $0x628] sm:$0xff] }
 0x7e1   : > { %v3107_v22 = vadd.f32 %v7317_v8, %v3027_v12  ;;  %v3302_v24 = vpop.f32.mrb[54].mxu1  ;;  %v3385_v25 = vpop.f32.mrb[60].mxu0 }
 0x7e2   : > { %v3303_v6 = vadd.f32 %v3302_v24, %v3207_v60  ;;  %v3386_v26 = vadd.f32 %v3385_v25, %v3215_v61  ;;  %v3304_v27 = vpop.f32.mrb[55].mxu1  ;;  %v3387_v28 = vpop.f32.mrb[61].mxu0  ;;  %v3651_v25 = vld [vmem:[%s9119_s12 + $0x170] sm:$0xf] }
 0x7e3   : > { %v9859_v43 = vadd.f32 %v7358_v19, %v3107_v22  ;;  %v3305_v44 = vadd.f32 %v3304_v27, %v3211_v21  ;;  %v3388_v45 = vadd.f32 %v3387_v28, %v3219_v7  ;;  %v3897_v28 = vld [vmem:[%s9129_s14 + $0x700] sm:$0xff] }
 0x7e4   : > { %v3402_v11 = vmax.f32 %v3303_v6, 0.0  ;;  %v3404_v12 = vmax.f32 %v3386_v26, 0.0 }
 0x7e5   : > { %v3403_v52 = vmax.f32 %v3305_v44, 0.0  ;;  %v3405_v33 = vmax.f32 %v3388_v45, 0.0  ;;  %v3308_v37 = vpop.f32.mrb[56].mxu1  ;;  %v3391_v35 = vpop.f32.mrb[62].mxu0  ;;  %v3915_v44 = vld [vmem:[%s9129_s14 + $0x790] sm:$0xff]  ;;  %v3916_v45 = vld [vmem:[%s9129_s14 + $0x798] sm:$0xff] }
 0x7e6   : > { %v3309_v29 = vadd.f32 %v3308_v37, %v3207_v60  ;;  %v3392_v50 = vadd.f32 %v3391_v35, %v3215_v61  ;;  %v3310_v46 = vpop.f32.mrb[57].mxu1  ;;  %v3393_v47 = vpop.f32.mrb[63].mxu0  ;;  %v3867_v37 = vld [vmem:[%s9129_s14 + $0x610] sm:$0xff]  ;;  %v3868_v35 = vld [vmem:[%s9129_s14 + $0x618] sm:$0xff] }
 0x7e7   : > { %v3311_v54 = vadd.f32 %v3310_v46, %v3211_v21  ;;  %v3394_v59 = vadd.f32 %v3393_v47, %v3219_v7  ;;  %3542 = vmatprep.mubr.f32.mxu1 %v3403_v52  ;;  %3622 = vmatprep.mubr.f32.mxu0 %v3405_v33  ;;  %v8444_v33 = vpack.c.bf16 %v3898_v31, %v3897_v28  ;;  %v3905_v31 = vld [vmem:[%s9129_s14 + $0x740] sm:$0xff] }
 0x7e8   : > { %3543 = vmatmul.mubr.f32.vlgmr.msra.gmra.mrb[60].mxu1 %v3402_v11  ;;  %3623 = vmatmul.mubr.f32.vlgmr.msra.gmra.mrb[66].mxu0 %v3404_v12  ;;  %v3406_v18 = vmax.f32 %v3309_v29, 0.0  ;;  %v3408_v20 = vmax.f32 %v3392_v50, 0.0  ;;  %v3885_v11 = vld [vmem:[%s9129_s14 + $0x6a0] sm:$0xff]  ;;  %v3886_v12 = vld [vmem:[%s9129_s14 + $0x6a8] sm:$0xff]  ;;  %v8416_v46 = vpack.c.bf16 %v3868_v35, %v3867_v37  ;;  %v8448_v47 = vpack.c.bf16 %v3900_v48, %v3899_v40  ;;  %v3924_v37 = vld [vmem:[%s9129_s14 + $0x7d8] sm:$0xff] }
 0x7e9   : > { %v3407_v51 = vmax.f32 %v3311_v54, 0.0  ;;  %v3409_v15 = vmax.f32 %v3394_v59, 0.0  ;;  %v3314_v58 = vpop.f32.mrb[58].mxu1  ;;  %v3397_v16 = vpop.f32.mrb[64].mxu0  ;;  %8405 = vmatpush1.bf16.msra.mxu1 %v8404_v36  ;;  %8409 = vmatpush1.bf16.msra.mxu0 %v8408_v39  ;;  %v8414_v36 = vpack.c.bf16 %v3884_v42, %v3883_v32  ;;  %v8446_v39 = vpack.c.bf16 %v3916_v45, %v3915_v44  ;;  %v3917_v29 = vld [vmem:[%s9129_s14 + $0x7a0] sm:$0xff]  ;;  %v3918_v50 = vld [vmem:[%s9129_s14 + $0x7a8] sm:$0xff] }
 0x7ea   : > { %v3315_v8 = vadd.f32 %v3314_v58, %v3207_v60  ;;  %v3398_v19 = vadd.f32 %v3397_v16, %v3215_v61  ;;  %v3316_v22 = vpop.f32.mrb[59].mxu1  ;;  %v3399_v24 = vpop.f32.mrb[65].mxu0  ;;  %7042 = vmatprep.subr.msk.mxu1 %vm1153_vm6, %v3650_v0  ;;  %7047 = vmatprep.subr.msk.mxu0 %vm1153_vm6, %v3652_v55  ;;  %v8418_v54 = vpack.c.bf16 %v3886_v12, %v3885_v11  ;;  %v3901_v0 = vld [vmem:[%s9129_s14 + $0x720] sm:$0xff]  ;;  %v3902_v55 = vld [vmem:[%s9129_s14 + $0x728] sm:$0xff]  ;;  %v3919_v58 = vld [vmem:[%s9129_s14 + $0x7b0] sm:$0xff] }
 0x7eb   : > { %v3317_v5 = vadd.f32 %v3316_v22, %v3211_v21  ;;  %v3400_v6 = vadd.f32 %v3399_v24, %v3219_v7  ;;  %3547 = vmatprep.mubr.f32.mxu1 %v3407_v51  ;;  %3627 = vmatprep.mubr.f32.mxu0 %v3409_v15  ;;  %v3865_v21 = vld [vmem:[%s9129_s14 + $0x600] sm:$0xff]  ;;  %v3866_v7 = vld [vmem:[%s9129_s14 + $0x608] sm:$0xff]  ;;  %v8450_v59 = vpack.c.bf16 %v3918_v50, %v3917_v29  ;;  %v3887_v51 = vld [vmem:[%s9129_s14 + $0x6b0] sm:$0xff] }
 0x7ec   : > { %3548 = vmatmul.mubr.f32.gmra.mrb[62].mxu1 %v3406_v18  ;;  %3628 = vmatmul.mubr.f32.gmra.mrb[68].mxu0 %v3408_v20  ;;  %v3410_v26 = vmax.f32 %v3315_v8, 0.0  ;;  %v3412_v27 = vmax.f32 %v3398_v19, 0.0  ;;  %v8412_v52 = vpack.c.bf16 %v3866_v7, %v3865_v21  ;;  %v3888_v15 = vld [vmem:[%s9129_s14 + $0x6b8] sm:$0xff]  ;;  %v3871_v20 = vld [vmem:[%s9129_s14 + $0x630] sm:$0xff]  ;;  %v3874_v21 = vld [vmem:[%s9129_s14 + $0x648] sm:$0xff] }
 0x7ed   : > { %v3411_v60 = vmax.f32 %v3317_v5, 0.0  ;;  %v3413_v61 = vmax.f32 %v3400_v6, 0.0  ;;  %7043 = vmatpush1.msk.msra.mxu1 %vm1153_vm6, %v3649_v17  ;;  %7048 = vmatpush1.msk.msra.mxu0 %vm1153_vm6, %v3651_v25  ;;  %v3920_v16 = vld [vmem:[%s9129_s14 + $0x7b8] sm:$0xff]  ;;  %v8420_v17 = vpack.c.bf16 %v3870_v14, %v3869_v13  ;;  %v3903_v19 = vld [vmem:[%s9129_s14 + $0x730] sm:$0xff]  ;;  %v3889_v5 = vld [vmem:[%s9129_s14 + $0x6c0] sm:$0xff] }
 0x7ee   : > { %8411 = vmatprep.subr.bf16.mxu1 %v8410_v56  ;;  %8443 = vmatprep.subr.bf16.mxu0 %v8442_v63  ;;  %v8452_v56 = vpack.c.bf16 %v3902_v55, %v3901_v0  ;;  %v8422_v63 = vpack.c.bf16 %v3888_v15, %v3887_v51  ;;  %v8454_v18 = vpack.c.bf16 %v3920_v16, %v3919_v58  ;;  %v3872_v8 = vld [vmem:[%s9129_s14 + $0x638] sm:$0xff]  ;;  %v3890_v6 = vld [vmem:[%s9129_s14 + $0x6c8] sm:$0xff]  ;;  %v3891_v44 = vld [vmem:[%s9129_s14 + $0x6d0] sm:$0xff] }
 0x7ef   : > { %3552 = vmatprep.mubr.f32.mxu1 %v3411_v60  ;;  %3632 = vmatprep.mubr.f32.mxu0 %v3413_v61  ;;  %v8424_v22 = vpack.c.bf16 %v3872_v8, %v3871_v20  ;;  %v3904_v24 = vld [vmem:[%s9129_s14 + $0x738] sm:$0xff]  ;;  %v3921_v60 = vld [vmem:[%s9129_s14 + $0x7c0] sm:$0xff]  ;;  %v8426_v61 = vpack.c.bf16 %v3890_v6, %v3889_v5  ;;  %v3906_v32 = vld [vmem:[%s9129_s14 + $0x748] sm:$0xff] }
 0x7f0   : > { %3553 = vmatmul.mubr.f32.gmra.mrb[64].mxu1 %v3410_v26  ;;  %3633 = vmatmul.mubr.f32.gmra.mrb[70].mxu0 %v3412_v27  ;;  %v8456_v25 = vpack.c.bf16 %v3904_v24, %v3903_v19  ;;  %v3922_v26 = vld [vmem:[%s9129_s14 + $0x7c8] sm:$0xff]  ;;  %v3873_v27 = vld [vmem:[%s9129_s14 + $0x640] sm:$0xff]  ;;  %v8460_v42 = vpack.c.bf16 %v3906_v32, %v3905_v31  ;;  %v3892_v45 = vld [vmem:[%s9129_s14 + $0x6d8] sm:$0xff] }
 0x7f1   : > { %3751 = vmatprep.mubr.f32.mxu1 %v8917_v34  ;;  %3834 = vmatprep.mubr.f32.mxu0 %v8917_v34  ;;  %v8458_v7 = vpack.c.bf16 %v3922_v26, %v3921_v60  ;;  %v8428_v28 = vpack.c.bf16 %v3874_v21, %v3873_v27  ;;  %v3875_v35 = vld [vmem:[%s9129_s14 + $0x650] sm:$0xff]  ;;  %v3908_v11 = vld [vmem:[%s9129_s14 + $0x758] sm:$0xff]  ;;  %v3893_v29 = vld [vmem:[%s9129_s14 + $0x6e0] sm:$0xff] }
 0x7f2   : > { %v3907_v48 = vld [vmem:[%s9129_s14 + $0x750] sm:$0xff]  ;;  %v3894_v50 = vld [vmem:[%s9129_s14 + $0x6e8] sm:$0xff]  ;;  %v3877_v14 = vld [vmem:[%s9129_s14 + $0x660] sm:$0xff] }
 0x7f3   : > { %v8464_v12 = vpack.c.bf16 %v3908_v11, %v3907_v48  ;;  %v3926_v13 = vld [vmem:[%s9129_s14 + $0x7e8] sm:$0xff]  ;;  %v3909_v55 = vld [vmem:[%s9129_s14 + $0x760] sm:$0xff]  ;;  %v3895_v58 = vld [vmem:[%s9129_s14 + $0x6f0] sm:$0xff] }
 0x7f4   : > { %7044 = vmatmul.mubr.msk.f32.vlgmr.msra.gmra.mrb[66].mxu1 %vm1143_vm7, %v9467_v38  ;;  %7049 = vmatmul.mubr.msk.f32.vlgmr.msra.gmra.mrb[72].mxu0 %vm1143_vm7, %v9467_v38  ;;  %v3910_v51 = vld [vmem:[%s9129_s14 + $0x768] sm:$0xff]  ;;  %v3896_v16 = vld [vmem:[%s9129_s14 + $0x6f8] sm:$0xff] }
 0x7f5   : > { %3757 = vmatprep.mubr.f32.mxu1 %v8917_v34  ;;  %3840 = vmatprep.mubr.f32.mxu0 %v8917_v34  ;;  %v8468_v15 = vpack.c.bf16 %v3910_v51, %v3909_v55  ;;  %v3880_v20 = vld [vmem:[%s9129_s14 + $0x678] sm:$0xff] }
 0x7f6   : > { %8413 = vmatpush3.bf16.msra.mxu1 %v8412_v52  ;;  %8445 = vmatpush3.bf16.msra.mxu0 %v8444_v33  ;;  %v3923_v52 = vld [vmem:[%s9129_s14 + $0x7d0] sm:$0xff]  ;;  %v8430_v33 = vpack.c.bf16 %v3892_v45, %v3891_v44  ;;  %v3912_v24 = vld [vmem:[%s9129_s14 + $0x778] sm:$0xff] }
 0x7f7   : > { %8415 = vmatprep.subr.bf16.mxu1 %v8414_v36  ;;  %8447 = vmatprep.subr.bf16.mxu0 %v8446_v39  ;;  %v3876_v36 = vld [vmem:[%s9129_s14 + $0x658] sm:$0xff]  ;;  %v8462_v39 = vpack.c.bf16 %v3924_v37, %v3923_v52  ;;  %v3653_v52 = vld [vmem:[%s9124_s13 + $0xc] sm:$0xf] }
 0x7f8   : > { %7045 = vmatmul.mubr.msk.f32.gmra.mrb[68].mxu1 %vm1143_vm7, %v9480_v62  ;;  %7050 = vmatmul.mubr.msk.f32.gmra.mrb[74].mxu0 %vm1143_vm7, %v9480_v62  ;;  %v8432_v40 = vpack.c.bf16 %v3876_v36, %v3875_v35  ;;  %v3666_v48 = vrot.slane %v3653_v52, %v9604_v2  ;;  %v3662_v11 = vrot.slane %v3653_v52, %v9606_v3 }
 0x7f9   : > { %3763 = vmatprep.mubr.f32.mxu1 %v8917_v34  ;;  %3846 = vmatprep.mubr.f32.mxu0 %v8917_v34 }
 0x7fa   : > { %8417 = vmatpush3.bf16.msra.mxu1 %v8416_v46  ;;  %8449 = vmatpush3.bf16.msra.mxu0 %v8448_v47  ;;  %v3925_v46 = vld [vmem:[%s9129_s14 + $0x7e0] sm:$0xff]  ;;  %v8434_v47 = vpack.c.bf16 %v3894_v50, %v3893_v29  ;;  %v3670_v50 = vrot.slane %v3653_v52, %v9608_v4 }
 0x7fb   : > { %8419 = vmatprep.subr.bf16.mxu1 %v8418_v54  ;;  %8451 = vmatprep.subr.bf16.mxu0 %v8450_v59  ;;  %v3878_v54 = vld [vmem:[%s9129_s14 + $0x668] sm:$0xff]  ;;  %v8466_v59 = vpack.c.bf16 %v3926_v13, %v3925_v46 }
 0x7fc   : > { %7046 = vmatmul.mubr.msk.f32.gmra.mrb[70].mxu1 %vm1143_vm7, %v9495_v53  ;;  %7051 = vmatmul.mubr.msk.f32.gmra.mrb[76].mxu0 %vm1143_vm7, %v9495_v53  ;;  %v8436_v0 = vpack.c.bf16 %v3878_v54, %v3877_v14 }
 0x7fe   : > { %8421 = vmatpush3.bf16.msra.mxu1 %v8420_v17  ;;  %8453 = vmatpush3.bf16.msra.mxu0 %v8452_v56  ;;  %v3927_v17 = vld [vmem:[%s9129_s14 + $0x7f0] sm:$0xff]  ;;  %v8438_v56 = vpack.c.bf16 %v3896_v16, %v3895_v58 }
 0x7ff   : > { %8423 = vmatprep.subr.bf16.mxu1 %v8422_v63  ;;  %8455 = vmatprep.subr.bf16.mxu0 %v8454_v18  ;;  %v3928_v63 = vld [vmem:[%s9129_s14 + $0x7f8] sm:$0xff]  ;;  %v3879_v18 = vld [vmem:[%s9129_s14 + $0x670] sm:$0xff] }
 0x800   : > { %v8470_v8 = vpack.c.bf16 %v3928_v63, %v3927_v17  ;;  %v8440_v19 = vpack.c.bf16 %v3880_v20, %v3879_v18 }
 0x802   : > { %8425 = vmatpush3.bf16.msra.mxu1 %v8424_v22  ;;  %8457 = vmatpush3.bf16.msra.mxu0 %v8456_v25  ;;  %v3911_v22 = vld [vmem:[%s9129_s14 + $0x770] sm:$0xff] }
 0x803   : > { %8427 = vmatprep.subr.bf16.mxu1 %v8426_v61  ;;  %8459 = vmatprep.subr.bf16.mxu0 %v8458_v7  ;;  %v8472_v25 = vpack.c.bf16 %v3912_v24, %v3911_v22 }
 0x806   : > { %8429 = vmatpush3.bf16.msra.mxu1 %v8428_v28  ;;  %8461 = vmatpush3.bf16.msra.mxu0 %v8460_v42 }
 0x807   : > { %8431 = vmatprep.subr.bf16.mxu1 %v8430_v33  ;;  %8463 = vmatprep.subr.bf16.mxu0 %v8462_v39 }
 0x80a   : > { %8433 = vmatpush3.bf16.msra.mxu1 %v8432_v40  ;;  %8465 = vmatpush3.bf16.msra.mxu0 %v8464_v12  ;;  %v3658_v40 = vrot.slane %v3653_v52, %v9602_v1 }
 0x80b   : > { %8435 = vmatprep.subr.bf16.mxu1 %v8434_v47  ;;  %8467 = vmatprep.subr.bf16.mxu0 %v8466_v59 }
 0x80e   : > { %8437 = vmatpush3.bf16.msra.mxu1 %v8436_v0  ;;  %8469 = vmatpush3.bf16.msra.mxu0 %v8468_v15 }
 0x80f   : > { %8439 = vmatprep.subr.bf16.mxu1 %v8438_v56  ;;  %8471 = vmatprep.subr.bf16.mxu0 %v8470_v8 }
 0x812   : > { %8441 = vmatpush3.bf16.msra.mxu1 %v8440_v19  ;;  %8473 = vmatpush3.bf16.msra.mxu0 %v8472_v25 }
 0x813   : > { %8474 = vmatprep.subr.bf16.mxu1 %v8915_v30  ;;  %8477 = vmatprep.subr.bf16.mxu0 %v8915_v30 }
 0x8bb   : > { %v7391_v5 = vpop.f32.mrb[60].mxu1  ;;  %v7432_v6 = vpop.f32.mrb[66].mxu0 }
 0x8bc   : > { %v7392_v60 = vpop.f32.mrb[61].mxu1  ;;  %v7433_v61 = vpop.f32.mrb[67].mxu0 }
 0x8bd   : > { %v7393_v26 = vadd.f32 %v7392_v60, %v7391_v5  ;;  %v7434_v27 = vadd.f32 %v7433_v61, %v7432_v6 }
 0x8bf   : > { %v3625_v21 = vadd.f32 %v7434_v27, %v7393_v26  ;;  %v7394_v7 = vpop.f32.mrb[62].mxu1  ;;  %v7435_v28 = vpop.f32.mrb[68].mxu0 }
 0x8c0   : > { %v7395_v31 = vpop.f32.mrb[63].mxu1  ;;  %v7436_v32 = vpop.f32.mrb[69].mxu0 }
 0x8c1   : > { %v9954_v42 = vadd.f32 %v3625_v21, %v9846_v41  ;;  %v7396_v44 = vadd.f32 %v7395_v31, %v7394_v7  ;;  %v7437_v45 = vadd.f32 %v7436_v32, %v7435_v28 }
 0x8c3   : > { %v3630_v33 = vadd.f32 %v7437_v45, %v7396_v44  ;;  %v7397_v37 = vpop.f32.mrb[64].mxu1  ;;  %v7438_v35 = vpop.f32.mrb[70].mxu0 }
 0x8c4   : > { %v7398_v36 = vpop.f32.mrb[65].mxu1  ;;  %v7439_v39 = vpop.f32.mrb[71].mxu0 }
 0x8c5   : > { %v9961_v12 = vadd.f32 %v3630_v33, %v9852_v23  ;;  %v7399_v29 = vadd.f32 %v7398_v36, %v7397_v37  ;;  %v7440_v41 = vadd.f32 %v7439_v39, %v7438_v35  ;;  %v4164_v33 = vld [vmem:[#allocation3 + $0x18] sm:$0xff]  ;;  %v4167_v37 = vld [vmem:[#allocation4] sm:$0xff]  ;;  %v4262_v35 = vld [vmem:[#allocation4 + $0x18] sm:$0xff] }
 0x8c6   : > { %v4170_v36 = vmul.f32 %v4167_v37, %v4164_v33  ;;  %v4265_v39 = vmul.f32 %v4262_v35, %v4164_v33 }
 0x8c7   : > { %v3635_v46 = vadd.f32 %v7440_v41, %v7399_v29  ;;  %v3753_v47 = vpop.f32.mrb[66].mxu1  ;;  %v3836_v13 = vpop.f32.mrb[72].mxu0 }
 0x8c8   : > { %v3754_v14 = vadd.f32 %v3753_v47, %v3658_v40  ;;  %v3837_v54 = vadd.f32 %v3836_v13, %v3666_v48  ;;  %v3755_v59 = vpop.f32.mrb[67].mxu1  ;;  %v3838_v0 = vpop.f32.mrb[73].mxu0  ;;  %v4264_v47 = vld [vmem:[#allocation4 + $0x28] sm:$0x1] }
 0x8c9   : > { %v9965_v55 = vadd.f32 %v3635_v46, %v9859_v43  ;;  %v3756_v51 = vadd.f32 %v3755_v59, %v3662_v11  ;;  %v3839_v15 = vadd.f32 %v3838_v0, %v3670_v50  ;;  %v4169_v46 = vld [vmem:[#allocation4 + $0x10] sm:$0x1] }
 0x8ca   : > { %v3853_v56 = vmax.f32 %v3754_v14, 0.0  ;;  %v3855_v63 = vmax.f32 %v3837_v54, 0.0 }
 0x8cb   : > { %v3854_v58 = vmax.f32 %v3756_v51, 0.0  ;;  %v3856_v16 = vmax.f32 %v3839_v15, 0.0  ;;  %v3759_v23 = vpop.f32.mrb[68].mxu1  ;;  %v3842_v17 = vpop.f32.mrb[74].mxu0 }
 0x8cc   : > { %v3760_v18 = vadd.f32 %v3759_v23, %v3658_v40  ;;  %v3843_v20 = vadd.f32 %v3842_v17, %v3666_v48  ;;  %v3761_v8 = vpop.f32.mrb[69].mxu1  ;;  %v3844_v19 = vpop.f32.mrb[75].mxu0 }
 0x8cd   : > { %v3762_v22 = vadd.f32 %v3761_v8, %v3662_v11  ;;  %v3845_v24 = vadd.f32 %v3844_v19, %v3670_v50  ;;  %3993 = vmatprep.mubr.f32.mxu1 %v3854_v58  ;;  %4073 = vmatprep.mubr.f32.mxu0 %v3856_v16 }
 0x8ce   : > { %3994 = vmatmul.mubr.f32.vlgmr.msra.gmra.mrb[72].mxu1 %v3853_v56  ;;  %4074 = vmatmul.mubr.f32.vlgmr.msra.gmra.mrb[78].mxu0 %v3855_v63  ;;  %v3857_v60 = vmax.f32 %v3760_v18, 0.0  ;;  %v3859_v61 = vmax.f32 %v3843_v20, 0.0 }
 0x8cf   : > { %v3858_v43 = vmax.f32 %v3762_v22, 0.0  ;;  %v3860_v25 = vmax.f32 %v3845_v24, 0.0  ;;  %v3765_v5 = vpop.f32.mrb[70].mxu1  ;;  %v3848_v6 = vpop.f32.mrb[76].mxu0  ;;  %8476 = vmatpush3.bf16.msra.mxu1 %v9279_v49  ;;  %8479 = vmatpush3.bf16.msra.mxu0 %v9279_v49  ;;  %v8871_v49 = vld [vmem:[%s10753_s30 + $0x10] sm:$0xf] }
 0x8d0   : > { %v3766_v26 = vadd.f32 %v3765_v5, %v3658_v40  ;;  %v3849_v27 = vadd.f32 %v3848_v6, %v3666_v48  ;;  %v3767_v21 = vpop.f32.mrb[71].mxu1  ;;  %v3850_v7 = vpop.f32.mrb[77].mxu0  ;;  %8062 = vmatprep.subr.mxu1 %v8917_v34  ;;  %8077 = vmatprep.subr.mxu0 %v8917_v34  ;;  %v4165_v40 = vld [vmem:[#allocation3 + $0x20] sm:$0xff]  ;;  %v4168_v48 = vld [vmem:[#allocation4 + $0x8] sm:$0xff] }
 0x8d1   : > { %v3768_v28 = vadd.f32 %v3767_v21, %v3662_v11  ;;  %v3851_v31 = vadd.f32 %v3850_v7, %v3670_v50  ;;  %3998 = vmatprep.mubr.f32.mxu1 %v3858_v43  ;;  %4078 = vmatprep.mubr.f32.mxu0 %v3860_v25  ;;  %v4263_v11 = vld [vmem:[#allocation4 + $0x20] sm:$0xff]  ;;  %v4171_v29 = vmul.f32 %v4168_v48, %v4165_v40  ;;  %v4166_v50 = vld [vmem:[#allocation3 + $0x28] sm:$0x1] }
 0x8d2   : > { %3999 = vmatmul.mubr.f32.gmra.mrb[74].mxu1 %v3857_v60  ;;  %4079 = vmatmul.mubr.f32.gmra.mrb[80].mxu0 %v3859_v61  ;;  %v3861_v45 = vmax.f32 %v3766_v26, 0.0  ;;  %v3863_v52 = vmax.f32 %v3849_v27, 0.0  ;;  %v4266_v41 = vmul.f32 %v4263_v11, %v4165_v40  ;;  %v4172_v13 = vmul.f32 %v4169_v46, %v4166_v50 }
 0x8d3   : > { %v3862_v32 = vmax.f32 %v3768_v28, 0.0  ;;  %v3864_v44 = vmax.f32 %v3851_v31, 0.0  ;;  %8063 = vmatpush3.msk.msra.mxu1 %vm1153_vm6, %v8871_v49  ;;  %8078 = vmatpush3.msk.msra.mxu0 %vm1153_vm6, %v8871_v49  ;;  %v4267_v14 = vmul.f32 %v4264_v47, %v4166_v50 }
 0x8d4   : > { %8480 = vmatprep.subr.bf16.mxu1 %v8915_v30  ;;  %8484 = vmatprep.subr.bf16.mxu0 %v8915_v30 }
 0x8d5   : > { %4003 = vmatprep.mubr.f32.mxu1 %v3862_v32  ;;  %4083 = vmatprep.mubr.f32.mxu0 %v3864_v44 }
 0x8d6   : > { %4004 = vmatmul.mubr.f32.gmra.mrb[76].mxu1 %v3861_v45  ;;  %4084 = vmatmul.mubr.f32.gmra.mrb[82].mxu0 %v3863_v52 }
 0x8d7   : > { %8064 = vmatprep.mubr.msk.f32.mxu1 %vm8916_vm5, %v8917_v34  ;;  %8079 = vmatprep.mubr.msk.f32.mxu0 %vm8916_vm5, %v8917_v34 }
 0x8da   : > { %8065 = vmatmul.mubr.msk.f32.vlgmr.msra.gmra.mrb[78].mxu1 %vm1143_vm7, %v4170_v36  ;;  %8080 = vmatmul.mubr.msk.f32.vlgmr.msra.gmra.mrb[84].mxu0 %vm1143_vm7, %v4265_v39 }
 0x8db   : > { %8067 = vmatprep.mubr.msk.f32.mxu1 %vm8916_vm5, %v8917_v34  ;;  %8082 = vmatprep.mubr.msk.f32.mxu0 %vm8916_vm5, %v8917_v34 }
 0x8dc   : > { %8483 = vmatpush3.bf16.msk.msra.mxu1 %vm9375_vm11, %v9373_v9  ;;  %8487 = vmatpush3.bf16.msk.msra.mxu0 %vm9375_vm11, %v9373_v9 }
 0x8dd   : > { %8488 = vmatprep.subr.bf16.mxu1 %v8915_v30 }
 0x8de   : > { %8068 = vmatmul.mubr.msk.f32.gmra.mrb[80].mxu1 %vm1143_vm7, %v4171_v29  ;;  %8083 = vmatmul.mubr.msk.f32.gmra.mrb[86].mxu0 %vm1143_vm7, %v4266_v41 }
 0x8df   : > { %8070 = vmatprep.mubr.msk.f32.mxu1 %vm8916_vm5, %v8917_v34  ;;  %8085 = vmatprep.mubr.msk.f32.mxu0 %vm8916_vm5, %v8917_v34 }
 0x8e2   : > { %8071 = vmatmul.mubr.msk.f32.gmra.mrb[82].mxu1 %vm1143_vm7, %v4172_v13  ;;  %8086 = vmatmul.mubr.msk.f32.gmra.mrb[88].mxu0 %vm1143_vm7, %v4267_v14 }
 0x8e3   : > { %8092 = vmatprep.mubr.msk.f32.mxu1 %vm8916_vm5, %v8917_v34  ;;  %8105 = vmatprep.mubr.msk.f32.mxu0 %vm8916_vm5, %v8917_v34 }
 0x9a1   : > { %v7473_v30 = vpop.f32.mrb[72].mxu1  ;;  %v7514_v9 = vpop.f32.mrb[78].mxu0 }
 0x9a2   : > { %v7474_v10 = vpop.f32.mrb[73].mxu1  ;;  %v7515_v54 = vpop.f32.mrb[79].mxu0 }
 0x9a3   : > { %v7475_v59 = vadd.f32 %v7474_v10, %v7473_v30  ;;  %v7516_v0 = vadd.f32 %v7515_v54, %v7514_v9 }
 0x9a5   : > { %v4076_v51 = vadd.f32 %v7516_v0, %v7475_v59  ;;  %v7476_v15 = vpop.f32.mrb[74].mxu1  ;;  %v7517_v58 = vpop.f32.mrb[80].mxu0 }
 0x9a6   : > { %v7477_v16 = vpop.f32.mrb[75].mxu1  ;;  %v7518_v23 = vpop.f32.mrb[81].mxu0 }
 0x9a7   : > { %v10008_v17 = vadd.f32 %v4076_v51, %v9954_v42  ;;  %v7478_v56 = vadd.f32 %v7477_v16, %v7476_v15  ;;  %v7519_v63 = vadd.f32 %v7518_v23, %v7517_v58 }
 0x9a9   : > { %v4081_v18 = vadd.f32 %v7519_v63, %v7478_v56  ;;  %v7479_v20 = vpop.f32.mrb[76].mxu1  ;;  %v7520_v8 = vpop.f32.mrb[82].mxu0 }
 0x9aa   : > { %v7480_v19 = vpop.f32.mrb[77].mxu1  ;;  %v7521_v22 = vpop.f32.mrb[83].mxu0 }
 0x9ab   : > { %v10011_v24 = vadd.f32 %v4081_v18, %v9961_v12  ;;  %v7481_v43 = vadd.f32 %v7480_v19, %v7479_v20  ;;  %v7522_v25 = vadd.f32 %v7521_v22, %v7520_v8  ;;  %v8872_v20 = vld [vmem:[%s9093_s8 + $0x10] sm:$0xf]  ;;  %v4574_v22 = vld [vmem:[#allocation5 + $0x18] sm:$0xff] }
 0x9ac   : > { %v4476_v8 = vld [vmem:[#allocation5] sm:$0xff] }
 0x9ad   : > { %v4086_v5 = vadd.f32 %v7522_v25, %v7481_v43  ;;  %v4248_v6 = vpop.f32.mrb[78].mxu1  ;;  %v4343_v60 = vpop.f32.mrb[84].mxu0 }
 0x9ae   : > { %v4357_v61 = vmax.f32 %v4248_v6, %v4343_v60  ;;  %v8066_v26 = vpop.f32.mrb[79].mxu1  ;;  %v8081_v27 = vpop.f32.mrb[85].mxu0 }
 0x9af   : > { %v10014_v42 = vadd.f32 %v4086_v5, %v9965_v55  ;;  %v4477_v26 = vld [vmem:[#allocation5 + $0x8] sm:$0xff] }
 0x9b0   : > { %v4360_v21 = vsub.f32 %v4248_v6, %v4357_v61  ;;  %v4369_v7 = vsub.f32 %v4343_v60, %v4357_v61 }
 0x9b1   : > { %v4253_v28 = vpop.f32.mrb[80].mxu1  ;;  %v4348_v31 = vpop.f32.mrb[86].mxu0 }
 0x9b2   : > { %v4363_v32 = vmul.f32 1.442695, %v4360_v21  ;;  %v4372_v44 = vmul.f32 1.442695, %v4369_v7  ;;  %v4358_v49 = vmax.f32 %v4253_v28, %v4348_v31  ;;  %v8069_v12 = vpop.f32.mrb[81].mxu1  ;;  %v8084_v45 = vpop.f32.mrb[87].mxu0 }
 0x9b3   : > { %v4575_v21 = vld [vmem:[#allocation5 + $0x20] sm:$0xff]  ;;  %v4478_v12 = vld [vmem:[#allocation5 + $0x10] sm:$0x1] }
 0x9b4   : > { %8835 = vpow2.f32 %v4363_v32  ;;  %v4361_v52 = vsub.f32 %v4253_v28, %v4358_v49  ;;  %v4370_v33 = vsub.f32 %v4348_v31, %v4358_v49 }
 0x9b5   : > { %8837 = vpow2.f32 %v4372_v44  ;;  %v4258_v37 = vpop.f32.mrb[82].mxu1  ;;  %v4353_v35 = vpop.f32.mrb[88].mxu0 }
 0x9b6   : > { %v4365_v36 = vmul.f32 1.442695, %v4361_v52  ;;  %v4374_v39 = vmul.f32 1.442695, %v4370_v33  ;;  %v4359_v40 = vmax.f32 %v4258_v37, %v4353_v35  ;;  %v8072_v55 = vpop.f32.mrb[83].mxu1  ;;  %v8087_v48 = vpop.f32.mrb[89].mxu0 }
 0x9b7   : > { %v4576_v52 = vld [vmem:[#allocation5 + $0x28] sm:$0x1]  ;;  %v8873_v48 = vld [vmem:[%s9099_s24] ss:$0 sm:$0xff] }
 0x9b8   : > { %8839 = vpow2.f32 %v4365_v36  ;;  %v4362_v11 = vsub.f32 %v4258_v37, %v4359_v40  ;;  %v4371_v29 = vsub.f32 %v4353_v35, %v4359_v40  ;;  %v4672_v55 = vld [vmem:[#allocation2 + $0x18] sm:$0xff] }
 0x9b9   : > { %8841 = vpow2.f32 %v4374_v39 }
 0x9ba   : > { %v4367_v41 = vmul.f32 1.442695, %v4362_v11  ;;  %v4376_v50 = vmul.f32 1.442695, %v4371_v29 }
 0x9bc   : > { %8843 = vpow2.f32 %v4367_v41 }
 0x9bd   : > { %8845 = vpow2.f32 %v4376_v50 }
 0x9be   : > { %v8836_v46 = vpop.eup %8835 }
 0x9bf   : > { %v8838_v47 = vpop.eup %8837 }
 0x9c0   : > { %v4378_v13 = vadd.f32 %v8838_v47, %v8836_v46 }
 0x9c2   : > { %v8840_v14 = vpop.eup %8839  ;;  %8847 = vrcp.f32 %v4378_v13 }
 0x9c3   : > { %v8842_v30 = vpop.eup %8841 }
 0x9c4   : > { %v4379_v9 = vadd.f32 %v8842_v30, %v8840_v14 }
 0x9c6   : > { %v8844_v10 = vpop.eup %8843  ;;  %8849 = vrcp.f32 %v4379_v9 }
 0x9c7   : > { %v8846_v54 = vpop.eup %8845 }
 0x9c8   : > { %v4380_v59 = vadd.f32 %v8846_v54, %v8844_v10 }
 0x9ca   : > { %8851 = vrcp.f32 %v4380_v59 }
 0x9cc   : > { %v8848_v0 = vpop.eup %8847 }
 0x9cd   : > { %v4384_v51 = vmul.f32 %v8848_v0, %v8836_v46  ;;  %v4482_v15 = vmul.f32 %v8848_v0, %v8838_v47  ;;  %v4673_v46 = vld [vmem:[#allocation2 + $0x20] sm:$0xff] }
 0x9cf   : > { %8093 = vmatmul.mubr.msk.f32.vlgmr.msra.gmra.mrb[84].mxu1 %vm1922_vm12, %v4384_v51  ;;  %8106 = vmatmul.mubr.msk.f32.vlgmr.msra.gmra.mrb[90].mxu0 %vm1922_vm12, %v4482_v15 }
 0x9d0   : > { %v8850_v58 = vpop.eup %8849  ;;  %8095 = vmatprep.mubr.msk.f32.mxu1 %vm8916_vm5, %v8917_v34  ;;  %8108 = vmatprep.mubr.msk.f32.mxu0 %vm8916_vm5, %v8917_v34 }
 0x9d1   : > { %v4385_v16 = vmul.f32 %v8850_v58, %v8840_v14  ;;  %v4483_v23 = vmul.f32 %v8850_v58, %v8842_v30  ;;  %8490 = vmatpush3.bf16.msra.mxu1 %v9388_v57 }
 0x9d2   : > { %8118 = vmatprep.subr.mxu1 %v8917_v34 }
 0x9d3   : > { %8096 = vmatmul.mubr.msk.f32.gmra.mrb[86].mxu1 %vm1922_vm12, %v4385_v16  ;;  %8109 = vmatmul.mubr.msk.f32.gmra.mrb[92].mxu0 %vm1922_vm12, %v4483_v23 }
 0x9d4   : > { %v8852_v56 = vpop.eup %8851  ;;  %8098 = vmatprep.mubr.msk.f32.mxu1 %vm8916_vm5, %v8917_v34  ;;  %8111 = vmatprep.mubr.msk.f32.mxu0 %vm8916_vm5, %v8917_v34 }
 0x9d5   : > { %v4386_v63 = vmul.f32 %v8852_v56, %v8844_v10  ;;  %v4484_v18 = vmul.f32 %v8852_v56, %v8846_v54  ;;  %8119 = vmatpush3.msk.msra.mxu1 %vm1153_vm6, %v8872_v20  ;;  %v4674_v10 = vld [vmem:[#allocation2 + $0x28] sm:$0x1]  ;;  %v7052_v56 = vld [vmem:[%s9135_s15] ss:$0 sm:$0xff] }
 0x9d7   : > { %8099 = vmatmul.mubr.msk.f32.gmra.mrb[88].mxu1 %vm1922_vm12, %v4386_v63  ;;  %8112 = vmatmul.mubr.msk.f32.gmra.mrb[94].mxu0 %vm1922_vm12, %v4484_v18 }
 0x9d8   : > { %8120 = vmatprep.mubr.msk.f32.mxu1 %vm8916_vm5, %v8917_v34  ;;  %4842 = vmatprep.mubr.f32.mxu0 %v8917_v34 }
 0xaa2   : > { %v4462_v57 = vpop.f32.mrb[84].mxu1  ;;  %v4560_v19 = vpop.f32.mrb[90].mxu0 }
 0xaa3   : > { %v4479_v43 = vmul.f32 %v4476_v8, %v4462_v57  ;;  %v4577_v25 = vmul.f32 %v4574_v22, %v4560_v19  ;;  %v8094_v5 = vpop.f32.mrb[85].mxu1  ;;  %v8107_v6 = vpop.f32.mrb[91].mxu0  ;;  %v4098_v57 = vadd.f32 %v7052_v56, %v10008_v17  ;;  %v4099_v17 = vadd.f32 %v7052_v56, %v10011_v24 }
 0xaa5   : > { %v4580_v60 = vadd.f32 %v4577_v25, %v4479_v43  ;;  %v10061_v5 = vadd.f32 %v4098_v57, %v9467_v38 }
 0xaa6   : > { %v4467_v61 = vpop.f32.mrb[86].mxu1  ;;  %v4565_v27 = vpop.f32.mrb[92].mxu0 }
 0xaa7   : > { %v4480_v7 = vmul.f32 %v4477_v26, %v4467_v61  ;;  %v4578_v28 = vmul.f32 %v4575_v21, %v4565_v27  ;;  %v8097_v31 = vpop.f32.mrb[87].mxu1  ;;  %v8110_v32 = vpop.f32.mrb[93].mxu0  ;;  %8121 = vmatmul.mubr.msk.f32.vlgmr.msra.gmra.mrb[90].mxu1 %vm1143_vm7, %v4580_v60  ;;  %v4100_v61 = vadd.f32 %v7052_v56, %v10014_v42  ;;  %v4104_v27 = vsel %vm1143_vm7, %v10061_v5, 0.0  ;;  %v5026_v56 = vld [vmem:[%s9119_s12 + $0xb0] sm:$0xff] }
 0xaa8   : > { %8123 = vmatprep.mubr.msk.f32.mxu1 %vm8916_vm5, %v8917_v34  ;;  %v10074_v21 = vadd.f32 %v4099_v17, %v9480_v62  ;;  %v4728_v31 = vld [vmem:[%s9119_s12 + $0x88] sm:$0xff]  ;;  %v4726_v62 = vld [vmem:[%s9119_s12 + $0x18] sm:$0xff] }
 0xaa9   : > { %v4581_v44 = vadd.f32 %v4578_v28, %v4480_v7  ;;  %v10077_v24 = vadd.f32 %v4100_v61, %v9495_v53  ;;  %v4724_v28 = vld [vmem:[%s9119_s12 + $0x8] sm:$0xff]  ;;  %v4730_v53 = vld [vmem:[%s9119_s12 + $0x98] sm:$0xff]  ;;  %v5260_v61 = vld [vmem:[%s9129_s14 + $0x280] sm:$0xff] }
 0xaaa   : > { %v4472_v49 = vpop.f32.mrb[88].mxu1  ;;  %v4570_v45 = vpop.f32.mrb[94].mxu0  ;;  %v4107_v42 = vsel %vm1143_vm7, %v10074_v21, 0.0  ;;  %v8491_v32 = vpack.c.bf16 %v4728_v31, %v4724_v28  ;;  %v5031_v17 = vld [vmem:[%s9119_s12 + $0x138] sm:$0xf] }
 0xaab   : > { %v4481_v33 = vmul.f32 %v4478_v12, %v4472_v49  ;;  %v4579_v37 = vmul.f32 %v4576_v52, %v4570_v45  ;;  %v8100_v35 = vpop.f32.mrb[89].mxu1  ;;  %v8113_v36 = vpop.f32.mrb[95].mxu0  ;;  %8124 = vmatmul.mubr.msk.f32.gmra.mrb[92].mxu1 %vm1143_vm7, %v4581_v44  ;;  %v4110_v7 = vsel %vm1242_vm8, %v10077_v24, 0.0  ;;  %v4723_v44 = vld [vmem:[%s9119_s12] sm:$0xff]  ;;  %v8495_v12 = vpack.c.bf16 %v4730_v53, %v4726_v62  ;;  %v4725_v52 = vld [vmem:[%s9119_s12 + $0x10] sm:$0xff] }
 0xaac   : > { %8126 = vmatprep.mubr.msk.f32.mxu1 %vm8916_vm5, %v8917_v34  ;;  %v4727_v49 = vld [vmem:[%s9119_s12 + $0x80] sm:$0xff]  ;;  %8492 = vmatprep.subr.bf16.mxu0 %v8491_v32  ;;  %v4732_v35 = vld [vmem:[%s9119_s12 + $0x108] sm:$0xf]  ;;  %v4734_v36 = vld [vmem:[%s9119_s12 + $0x118] sm:$0xf] }
 0xaad   : > { %v4582_v39 = vadd.f32 %v4579_v37, %v4481_v33  ;;  %v8493_v45 = vpack.c.bf16 %v4727_v49, %v4723_v44  ;;  %v4729_v33 = vld [vmem:[%s9119_s12 + $0x90] sm:$0xff]  ;;  %8496 = vmatprep.subr.bf16.mxu1 %v8495_v12  ;;  %v5028_v28 = vld [vmem:[%s9119_s12 + $0x120] sm:$0xf]  ;;  %v5245_v49 = vld [vmem:[%s9129_s14 + $0x208] sm:$0xff] }
 0xaae   : > { %v8497_v37 = vpack.c.bf16 %v4729_v33, %v4725_v52  ;;  %v5030_v31 = vld [vmem:[%s9119_s12 + $0x130] sm:$0xf]  ;;  %v5244_v44 = vld [vmem:[%s9129_s14 + $0x200] sm:$0xff]  ;;  %v5263_v33 = vld [vmem:[%s9129_s14 + $0x298] sm:$0xff] }
 0xaaf   : > { %8127 = vmatmul.mubr.msk.f32.gmra.mrb[94].mxu1 %vm1143_vm7, %v4582_v39  ;;  %8494 = vmatpush1.bf16.msra.mxu0 %v8493_v45  ;;  %v4731_v39 = vld [vmem:[%s9119_s12 + $0x100] sm:$0xf]  ;;  %v5277_v45 = vld [vmem:[%s9129_s14 + $0x308] sm:$0xff]  ;;  %v5262_v52 = vld [vmem:[%s9129_s14 + $0x290] sm:$0xff] }
 0xab0   : > { %4925 = vmatprep.mubr.f32.mxu1 %v8917_v34  ;;  %8498 = vmatpush1.bf16.msra.mxu1 %v8497_v37  ;;  %v5276_v12 = vld [vmem:[%s9129_s14 + $0x300] sm:$0xff]  ;;  %v5294_v37 = vld [vmem:[%s9129_s14 + $0x390] sm:$0xff] }
 0xab1   : > { %7075 = vmatprep.subr.msk.mxu0 %vm1153_vm6, %v4732_v35  ;;  %7080 = vmatprep.subr.msk.mxu1 %vm1153_vm6, %v4734_v36  ;;  %v5295_v35 = vld [vmem:[%s9129_s14 + $0x398] sm:$0xff]  ;;  %v8509_v36 = vpack.c.bf16 %v5245_v49, %v5244_v44  ;;  %v5270_v49 = vld [vmem:[%s9129_s14 + $0x2d0] sm:$0xff] }
 0xab3   : > { %7076 = vmatpush1.msk.msra.mxu0 %vm1153_vm6, %v4731_v39  ;;  %v8541_v39 = vpack.c.bf16 %v5277_v45, %v5276_v12  ;;  %v5271_v12 = vld [vmem:[%s9129_s14 + $0x2d8] sm:$0xff]  ;;  %v5302_v45 = vld [vmem:[%s9129_s14 + $0x3d0] sm:$0xff] }
 0xb7a   : > { %v4658_v40 = vpop.f32.mrb[90].mxu1 }
 0xb7b   : > { %v4659_v11 = vadd.f32 %v8873_v48, %v4658_v40  ;;  %v8122_v29 = vpop.f32.mrb[91].mxu1  ;;  %v4733_v40 = vld [vmem:[%s9119_s12 + $0x110] sm:$0xf] }
 0xb7c   : > { %7081 = vmatpush1.msk.msra.mxu1 %vm1153_vm6, %v4733_v40  ;;  %v5246_v40 = vld [vmem:[%s9129_s14 + $0x210] sm:$0xff] }
 0xb7d   : > { %v4675_v41 = vadd.f32 %v4672_v55, %v4659_v11  ;;  %v5021_v55 = vld [vmem:[%s9119_s12 + $0x28] sm:$0xff]  ;;  %v5023_v11 = vld [vmem:[%s9119_s12 + $0x38] sm:$0xff] }
 0xb7e   : > { %v4663_v50 = vpop.f32.mrb[92].mxu1 }
 0xb7f   : > { %v4664_v47 = vadd.f32 %v8873_v48, %v4663_v50  ;;  %v8125_v13 = vpop.f32.mrb[93].mxu1  ;;  %v4678_v14 = vsel %vm1143_vm7, %v4675_v41, 0.0 }
 0xb80   : > { %4679 = vadd.xlane.f32.xlu0 %v4678_v14 }
 0xb81   : > { %v4676_v30 = vadd.f32 %v4673_v46, %v4664_v47 }
 0xb82   : > { %v4668_v9 = vpop.f32.mrb[94].mxu1 }
 0xb83   : > { %v4669_v54 = vadd.f32 %v8873_v48, %v4668_v9  ;;  %v8128_v59 = vpop.f32.mrb[95].mxu1  ;;  %v4681_v0 = vsel %vm1143_vm7, %v4676_v30, 0.0  ;;  %v5025_v48 = vld [vmem:[%s9119_s12 + $0xa8] sm:$0xff] }
 0xb84   : > { %4682 = vadd.xlane.f32.xlu1 %v4681_v0  ;;  %v8499_v29 = vpack.c.bf16 %v5025_v48, %v5021_v55  ;;  %v5247_v55 = vld [vmem:[%s9129_s14 + $0x218] sm:$0xff]  ;;  %v8511_v48 = vpack.c.bf16 %v5263_v33, %v5262_v52  ;;  %v8527_v52 = vpack.c.bf16 %v5271_v12, %v5270_v49 }
 0xb85   : > { %v4677_v51 = vadd.f32 %v4674_v10, %v4669_v54  ;;  %v5303_v33 = vld [vmem:[%s9129_s14 + $0x3d8] sm:$0xff] }
 0xb86   : > { %8500 = vmatprep.subr.bf16.mxu0 %v8499_v29  ;;  %v5278_v29 = vld [vmem:[%s9129_s14 + $0x310] sm:$0xff] }
 0xb87   : > { %v4684_v15 = vsel %vm1242_vm8, %v4677_v51, 0.0 }
 0xb88   : > { %4685 = vadd.xlane.f32.xlu0 %v4684_v15 }
 0xc0d   : > { %v4680_v58 = vpop.xlane.xlu0 %4679 }
 0xc0e   : > { %v4687_v16 = vmul.f32 0.05, %v4680_v58  ;;  %v5024_v58 = vld [vmem:[%s9119_s12 + $0xa0] sm:$0xff] }
 0xc10   : > { %v10049_v23 = vsub.f32 %v4675_v41, %v4687_v16  ;;  %v5027_v41 = vld [vmem:[%s9119_s12 + $0xb8] sm:$0xff]  ;;  %v5022_v16 = vld [vmem:[%s9119_s12 + $0x30] sm:$0xff] }
 0xc11   : > { %v4683_v63 = vpop.xlane.xlu1 %4682  ;;  %v8503_v50 = vpack.c.bf16 %v5027_v41, %v5023_v11  ;;  %v8543_v11 = vpack.c.bf16 %v5295_v35, %v5294_v37  ;;  %v5279_v41 = vld [vmem:[%s9129_s14 + $0x318] sm:$0xff]  ;;  %v5254_v37 = vld [vmem:[%s9129_s14 + $0x250] sm:$0xff] }
 0xc12   : > { %v4688_v18 = vmul.f32 0.05, %v4683_v63  ;;  %v4693_v20 = vmul.f32 %v10049_v23, %v10049_v23  ;;  %v8874_v63 = vld [vmem:[%s10761_s28] ss:$0 sm:$0xff]  ;;  %v5255_v35 = vld [vmem:[%s9129_s14 + $0x258] sm:$0xff] }
 0xc13   : > { %8504 = vmatprep.subr.bf16.mxu1 %v8503_v50  ;;  %v5264_v50 = vld [vmem:[%s9129_s14 + $0x2a0] sm:$0xff] }
 0xc14   : > { %v10055_v8 = vsub.f32 %v4676_v30, %v4688_v18  ;;  %v4696_v19 = vsel %vm1143_vm7, %v4693_v20, 0.0 }
 0xc15   : > { %4697 = vadd.xlane.f32.xlu1 %v4696_v19  ;;  %v4686_v22 = vpop.xlane.xlu0 %4685  ;;  %v8505_v19 = vpack.c.bf16 %v5026_v56, %v5022_v16  ;;  %v5298_v16 = vld [vmem:[%s9129_s14 + $0x3b0] sm:$0xff]  ;;  %v5299_v56 = vld [vmem:[%s9129_s14 + $0x3b8] sm:$0xff] }
 0xc16   : > { %v4689_v43 = vmul.f32 0.05, %v4686_v22  ;;  %v4694_v25 = vmul.f32 %v10055_v8, %v10055_v8  ;;  %v8875_v22 = vld [vmem:[%s10762_s25] ss:$0 sm:$0xff] }
 0xc18   : > { %v10063_v6 = vsub.f32 %v4677_v51, %v4689_v43  ;;  %v4699_v60 = vsel %vm1143_vm7, %v4694_v25, 0.0  ;;  %v5020_v51 = vld [vmem:[%s9119_s12 + $0x20] sm:$0xff] }
 0xc19   : > { %4700 = vadd.xlane.f32.xlu0 %v4699_v60  ;;  %v8501_v57 = vpack.c.bf16 %v5024_v58, %v5020_v51  ;;  %v5029_v60 = vld [vmem:[%s9119_s12 + $0x128] sm:$0xf]  ;;  %v5267_v58 = vld [vmem:[%s9129_s14 + $0x2b8] sm:$0xff] }
 0xc1a   : > { %v4695_v26 = vmul.f32 %v10063_v6, %v10063_v6  ;;  %v5281_v51 = vld [vmem:[%s9129_s14 + $0x328] sm:$0xff] }
 0xc1c   : > { %v4702_v38 = vsel %vm1242_vm8, %v4695_v26, 0.0  ;;  %v5261_v26 = vld [vmem:[%s9129_s14 + $0x288] sm:$0xff] }
 0xc1d   : > { %4703 = vadd.xlane.f32.xlu1 %v4702_v38  ;;  %4105 = vadd.xlane.f32.xlu0 %v4104_v27  ;;  %v5292_v38 = vld [vmem:[%s9129_s14 + $0x380] sm:$0xff]  ;;  %v5293_v27 = vld [vmem:[%s9129_s14 + $0x388] sm:$0xff]  ;;  %v8507_v62 = vpack.c.bf16 %v5261_v26, %v5260_v61 }
 0xc1e   : > { %v8539_v32 = vpack.c.bf16 %v5293_v27, %v5292_v38  ;;  %v5269_v26 = vld [vmem:[%s9129_s14 + $0x2c8] sm:$0xff]  ;;  %v5300_v38 = vld [vmem:[%s9129_s14 + $0x3c0] sm:$0xff] }
 0xc21   : > { %4108 = vadd.xlane.f32.xlu1 %v4107_v42  ;;  %4111 = vadd.xlane.f32.xlu0 %v4110_v7 }
 0xca2   : > { %v4698_v46 = vpop.xlane.xlu1 %4697 }
 0xca3   : > { %v4705_v47 = vmul.f32 0.05, %v4698_v46  ;;  %v5265_v46 = vld [vmem:[%s9129_s14 + $0x2a8] sm:$0xff] }
 0xca5   : > { %v4708_v13 = vadd.f32 1e-05, %v4705_v47  ;;  %v5296_v47 = vld [vmem:[%s9129_s14 + $0x3a0] sm:$0xff] }
 0xca6   : > { %v4701_v14 = vpop.xlane.xlu0 %4700 }
 0xca7   : > { %8853 = vrsqrt.f32 %v4708_v13  ;;  %v4706_v30 = vmul.f32 0.05, %v4701_v14  ;;  %v5297_v13 = vld [vmem:[%s9129_s14 + $0x3a8] sm:$0xff]  ;;  %v8513_v14 = vpack.c.bf16 %v5247_v55, %v5246_v40  ;;  %v5286_v40 = vld [vmem:[%s9129_s14 + $0x350] sm:$0xff]  ;;  %v5287_v55 = vld [vmem:[%s9129_s14 + $0x358] sm:$0xff] }
 0xca9   : > { %v4709_v9 = vadd.f32 1e-05, %v4706_v30  ;;  %v8545_v30 = vpack.c.bf16 %v5279_v41, %v5278_v29  ;;  %v5273_v29 = vld [vmem:[%s9129_s14 + $0x2e8] sm:$0xff]  ;;  %v5304_v41 = vld [vmem:[%s9129_s14 + $0x3e0] sm:$0xff] }
 0xcaa   : > { %v4704_v10 = vpop.xlane.xlu1 %4703 }
 0xcab   : > { %8855 = vrsqrt.f32 %v4709_v9  ;;  %v4707_v54 = vmul.f32 0.05, %v4704_v10  ;;  %v5248_v9 = vld [vmem:[%s9129_s14 + $0x220] sm:$0xff]  ;;  %v5249_v10 = vld [vmem:[%s9129_s14 + $0x228] sm:$0xff] }
 0xcad   : > { %v4710_v59 = vadd.f32 1e-05, %v4707_v54  ;;  %v8515_v54 = vpack.c.bf16 %v5265_v46, %v5264_v50  ;;  %v5305_v46 = vld [vmem:[%s9129_s14 + $0x3e8] sm:$0xff] }
 0xcaf   : > { %8857 = vrsqrt.f32 %v4710_v59  ;;  %v8547_v59 = vpack.c.bf16 %v5297_v13, %v5296_v47  ;;  %v5256_v47 = vld [vmem:[%s9129_s14 + $0x260] sm:$0xff]  ;;  %v5257_v13 = vld [vmem:[%s9129_s14 + $0x268] sm:$0xff] }
 0xcb1   : > { %v8854_v0 = vpop.eup %8853 }
 0xcb2   : > { %v4714_v15 = vmul.f32 %v8854_v0, %v10049_v23  ;;  %v5280_v0 = vld [vmem:[%s9129_s14 + $0x320] sm:$0xff] }
 0xcb4   : > { %v4717_v18 = vmul.f32 %v8874_v63, %v4714_v15  ;;  %v5266_v15 = vld [vmem:[%s9129_s14 + $0x2b0] sm:$0xff] }
 0xcb5   : > { %v8856_v20 = vpop.eup %8855 }
 0xcb6   : > { %v10110_v43 = vadd.f32 %v8875_v22, %v4717_v18  ;;  %v4715_v25 = vmul.f32 %v8856_v20, %v10055_v8  ;;  %v8549_v18 = vpack.c.bf16 %v5281_v51, %v5280_v0  ;;  %v5250_v20 = vld [vmem:[%s9129_s14 + $0x230] sm:$0xff]  ;;  %v5275_v0 = vld [vmem:[%s9129_s14 + $0x2f8] sm:$0xff] }
 0xcb7   : > { %v5306_v51 = vld [vmem:[%s9129_s14 + $0x3f0] sm:$0xff] }
 0xcb8   : > { %v4718_v23 = vmul.f32 %v8874_v63, %v4715_v25  ;;  %7077 = vmatmul.mubr.msk.f32.vlgmr.msra.gmra.mrb[96].mxu0 %vm1143_vm7, %v10110_v43  ;;  %7082 = vmatmul.mubr.msk.f32.vlgmr.msra.gmra.mrb[96].mxu1 %vm1143_vm7, %v10110_v43  ;;  %v5282_v25 = vld [vmem:[%s9129_s14 + $0x330] sm:$0xff] }
 0xcb9   : > { %v8858_v42 = vpop.eup %8857  ;;  %8502 = vmatpush1.bf16.msra.mxu0 %v8501_v57  ;;  %8506 = vmatpush1.bf16.msra.mxu1 %v8505_v19  ;;  %v8519_v57 = vpack.c.bf16 %v5267_v58, %v5266_v15  ;;  %v8551_v19 = vpack.c.bf16 %v5299_v56, %v5298_v16  ;;  %v5307_v58 = vld [vmem:[%s9129_s14 + $0x3f8] sm:$0xff]  ;;  %v5258_v16 = vld [vmem:[%s9129_s14 + $0x270] sm:$0xff] }
 0xcba   : > { %v10123_v7 = vadd.f32 %v8875_v22, %v4718_v23  ;;  %v4716_v8 = vmul.f32 %v8858_v42, %v10063_v6  ;;  %4848 = vmatprep.mubr.f32.mxu0 %v8917_v34  ;;  %4931 = vmatprep.mubr.f32.mxu1 %v8917_v34  ;;  %v5268_v23 = vld [vmem:[%s9129_s14 + $0x2c0] sm:$0xff]  ;;  %v5301_v42 = vld [vmem:[%s9129_s14 + $0x3c8] sm:$0xff]  ;;  %v5259_v56 = vld [vmem:[%s9129_s14 + $0x278] sm:$0xff] }
 0xcbb   : > { %7085 = vmatprep.subr.msk.mxu0 %vm1153_vm6, %v5029_v60  ;;  %7090 = vmatprep.subr.msk.mxu1 %vm1153_vm6, %v5031_v17  ;;  %v5283_v60 = vld [vmem:[%s9129_s14 + $0x338] sm:$0xff]  ;;  %v8523_v27 = vpack.c.bf16 %v5269_v26, %v5268_v23 }
 0xcbc   : > { %v4719_v53 = vmul.f32 %v8874_v63, %v4716_v8  ;;  %7078 = vmatmul.mubr.msk.f32.gmra.mrb[98].mxu0 %vm1143_vm7, %v10123_v7  ;;  %7083 = vmatmul.mubr.msk.f32.gmra.mrb[98].mxu1 %vm1143_vm7, %v10123_v7  ;;  %v8517_v63 = vpack.c.bf16 %v5249_v10, %v5248_v9  ;;  %v8553_v61 = vpack.c.bf16 %v5283_v60, %v5282_v25  ;;  %v5252_v8 = vld [vmem:[%s9129_s14 + $0x240] sm:$0xff]  ;;  %v5289_v10 = vld [vmem:[%s9129_s14 + $0x368] sm:$0xff] }
 0xcbd   : > { %4854 = vmatprep.mubr.f32.mxu0 %v8917_v34  ;;  %4937 = vmatprep.mubr.f32.mxu1 %v8917_v34  ;;  %v5288_v9 = vld [vmem:[%s9129_s14 + $0x360] sm:$0xff]  ;;  %v4973_v25 = vld [vmem:[%s9129_s14 + $0x88] sm:$0xff] }
 0xcbe   : > { %v10138_v6 = vadd.f32 %v8875_v22, %v4719_v53  ;;  %7086 = vmatpush1.msk.msra.mxu0 %vm1153_vm6, %v5028_v28  ;;  %7091 = vmatpush1.msk.msra.mxu1 %vm1153_vm6, %v5030_v31  ;;  %v5251_v22 = vld [vmem:[%s9129_s14 + $0x238] sm:$0xff]  ;;  %v5253_v28 = vld [vmem:[%s9129_s14 + $0x248] sm:$0xff]  ;;  %v8555_v31 = vpack.c.bf16 %v5301_v42, %v5300_v38  ;;  %v5004_v60 = vld [vmem:[%s9129_s14 + $0x180] sm:$0xff] }
 0xcbf   : > { %8508 = vmatprep.subr.bf16.mxu0 %v8507_v62  ;;  %8540 = vmatprep.subr.bf16.mxu1 %v8539_v32  ;;  %v8521_v17 = vpack.c.bf16 %v5251_v22, %v5250_v20  ;;  %v8525_v62 = vpack.c.bf16 %v5253_v28, %v5252_v8  ;;  %v5284_v32 = vld [vmem:[%s9129_s14 + $0x340] sm:$0xff]  ;;  %v5285_v53 = vld [vmem:[%s9129_s14 + $0x348] sm:$0xff]  ;;  %v5290_v20 = vld [vmem:[%s9129_s14 + $0x370] sm:$0xff] }
 0xcc0   : > { %7079 = vmatmul.mubr.msk.f32.gmra.mrb[100].mxu0 %vm1143_vm7, %v10138_v6  ;;  %7084 = vmatmul.mubr.msk.f32.gmra.mrb[100].mxu1 %vm1143_vm7, %v10138_v6  ;;  %v8557_v44 = vpack.c.bf16 %v5285_v53, %v5284_v32  ;;  %v4972_v22 = vld [vmem:[%s9129_s14 + $0x80] sm:$0xff] }
 0xcc1   : > { %5130 = vmatprep.mubr.f32.mxu0 %v8917_v34  ;;  %5213 = vmatprep.mubr.f32.mxu1 %v8917_v34  ;;  %v5032_v32 = vld [vmem:[%s9124_s13 + $0x4] sm:$0xf] }
 0xcc4   : > { %7087 = vmatmul.mubr.msk.f32.vlgmr.msra.gmra.mrb[102].mxu0 %vm1143_vm7, %v10110_v43  ;;  %7092 = vmatmul.mubr.msk.f32.vlgmr.msra.gmra.mrb[102].mxu1 %vm1143_vm7, %v10110_v43 }
 0xcc5   : > { %5136 = vmatprep.mubr.f32.mxu0 %v8917_v34  ;;  %5219 = vmatprep.mubr.f32.mxu1 %v8917_v34 }
 0xcc6   : > { %8510 = vmatpush3.bf16.msra.mxu0 %v8509_v36  ;;  %8542 = vmatpush3.bf16.msra.mxu1 %v8541_v39  ;;  %v8559_v36 = vpack.c.bf16 %v5303_v33, %v5302_v45  ;;  %v8529_v39 = vpack.c.bf16 %v5255_v35, %v5254_v37  ;;  %v10254_v45 = vrot.slane %v5032_v32, %v9602_v1  ;;  %v4956_v35 = vld [vmem:[%s9129_s14] sm:$0xff] }
 0xcc7   : > { %8512 = vmatprep.subr.bf16.mxu0 %v8511_v48  ;;  %8544 = vmatprep.subr.bf16.mxu1 %v8543_v11  ;;  %v8561_v48 = vpack.c.bf16 %v5287_v55, %v5286_v40  ;;  %v5272_v11 = vld [vmem:[%s9129_s14 + $0x2e0] sm:$0xff]  ;;  %v10260_v33 = vrot.slane %v5032_v32, %v9606_v3  ;;  %v10263_v37 = vrot.slane %v5032_v32, %v9608_v4 }
 0xcc8   : > { %7088 = vmatmul.mubr.msk.f32.gmra.mrb[104].mxu0 %vm1143_vm7, %v10123_v7  ;;  %7093 = vmatmul.mubr.msk.f32.gmra.mrb[104].mxu1 %vm1143_vm7, %v10123_v7  ;;  %v8531_v50 = vpack.c.bf16 %v5273_v29, %v5272_v11  ;;  %v4988_v55 = vld [vmem:[%s9129_s14 + $0x100] sm:$0xff]  ;;  %v4974_v11 = vld [vmem:[%s9129_s14 + $0x90] sm:$0xff] }
 0xcc9   : > { %5142 = vmatprep.mubr.f32.mxu0 %v8917_v34  ;;  %5225 = vmatprep.mubr.f32.mxu1 %v8917_v34 }
 0xcca   : > { %8514 = vmatpush3.bf16.msra.mxu0 %v8513_v14  ;;  %8546 = vmatpush3.bf16.msra.mxu1 %v8545_v30  ;;  %v8563_v14 = vpack.c.bf16 %v5305_v46, %v5304_v41  ;;  %v8533_v30 = vpack.c.bf16 %v5257_v13, %v5256_v47  ;;  %v4975_v47 = vld [vmem:[%s9129_s14 + $0x98] sm:$0xff]  ;;  %v5006_v13 = vld [vmem:[%s9129_s14 + $0x190] sm:$0xff] }
 0xccb   : > { %8516 = vmatprep.subr.bf16.mxu0 %v8515_v54  ;;  %8548 = vmatprep.subr.bf16.mxu1 %v8547_v59  ;;  %v8565_v54 = vpack.c.bf16 %v5289_v10, %v5288_v9  ;;  %v5274_v59 = vld [vmem:[%s9129_s14 + $0x2f0] sm:$0xff] }
 0xccc   : > { %7089 = vmatmul.mubr.msk.f32.gmra.mrb[106].mxu0 %vm1143_vm7, %v10138_v6  ;;  %7094 = vmatmul.mubr.msk.f32.gmra.mrb[106].mxu1 %vm1143_vm7, %v10138_v6  ;;  %v8535_v15 = vpack.c.bf16 %v5275_v0, %v5274_v59 }
 0xcce   : > { %8518 = vmatpush3.bf16.msra.mxu0 %v8517_v63  ;;  %8550 = vmatpush3.bf16.msra.mxu1 %v8549_v18  ;;  %v8567_v63 = vpack.c.bf16 %v5307_v58, %v5306_v51  ;;  %v8537_v18 = vpack.c.bf16 %v5259_v56, %v5258_v16  ;;  %v10284_v51 = vld [vmem:[%s9129_s14 + $0x18] sm:$0xff] }
 0xccf   : > { %8520 = vmatprep.subr.bf16.mxu0 %v8519_v57  ;;  %8552 = vmatprep.subr.bf16.mxu1 %v8551_v19  ;;  %v5291_v57 = vld [vmem:[%s9129_s14 + $0x378] sm:$0xff] }
 0xcd0   : > { %v8569_v19 = vpack.c.bf16 %v5291_v57, %v5290_v20  ;;  %v4991_v58 = vld [vmem:[%s9129_s14 + $0x118] sm:$0xff]  ;;  %v8575_v20 = vpack.c.bf16 %v4975_v47, %v4974_v11 }
 0xcd2   : > { %8522 = vmatpush3.bf16.msra.mxu0 %v8521_v17  ;;  %8554 = vmatpush3.bf16.msra.mxu1 %v8553_v61  ;;  %v8571_v17 = vpack.c.bf16 %v4973_v25, %v4972_v22  ;;  %v5005_v61 = vld [vmem:[%s9129_s14 + $0x188] sm:$0xff] }
 0xcd3   : > { %8524 = vmatprep.subr.bf16.mxu0 %v8523_v27  ;;  %8556 = vmatprep.subr.bf16.mxu1 %v8555_v31  ;;  %v8603_v23 = vpack.c.bf16 %v5005_v61, %v5004_v60  ;;  %v4977_v22 = vld [vmem:[%s9129_s14 + $0xa8] sm:$0xff] }
 0xcd6   : > { %8526 = vmatpush3.bf16.msra.mxu0 %v8525_v62  ;;  %8558 = vmatpush3.bf16.msra.mxu1 %v8557_v44 }
 0xcd7   : > { %8528 = vmatprep.subr.bf16.mxu0 %v8527_v52  ;;  %8560 = vmatprep.subr.bf16.mxu1 %v8559_v36  ;;  %v10257_v52 = vrot.slane %v5032_v32, %v9604_v2  ;;  %v4957_v36 = vld [vmem:[%s9129_s14 + $0x8] sm:$0xff] }
 0xcd8   : > { %v8573_v59 = vpack.c.bf16 %v4957_v36, %v4956_v35  ;;  %v5008_v35 = vld [vmem:[%s9129_s14 + $0x1a0] sm:$0xff]  ;;  %v5009_v36 = vld [vmem:[%s9129_s14 + $0x1a8] sm:$0xff] }
 0xcda   : > { %8530 = vmatpush3.bf16.msra.mxu0 %v8529_v39  ;;  %8562 = vmatpush3.bf16.msra.mxu1 %v8561_v48  ;;  %v4989_v48 = vld [vmem:[%s9129_s14 + $0x108] sm:$0xff] }
 0xcdb   : > { %8532 = vmatprep.subr.bf16.mxu0 %v8531_v50  ;;  %8564 = vmatprep.subr.bf16.mxu1 %v8563_v14  ;;  %v5007_v14 = vld [vmem:[%s9129_s14 + $0x198] sm:$0xff]  ;;  %v8605_v0 = vpack.c.bf16 %v4989_v48, %v4988_v55 }
 0xcdc   : > { %v8607_v57 = vpack.c.bf16 %v5007_v14, %v5006_v13  ;;  %v8611_v14 = vpack.c.bf16 %v5009_v36, %v5008_v35  ;;  %v4980_v35 = vld [vmem:[%s9129_s14 + $0xc0] sm:$0xff] }
 0xcde   : > { %8534 = vmatpush3.bf16.msra.mxu0 %v8533_v30  ;;  %8566 = vmatpush3.bf16.msra.mxu1 %v8565_v54  ;;  %v10276_v30 = vld [vmem:[%s9124_s13] sm:$0xf]  ;;  %v10281_v54 = vld [vmem:[%s9129_s14 + $0x10] sm:$0xff] }
 0xcdf   : > { %8536 = vmatprep.subr.bf16.mxu0 %v8535_v15  ;;  %8568 = vmatprep.subr.bf16.mxu1 %v8567_v63  ;;  %v10287_v15 = vld [vmem:[%s9129_s14 + $0x110] sm:$0xff]  ;;  %v10304_v48 = vrot.slane %v10276_v30, %v9608_v4  ;;  %v8577_v11 = vpack.c.bf16 %v10284_v51, %v10281_v54 }
 0xce2   : > { %8538 = vmatpush3.bf16.msra.mxu0 %v8537_v18  ;;  %8570 = vmatpush3.bf16.msra.mxu1 %v8569_v19  ;;  %v4976_v19 = vld [vmem:[%s9129_s14 + $0xa0] sm:$0xff] }
 0xce3   : > { %8572 = vmatprep.subr.bf16.mxu0 %v8571_v17  ;;  %8604 = vmatprep.subr.bf16.mxu1 %v8603_v23  ;;  %v8579_v13 = vpack.c.bf16 %v4977_v22, %v4976_v19 }
 0xd8b   : > { %v10228_v26 = vpop.f32.mrb[96].mxu0  ;;  %v10230_v38 = vpop.f32.mrb[96].mxu1 }
 0xd8c   : > { %v10232_v27 = vpop.f32.mrb[97].mxu0  ;;  %v10234_v42 = vpop.f32.mrb[97].mxu1 }
 0xd8d   : > { %v4930_v19 = vadd.f32 %v10234_v42, %v10304_v48 }
 0xd8f   : > { %v10236_v8 = vpop.f32.mrb[98].mxu0  ;;  %v10238_v28 = vpop.f32.mrb[98].mxu1 }
 0xd90   : > { %v10240_v31 = vpop.f32.mrb[99].mxu0  ;;  %v10242_v62 = vpop.f32.mrb[99].mxu1 }
 0xd93   : > { %v10245_v53 = vpop.f32.mrb[100].mxu0  ;;  %v10247_v44 = vpop.f32.mrb[100].mxu1 }
 0xd94   : > { %v10249_v49 = vpop.f32.mrb[101].mxu0  ;;  %v10251_v12 = vpop.f32.mrb[101].mxu1 }
 0xd97   : > { %v5132_v39 = vpop.f32.mrb[102].mxu0  ;;  %v5215_v40 = vpop.f32.mrb[102].mxu1 }
 0xd98   : > { %v5133_v29 = vadd.f32 %v5132_v39, %v10254_v45  ;;  %v5216_v41 = vadd.f32 %v5215_v40, %v10257_v52  ;;  %v5134_v50 = vpop.f32.mrb[103].mxu0  ;;  %v5217_v46 = vpop.f32.mrb[103].mxu1  ;;  %v10298_v39 = vrot.slane %v10276_v30, %v9606_v3 }
 0xd99   : > { %v5135_v9 = vadd.f32 %v5134_v50, %v10260_v33  ;;  %v5218_v10 = vadd.f32 %v5217_v46, %v10263_v37 }
 0xd9a   : > { %v5232_v25 = vmax.f32 %v5133_v29, 0.0  ;;  %v5234_v60 = vmax.f32 %v5216_v41, 0.0  ;;  %v8609_v29 = vpack.c.bf16 %v4991_v58, %v10287_v15  ;;  %v4993_v15 = vld [vmem:[%s9129_s14 + $0x128] sm:$0xff] }
 0xd9b   : > { %v5233_v16 = vmax.f32 %v5135_v9, 0.0  ;;  %v5235_v56 = vmax.f32 %v5218_v10, 0.0  ;;  %v5138_v63 = vpop.f32.mrb[104].mxu0  ;;  %v5221_v18 = vpop.f32.mrb[104].mxu1  ;;  %v4960_v9 = vld [vmem:[%s9129_s14 + $0x20] sm:$0xff]  ;;  %v4961_v10 = vld [vmem:[%s9129_s14 + $0x28] sm:$0xff] }
 0xd9c   : > { %v5139_v17 = vadd.f32 %v5138_v63, %v10254_v45  ;;  %v5222_v61 = vadd.f32 %v5221_v18, %v10257_v52  ;;  %v5140_v23 = vpop.f32.mrb[105].mxu0  ;;  %v5223_v32 = vpop.f32.mrb[105].mxu1 }
 0xd9d   : > { %v5141_v40 = vadd.f32 %v5140_v23, %v10260_v33  ;;  %v5224_v55 = vadd.f32 %v5223_v32, %v10263_v37  ;;  %5372 = vmatprep.mubr.f32.mxu0 %v5233_v16  ;;  %5452 = vmatprep.mubr.f32.mxu1 %v5235_v56  ;;  %v4994_v23 = vld [vmem:[%s9129_s14 + $0x130] sm:$0xff]  ;;  %v4995_v32 = vld [vmem:[%s9129_s14 + $0x138] sm:$0xff] }
 0xd9e   : > { %5373 = vmatmul.mubr.f32.vlgmr.msra.gmra.mrb[108].mxu0 %v5232_v25  ;;  %5453 = vmatmul.mubr.f32.vlgmr.msra.gmra.mrb[108].mxu1 %v5234_v60  ;;  %v5236_v16 = vmax.f32 %v5139_v17, 0.0  ;;  %v5238_v56 = vmax.f32 %v5222_v61, 0.0  ;;  %v8581_v25 = vpack.c.bf16 %v4961_v10, %v4960_v9  ;;  %v4963_v17 = vld [vmem:[%s9129_s14 + $0x38] sm:$0xff] }
 0xd9f   : > { %v5237_v41 = vmax.f32 %v5141_v40, 0.0  ;;  %v5239_v50 = vmax.f32 %v5224_v55, 0.0  ;;  %8574 = vmatpush3.bf16.msra.mxu0 %v8573_v59  ;;  %8606 = vmatpush3.bf16.msra.mxu1 %v8605_v0  ;;  %v5144_v46 = vpop.f32.mrb[106].mxu0  ;;  %v5227_v47 = vpop.f32.mrb[106].mxu1  ;;  %v4992_v0 = vld [vmem:[%s9129_s14 + $0x120] sm:$0xff]  ;;  %v4981_v55 = vld [vmem:[%s9129_s14 + $0xc8] sm:$0xff] }
 0xda0   : > { %v5145_v63 = vadd.f32 %v5144_v46, %v10254_v45  ;;  %v5228_v54 = vadd.f32 %v5227_v47, %v10257_v52  ;;  %v5146_v51 = vpop.f32.mrb[107].mxu0  ;;  %v5229_v59 = vpop.f32.mrb[107].mxu1  ;;  %8576 = vmatprep.subr.bf16.mxu0 %v8575_v20  ;;  %8608 = vmatprep.subr.bf16.mxu1 %v8607_v57  ;;  %v4978_v45 = vld [vmem:[%s9129_s14 + $0xb0] sm:$0xff]  ;;  %v4847_v52 = vadd.f32 %v10232_v27, %v10298_v39  ;;  %v4979_v20 = vld [vmem:[%s9129_s14 + $0xb8] sm:$0xff] }
 0xda1   : > { %v5147_v58 = vadd.f32 %v5146_v51, %v10260_v33  ;;  %v5230_v18 = vadd.f32 %v5229_v59, %v10263_v37  ;;  %5377 = vmatprep.mubr.f32.mxu0 %v5237_v41  ;;  %5457 = vmatprep.mubr.f32.mxu1 %v5239_v50  ;;  %v5010_v57 = vld [vmem:[%s9129_s14 + $0x1b0] sm:$0xff]  ;;  %v5011_v33 = vld [vmem:[%s9129_s14 + $0x1b8] sm:$0xff]  ;;  %v8613_v60 = vpack.c.bf16 %v4993_v15, %v4992_v0  ;;  %v4947_v50 = vmax.f32 %v4930_v19, 0.0 }
 0xda2   : > { %5378 = vmatmul.mubr.f32.gmra.mrb[110].mxu0 %v5236_v16  ;;  %5458 = vmatmul.mubr.f32.gmra.mrb[110].mxu1 %v5238_v56  ;;  %v4962_v27 = vld [vmem:[%s9129_s14 + $0x30] sm:$0xff]  ;;  %v5240_v42 = vmax.f32 %v5145_v63, 0.0  ;;  %v5242_v61 = vmax.f32 %v5228_v54, 0.0  ;;  %v8583_v36 = vpack.c.bf16 %v4979_v20, %v4978_v45  ;;  %v8615_v40 = vpack.c.bf16 %v5011_v33, %v5010_v57  ;;  %v4996_v16 = vld [vmem:[%s9129_s14 + $0x140] sm:$0xff]  ;;  %v4997_v56 = vld [vmem:[%s9129_s14 + $0x148] sm:$0xff] }
 0xda3   : > { %v5241_v37 = vmax.f32 %v5147_v58, 0.0  ;;  %v5243_v22 = vmax.f32 %v5230_v18, 0.0  ;;  %8578 = vmatpush3.bf16.msra.mxu0 %v8577_v11  ;;  %8610 = vmatpush3.bf16.msra.mxu1 %v8609_v29  ;;  %v5012_v11 = vld [vmem:[%s9129_s14 + $0x1c0] sm:$0xff]  ;;  %v5013_v29 = vld [vmem:[%s9129_s14 + $0x1c8] sm:$0xff]  ;;  %v4945_v41 = vmax.f32 %v4847_v52, 0.0  ;;  %v8585_v46 = vpack.c.bf16 %v4963_v17, %v4962_v27  ;;  %v4982_v63 = vld [vmem:[%s9129_s14 + $0xd0] sm:$0xff] }
 0xda4   : > { %8580 = vmatprep.subr.bf16.mxu0 %v8579_v13  ;;  %8612 = vmatprep.subr.bf16.mxu1 %v8611_v14  ;;  %v8617_v47 = vpack.c.bf16 %v4995_v32, %v4994_v23  ;;  %v4964_v13 = vld [vmem:[%s9129_s14 + $0x40] sm:$0xff]  ;;  %v4965_v14 = vld [vmem:[%s9129_s14 + $0x48] sm:$0xff]  ;;  %v8587_v9 = vpack.c.bf16 %v4981_v55, %v4980_v35  ;;  %v8619_v10 = vpack.c.bf16 %v5013_v29, %v5012_v11  ;;  %v4983_v54 = vld [vmem:[%s9129_s14 + $0xd8] sm:$0xff] }
 0xda5   : > { %5382 = vmatprep.mubr.f32.mxu0 %v5241_v37  ;;  %5462 = vmatprep.mubr.f32.mxu1 %v5243_v22  ;;  %v5014_v51 = vld [vmem:[%s9129_s14 + $0x1d0] sm:$0xff]  ;;  %v5015_v59 = vld [vmem:[%s9129_s14 + $0x1d8] sm:$0xff]  ;;  %v8589_v0 = vpack.c.bf16 %v4965_v14, %v4964_v13  ;;  %v8621_v15 = vpack.c.bf16 %v4997_v56, %v4996_v16  ;;  %v8591_v45 = vpack.c.bf16 %v4983_v54, %v4982_v63  ;;  %v4984_v57 = vld [vmem:[%s9129_s14 + $0xe0] sm:$0xff] }
 0xda6   : > { %5383 = vmatmul.mubr.f32.gmra.mrb[112].mxu0 %v5240_v42  ;;  %5463 = vmatmul.mubr.f32.gmra.mrb[112].mxu1 %v5242_v61  ;;  %v4966_v58 = vld [vmem:[%s9129_s14 + $0x50] sm:$0xff]  ;;  %v4967_v18 = vld [vmem:[%s9129_s14 + $0x58] sm:$0xff]  ;;  %v8623_v52 = vpack.c.bf16 %v5015_v59, %v5014_v51  ;;  %v4985_v33 = vld [vmem:[%s9129_s14 + $0xe8] sm:$0xff]  ;;  %v4740_v11 = vrot.slane %v10276_v30, %v9602_v1  ;;  %v4748_v13 = vrot.slane %v10276_v30, %v9604_v2 }
 0xda7   : > { %8582 = vmatpush3.bf16.msra.mxu0 %v8581_v25  ;;  %8614 = vmatpush3.bf16.msra.mxu1 %v8613_v60  ;;  %v4998_v19 = vld [vmem:[%s9129_s14 + $0x150] sm:$0xff]  ;;  %v4999_v20 = vld [vmem:[%s9129_s14 + $0x158] sm:$0xff]  ;;  %v5016_v37 = vld [vmem:[%s9129_s14 + $0x1e0] sm:$0xff]  ;;  %v8593_v25 = vpack.c.bf16 %v4967_v18, %v4966_v58  ;;  %v8595_v42 = vpack.c.bf16 %v4985_v33, %v4984_v57  ;;  %v4936_v57 = vadd.f32 %v10242_v62, %v10304_v48 }
 0xda8   : > { %5532 = vmatprep.mubr.f32.mxu0 %v4945_v41  ;;  %5612 = vmatprep.mubr.f32.mxu1 %v4947_v50  ;;  %v5017_v22 = vld [vmem:[%s9129_s14 + $0x1e8] sm:$0xff]  ;;  %v8625_v60 = vpack.c.bf16 %v4999_v20, %v4998_v19  ;;  %v4968_v27 = vld [vmem:[%s9129_s14 + $0x60] sm:$0xff]  ;;  %v4986_v35 = vld [vmem:[%s9129_s14 + $0xf0] sm:$0xff]  ;;  %v4845_v30 = vadd.f32 %v10228_v26, %v4740_v11  ;;  %v4928_v58 = vadd.f32 %v10230_v38, %v4748_v13 }
 0xda9   : > { %8584 = vmatprep.subr.bf16.mxu0 %v8583_v36  ;;  %8616 = vmatprep.subr.bf16.mxu1 %v8615_v40  ;;  %v4969_v17 = vld [vmem:[%s9129_s14 + $0x68] sm:$0xff]  ;;  %v8627_v61 = vpack.c.bf16 %v5017_v22, %v5016_v37  ;;  %v5000_v23 = vld [vmem:[%s9129_s14 + $0x160] sm:$0xff]  ;;  %v4987_v36 = vld [vmem:[%s9129_s14 + $0xf8] sm:$0xff]  ;;  %v4853_v20 = vadd.f32 %v10240_v31, %v10298_v39  ;;  %v4851_v22 = vadd.f32 %v10236_v8, %v4740_v11 }
 0xdaa   : > { %v5001_v32 = vld [vmem:[%s9129_s14 + $0x168] sm:$0xff]  ;;  %v5018_v40 = vld [vmem:[%s9129_s14 + $0x1f0] sm:$0xff]  ;;  %v5019_v55 = vld [vmem:[%s9129_s14 + $0x1f8] sm:$0xff]  ;;  %v8597_v29 = vpack.c.bf16 %v4969_v17, %v4968_v27  ;;  %v8599_v14 = vpack.c.bf16 %v4987_v36, %v4986_v35  ;;  %v4944_v37 = vmax.f32 %v4845_v30, 0.0  ;;  %v4946_v38 = vmax.f32 %v4928_v58, 0.0 }
 0xdab   : > { %8586 = vmatpush3.bf16.msra.mxu0 %v8585_v46  ;;  %8618 = vmatpush3.bf16.msra.mxu1 %v8617_v47  ;;  %v8629_v41 = vpack.c.bf16 %v5001_v32, %v5000_v23  ;;  %v4970_v50 = vld [vmem:[%s9129_s14 + $0x70] sm:$0xff]  ;;  %v4971_v46 = vld [vmem:[%s9129_s14 + $0x78] sm:$0xff]  ;;  %v5629_v16 = vld [vmem:[%s9119_s12 + $0x48] sm:$0xff]  ;;  %v4951_v27 = vmax.f32 %v4936_v57, 0.0  ;;  %v4859_v31 = vadd.f32 %v10249_v49, %v10298_v39  ;;  %v4942_v62 = vadd.f32 %v10251_v12, %v10304_v48 }
 0xdac   : > { %8588 = vmatprep.subr.bf16.mxu0 %v8587_v9  ;;  %8620 = vmatprep.subr.bf16.mxu1 %v8619_v10  ;;  %v5002_v47 = vld [vmem:[%s9129_s14 + $0x170] sm:$0xff]  ;;  %v8631_v9 = vpack.c.bf16 %v5019_v55, %v5018_v40  ;;  %v5003_v10 = vld [vmem:[%s9129_s14 + $0x178] sm:$0xff]  ;;  %v5633_v56 = vld [vmem:[%s9119_s12 + $0xc8] sm:$0xff]  ;;  %v8601_v51 = vpack.c.bf16 %v4971_v46, %v4970_v50  ;;  %v4948_v8 = vmax.f32 %v4851_v22, 0.0  ;;  %v4940_v23 = vadd.f32 %v10247_v44, %v4748_v13 }
 0xdad   : > { %v5631_v63 = vld [vmem:[%s9119_s12 + $0x58] sm:$0xff]  ;;  %v8633_v59 = vpack.c.bf16 %v5003_v10, %v5002_v47  ;;  %v5634_v19 = vld [vmem:[%s9119_s12 + $0xd0] sm:$0xff]  ;;  %v5637_v17 = vld [vmem:[%s9119_s12 + $0x148] sm:$0xf]  ;;  %v4953_v49 = vmax.f32 %v4859_v31, 0.0  ;;  %v4955_v39 = vmax.f32 %v4942_v62, 0.0 }
 0xdae   : > { %v5635_v54 = vld [vmem:[%s9119_s12 + $0xd8] sm:$0xff]  ;;  %v5636_v12 = vld [vmem:[%s9119_s12 + $0x140] sm:$0xf]  ;;  %v5638_v48 = vld [vmem:[%s9119_s12 + $0x150] sm:$0xf]  ;;  %v4954_v35 = vmax.f32 %v4940_v23, 0.0 }
 0xdaf   : > { %8590 = vmatpush3.bf16.msra.mxu0 %v8589_v0  ;;  %8622 = vmatpush3.bf16.msra.mxu1 %v8621_v15  ;;  %v8635_v0 = vpack.c.bf16 %v5633_v56, %v5629_v16  ;;  %v5628_v15 = vld [vmem:[%s9119_s12 + $0x40] sm:$0xff]  ;;  %v8639_v18 = vpack.c.bf16 %v5635_v54, %v5631_v63  ;;  %v5869_v44 = vld [vmem:[%s9129_s14 + $0x488] sm:$0xff]  ;;  %v5902_v10 = vld [vmem:[%s9129_s14 + $0x590] sm:$0xff] }
 0xdb0   : > { %8592 = vmatprep.subr.bf16.mxu0 %v8591_v45  ;;  %8624 = vmatprep.subr.bf16.mxu1 %v8623_v52  ;;  %v5632_v45 = vld [vmem:[%s9119_s12 + $0xc0] sm:$0xff]  ;;  %v5630_v52 = vld [vmem:[%s9119_s12 + $0x50] sm:$0xff]  ;;  %v5901_v55 = vld [vmem:[%s9129_s14 + $0x588] sm:$0xff] }
 0xdb1   : > { %v8637_v33 = vpack.c.bf16 %v5632_v45, %v5628_v15  ;;  %v8641_v26 = vpack.c.bf16 %v5634_v19, %v5630_v52  ;;  %v5900_v36 = vld [vmem:[%s9129_s14 + $0x580] sm:$0xff]  ;;  %v5885_v47 = vld [vmem:[%s9129_s14 + $0x508] sm:$0xff]  ;;  %v5903_v16 = vld [vmem:[%s9129_s14 + $0x598] sm:$0xff] }
 0xdb2   : > { %v5884_v46 = vld [vmem:[%s9129_s14 + $0x500] sm:$0xff]  ;;  %v8679_v63 = vpack.c.bf16 %v5903_v16, %v5902_v10  ;;  %v5854_v54 = vld [vmem:[%s9129_s14 + $0x410] sm:$0xff]  ;;  %v5887_v15 = vld [vmem:[%s9129_s14 + $0x518] sm:$0xff] }
 0xdb3   : > { %8594 = vmatpush3.bf16.msra.mxu0 %v8593_v25  ;;  %8626 = vmatpush3.bf16.msra.mxu1 %v8625_v60  ;;  %v4934_v25 = vadd.f32 %v10238_v28, %v4748_v13  ;;  %v4949_v60 = vmax.f32 %v4853_v20, 0.0  ;;  %v5870_v13 = vld [vmem:[%s9129_s14 + $0x490] sm:$0xff]  ;;  %v5872_v30 = vld [vmem:[%s9129_s14 + $0x4a0] sm:$0xff]  ;;  %v5873_v58 = vld [vmem:[%s9129_s14 + $0x4a8] sm:$0xff] }
 0xdb4   : > { %8596 = vmatprep.subr.bf16.mxu0 %v8595_v42  ;;  %8628 = vmatprep.subr.bf16.mxu1 %v8627_v61  ;;  %v5639_v42 = vld [vmem:[%s9119_s12 + $0x158] sm:$0xf]  ;;  %v4857_v61 = vadd.f32 %v10245_v53, %v4740_v11  ;;  %v5868_v53 = vld [vmem:[%s9129_s14 + $0x480] sm:$0xff]  ;;  %v8651_v45 = vpack.c.bf16 %v5873_v58, %v5872_v30  ;;  %v5905_v19 = vld [vmem:[%s9129_s14 + $0x5a8] sm:$0xff] }
 0xdb5   : > { %v4950_v28 = vmax.f32 %v4934_v25, 0.0  ;;  %v8643_v40 = vpack.c.bf16 %v5869_v44, %v5868_v53  ;;  %v5852_v11 = vld [vmem:[%s9129_s14 + $0x400] sm:$0xff]  ;;  %v5874_v22 = vld [vmem:[%s9129_s14 + $0x4b0] sm:$0xff]  ;;  %v5875_v25 = vld [vmem:[%s9129_s14 + $0x4b8] sm:$0xff] }
 0xdb6   : > { %v4952_v32 = vmax.f32 %v4857_v61, 0.0  ;;  %v5904_v52 = vld [vmem:[%s9129_s14 + $0x5a0] sm:$0xff]  ;;  %v8655_v31 = vpack.c.bf16 %v5875_v25, %v5874_v22  ;;  %v5907_v62 = vld [vmem:[%s9129_s14 + $0x5b8] sm:$0xff]  ;;  %v5861_v44 = vld [vmem:[%s9129_s14 + $0x448] sm:$0xff] }
 0xdb7   : > { %8598 = vmatpush3.bf16.msra.mxu0 %v8597_v29  ;;  %8630 = vmatpush3.bf16.msra.mxu1 %v8629_v41  ;;  %v5853_v29 = vld [vmem:[%s9129_s14 + $0x408] sm:$0xff]  ;;  %v8675_v41 = vpack.c.bf16 %v5901_v55, %v5900_v36  ;;  %v5856_v20 = vld [vmem:[%s9129_s14 + $0x420] sm:$0xff]  ;;  %v8683_v57 = vpack.c.bf16 %v5905_v19, %v5904_v52  ;;  %v5891_v23 = vld [vmem:[%s9129_s14 + $0x538] sm:$0xff] }
 0xdb8   : > { %8600 = vmatprep.subr.bf16.mxu0 %v8599_v14  ;;  %8632 = vmatprep.subr.bf16.mxu1 %v8631_v9  ;;  %v8645_v50 = vpack.c.bf16 %v5853_v29, %v5852_v11  ;;  %v8677_v14 = vpack.c.bf16 %v5885_v47, %v5884_v46  ;;  %v5871_v9 = vld [vmem:[%s9129_s14 + $0x498] sm:$0xff]  ;;  %v5860_v53 = vld [vmem:[%s9129_s14 + $0x440] sm:$0xff]  ;;  %v5893_v11 = vld [vmem:[%s9129_s14 + $0x548] sm:$0xff] }
 0xdb9   : > { %v8647_v56 = vpack.c.bf16 %v5871_v9, %v5870_v13  ;;  %v5892_v55 = vld [vmem:[%s9129_s14 + $0x540] sm:$0xff]  ;;  %v5910_v46 = vld [vmem:[%s9129_s14 + $0x5d0] sm:$0xff]  ;;  %v5911_v13 = vld [vmem:[%s9129_s14 + $0x5d8] sm:$0xff] }
 0xdba   : > { %v8693_v29 = vpack.c.bf16 %v5893_v11, %v5892_v55  ;;  %v5863_v9 = vld [vmem:[%s9129_s14 + $0x458] sm:$0xff]  ;;  %v8695_v10 = vpack.c.bf16 %v5911_v13, %v5910_v46  ;;  %v5913_v30 = vld [vmem:[%s9129_s14 + $0x5e8] sm:$0xff]  ;;  %v5864_v58 = vld [vmem:[%s9129_s14 + $0x460] sm:$0xff] }
 0xdbb   : > { %8602 = vmatpush3.bf16.msra.mxu0 %v8601_v51  ;;  %8634 = vmatpush3.bf16.msra.mxu1 %v8633_v59  ;;  %v5855_v51 = vld [vmem:[%s9129_s14 + $0x418] sm:$0xff]  ;;  %v5886_v59 = vld [vmem:[%s9129_s14 + $0x510] sm:$0xff]  ;;  %v5896_v19 = vld [vmem:[%s9129_s14 + $0x560] sm:$0xff] }
 0xdbc   : > { %8636 = vmatprep.subr.bf16.mxu0 %v8635_v0  ;;  %8640 = vmatprep.subr.bf16.mxu1 %v8639_v18  ;;  %v8649_v0 = vpack.c.bf16 %v5855_v51, %v5854_v54  ;;  %v8681_v18 = vpack.c.bf16 %v5887_v15, %v5886_v59  ;;  %v5880_v51 = vld [vmem:[%s9129_s14 + $0x4e0] sm:$0xff]  ;;  %v5881_v59 = vld [vmem:[%s9129_s14 + $0x4e8] sm:$0xff]  ;;  %v5915_v22 = vld [vmem:[%s9129_s14 + $0x5f8] sm:$0xff] }
 0xdbd   : > { %v8667_v15 = vpack.c.bf16 %v5881_v59, %v5880_v51  ;;  %v5866_v25 = vld [vmem:[%s9129_s14 + $0x470] sm:$0xff] }
 0xdbe   : > { %5533 = vmatmul.mubr.f32.vlgmr.msra.gmra.mrb[114].mxu0 %v4944_v37  ;;  %5613 = vmatmul.mubr.f32.vlgmr.msra.gmra.mrb[114].mxu1 %v4946_v38  ;;  %v5889_v37 = vld [vmem:[%s9129_s14 + $0x528] sm:$0xff] }
 0xdbf   : > { %5537 = vmatprep.mubr.f32.mxu0 %v4949_v60  ;;  %5617 = vmatprep.mubr.f32.mxu1 %v4951_v27  ;;  %v5906_v60 = vld [vmem:[%s9129_s14 + $0x5b0] sm:$0xff] }
 0xdc0   : > { %8638 = vmatpush1.bf16.msra.mxu0 %v8637_v33  ;;  %8642 = vmatpush1.bf16.msra.mxu1 %v8641_v26  ;;  %v5857_v33 = vld [vmem:[%s9129_s14 + $0x428] sm:$0xff]  ;;  %v5888_v26 = vld [vmem:[%s9129_s14 + $0x520] sm:$0xff] }
 0xdc1   : > { %7095 = vmatprep.subr.msk.mxu0 %vm1153_vm6, %v5637_v17  ;;  %7100 = vmatprep.subr.msk.mxu1 %vm1153_vm6, %v5639_v42  ;;  %v8653_v38 = vpack.c.bf16 %v5857_v33, %v5856_v20  ;;  %v8685_v27 = vpack.c.bf16 %v5889_v37, %v5888_v26  ;;  %v8687_v17 = vpack.c.bf16 %v5907_v62, %v5906_v60  ;;  %v5858_v42 = vld [vmem:[%s9129_s14 + $0x430] sm:$0xff]  ;;  %v5897_v20 = vld [vmem:[%s9129_s14 + $0x568] sm:$0xff]  ;;  %v5883_v26 = vld [vmem:[%s9129_s14 + $0x4f8] sm:$0xff] }
 0xdc2   : > { %5538 = vmatmul.mubr.f32.gmra.mrb[116].mxu0 %v4948_v8  ;;  %5618 = vmatmul.mubr.f32.gmra.mrb[116].mxu1 %v4950_v28  ;;  %v5859_v8 = vld [vmem:[%s9129_s14 + $0x438] sm:$0xff]  ;;  %v5890_v28 = vld [vmem:[%s9129_s14 + $0x530] sm:$0xff] }
 0xdc3   : > { %5542 = vmatprep.mubr.f32.mxu0 %v4953_v49  ;;  %5622 = vmatprep.mubr.f32.mxu1 %v4955_v39  ;;  %v8657_v61 = vpack.c.bf16 %v5859_v8, %v5858_v42  ;;  %v8689_v49 = vpack.c.bf16 %v5891_v23, %v5890_v28  ;;  %v5876_v39 = vld [vmem:[%s9129_s14 + $0x4c0] sm:$0xff]  ;;  %v5882_v33 = vld [vmem:[%s9129_s14 + $0x4f0] sm:$0xff]  ;;  %v5867_v60 = vld [vmem:[%s9129_s14 + $0x478] sm:$0xff] }
 0xdc4   : > { %7096 = vmatpush1.msk.msra.mxu0 %vm1153_vm6, %v5636_v12  ;;  %7101 = vmatpush1.msk.msra.mxu1 %vm1153_vm6, %v5638_v48  ;;  %v5877_v12 = vld [vmem:[%s9129_s14 + $0x4c8] sm:$0xff]  ;;  %v5908_v48 = vld [vmem:[%s9129_s14 + $0x5c0] sm:$0xff]  ;;  %v5914_v37 = vld [vmem:[%s9129_s14 + $0x5f0] sm:$0xff] }
 0xdc5   : > { %8644 = vmatprep.subr.bf16.mxu0 %v8643_v40  ;;  %8676 = vmatprep.subr.bf16.mxu1 %v8675_v41  ;;  %v8661_v40 = vpack.c.bf16 %v5861_v44, %v5860_v53  ;;  %v5878_v41 = vld [vmem:[%s9129_s14 + $0x4d0] sm:$0xff]  ;;  %v6080_v8 = vld [vmem:[%s9119_s12 + $0x68] sm:$0xff] }
 0xdc6   : > { %5543 = vmatmul.mubr.f32.gmra.mrb[118].mxu0 %v4952_v32  ;;  %5623 = vmatmul.mubr.f32.gmra.mrb[118].mxu1 %v4954_v35  ;;  %v8659_v32 = vpack.c.bf16 %v5877_v12, %v5876_v39  ;;  %v5909_v35 = vld [vmem:[%s9129_s14 + $0x5c8] sm:$0xff]  ;;  %v5898_v62 = vld [vmem:[%s9129_s14 + $0x570] sm:$0xff] }
 0xdc7   : > { %5738 = vmatprep.mubr.f32.mxu0 %v8917_v34  ;;  %5821 = vmatprep.mubr.f32.mxu1 %v8917_v34  ;;  %v8691_v36 = vpack.c.bf16 %v5909_v35, %v5908_v48  ;;  %v6084_v28 = vld [vmem:[%s9119_s12 + $0xe8] sm:$0xff] }
 0xdc8   : > { %v8707_v23 = vpack.c.bf16 %v6084_v28, %v6080_v8 }
 0xdca   : > { %7097 = vmatmul.mubr.msk.f32.vlgmr.msra.gmra.mrb[120].mxu0 %vm1143_vm7, %v10110_v43  ;;  %7102 = vmatmul.mubr.msk.f32.vlgmr.msra.gmra.mrb[120].mxu1 %vm1143_vm7, %v10110_v43 }
 0xdcb   : > { %5744 = vmatprep.mubr.f32.mxu0 %v8917_v34  ;;  %5827 = vmatprep.mubr.f32.mxu1 %v8917_v34 }
 0xdcc   : > { %8646 = vmatpush3.bf16.msra.mxu0 %v8645_v50  ;;  %8678 = vmatpush3.bf16.msra.mxu1 %v8677_v14  ;;  %v5879_v50 = vld [vmem:[%s9129_s14 + $0x4d8] sm:$0xff]  ;;  %v5862_v14 = vld [vmem:[%s9129_s14 + $0x450] sm:$0xff] }
 0xdcd   : > { %8648 = vmatprep.subr.bf16.mxu0 %v8647_v56  ;;  %8680 = vmatprep.subr.bf16.mxu1 %v8679_v63  ;;  %v8663_v47 = vpack.c.bf16 %v5879_v50, %v5878_v41  ;;  %v8665_v16 = vpack.c.bf16 %v5863_v9, %v5862_v14  ;;  %v5894_v56 = vld [vmem:[%s9129_s14 + $0x550] sm:$0xff]  ;;  %v5895_v63 = vld [vmem:[%s9129_s14 + $0x558] sm:$0xff] }
 0xdce   : > { %7098 = vmatmul.mubr.msk.f32.gmra.mrb[122].mxu0 %vm1143_vm7, %v10123_v7  ;;  %7103 = vmatmul.mubr.msk.f32.gmra.mrb[122].mxu1 %vm1143_vm7, %v10123_v7  ;;  %v8697_v54 = vpack.c.bf16 %v5895_v63, %v5894_v56 }
 0xdcf   : > { %5750 = vmatprep.mubr.f32.mxu0 %v8917_v34  ;;  %5833 = vmatprep.mubr.f32.mxu1 %v8917_v34 }
 0xdd0   : > { %8650 = vmatpush3.bf16.msra.mxu0 %v8649_v0  ;;  %8682 = vmatpush3.bf16.msra.mxu1 %v8681_v18  ;;  %v5912_v0 = vld [vmem:[%s9129_s14 + $0x5e0] sm:$0xff]  ;;  %v5865_v18 = vld [vmem:[%s9129_s14 + $0x468] sm:$0xff] }
 0xdd1   : > { %8652 = vmatprep.subr.bf16.mxu0 %v8651_v45  ;;  %8684 = vmatprep.subr.bf16.mxu1 %v8683_v57  ;;  %v8699_v45 = vpack.c.bf16 %v5913_v30, %v5912_v0  ;;  %v8669_v52 = vpack.c.bf16 %v5865_v18, %v5864_v58  ;;  %v8701_v57 = vpack.c.bf16 %v5897_v20, %v5896_v19 }
 0xdd2   : > { %7099 = vmatmul.mubr.msk.f32.gmra.mrb[124].mxu0 %vm1143_vm7, %v10138_v6  ;;  %7104 = vmatmul.mubr.msk.f32.gmra.mrb[124].mxu1 %vm1143_vm7, %v10138_v6 }
 0xdd4   : > { %8654 = vmatpush3.bf16.msra.mxu0 %v8653_v38  ;;  %8686 = vmatpush3.bf16.msra.mxu1 %v8685_v27  ;;  %v8671_v38 = vpack.c.bf16 %v5883_v26, %v5882_v33  ;;  %v8703_v27 = vpack.c.bf16 %v5915_v22, %v5914_v37  ;;  %v5640_v33 = vld [vmem:[%s9124_s13 + $0x8] sm:$0xf] }
 0xdd5   : > { %8656 = vmatprep.subr.bf16.mxu0 %v8655_v31  ;;  %8688 = vmatprep.subr.bf16.mxu1 %v8687_v17  ;;  %v8673_v31 = vpack.c.bf16 %v5867_v60, %v5866_v25  ;;  %v5899_v17 = vld [vmem:[%s9129_s14 + $0x578] sm:$0xff]  ;;  %v5645_v60 = vrot.slane %v5640_v33, %v9602_v1  ;;  %v5657_v8 = vrot.slane %v5640_v33, %v9608_v4 }
 0xdd6   : > { %v8705_v42 = vpack.c.bf16 %v5899_v17, %v5898_v62 }
 0xdd8   : > { %8658 = vmatpush3.bf16.msra.mxu0 %v8657_v61  ;;  %8690 = vmatpush3.bf16.msra.mxu1 %v8689_v49  ;;  %v6082_v61 = vld [vmem:[%s9119_s12 + $0x78] sm:$0xff] }
 0xdd9   : > { %8660 = vmatprep.subr.bf16.mxu0 %v8659_v32  ;;  %8692 = vmatprep.subr.bf16.mxu1 %v8691_v36  ;;  %v6086_v49 = vld [vmem:[%s9119_s12 + $0xf8] sm:$0xff] }
 0xdda   : > { %v8711_v39 = vpack.c.bf16 %v6086_v49, %v6082_v61  ;;  %v6079_v49 = vld [vmem:[%s9119_s12 + $0x60] sm:$0xff] }
 0xddc   : > { %8662 = vmatpush3.bf16.msra.mxu0 %v8661_v40  ;;  %8694 = vmatpush3.bf16.msra.mxu1 %v8693_v29 }
 0xddd   : > { %8664 = vmatprep.subr.bf16.mxu0 %v8663_v47  ;;  %8696 = vmatprep.subr.bf16.mxu1 %v8695_v10 }
 0xde0   : > { %8666 = vmatpush3.bf16.msra.mxu0 %v8665_v16  ;;  %8698 = vmatpush3.bf16.msra.mxu1 %v8697_v54 }
 0xde1   : > { %8668 = vmatprep.subr.bf16.mxu0 %v8667_v15  ;;  %8700 = vmatprep.subr.bf16.mxu1 %v8699_v45 }
 0xde4   : > { %8670 = vmatpush3.bf16.msra.mxu0 %v8669_v52  ;;  %8702 = vmatpush3.bf16.msra.mxu1 %v8701_v57 }
 0xde5   : > { %8672 = vmatprep.subr.bf16.mxu0 %v8671_v38  ;;  %8704 = vmatprep.subr.bf16.mxu1 %v8703_v27  ;;  %v5653_v27 = vrot.slane %v5640_v33, %v9604_v2 }
 0xde8   : > { %8674 = vmatpush3.bf16.msra.mxu0 %v8673_v31  ;;  %8706 = vmatpush3.bf16.msra.mxu1 %v8705_v42  ;;  %v5649_v31 = vrot.slane %v5640_v33, %v9606_v3 }
 0xde9   : > { %8708 = vmatprep.subr.bf16.mxu0 %v8707_v23  ;;  %8712 = vmatprep.subr.bf16.mxu1 %v8711_v39 }
 0xe71   : > { %v7583_v12 = vpop.f32.mrb[108].mxu0  ;;  %v7624_v48 = vpop.f32.mrb[108].mxu1 }
 0xe72   : > { %v7584_v32 = vpop.f32.mrb[109].mxu0  ;;  %v7625_v35 = vpop.f32.mrb[109].mxu1 }
 0xe73   : > { %v7585_v53 = vadd.f32 %v7584_v32, %v7583_v12  ;;  %v7626_v44 = vadd.f32 %v7625_v35, %v7624_v48  ;;  %v6083_v35 = vld [vmem:[%s9119_s12 + $0xe0] sm:$0xff] }
 0xe75   : > { %v5455_v36 = vadd.f32 %v7626_v44, %v7585_v53  ;;  %v7586_v40 = vpop.f32.mrb[110].mxu0  ;;  %v7627_v55 = vpop.f32.mrb[110].mxu1  ;;  %v6081_v53 = vld [vmem:[%s9119_s12 + $0x70] sm:$0xff] }
 0xe76   : > { %v7587_v11 = vpop.f32.mrb[111].mxu0  ;;  %v7628_v29 = vpop.f32.mrb[111].mxu1  ;;  %v6085_v44 = vld [vmem:[%s9119_s12 + $0xf0] sm:$0xff] }
 0xe77   : > { %v7588_v41 = vadd.f32 %v7587_v11, %v7586_v40  ;;  %v7629_v50 = vadd.f32 %v7628_v29, %v7627_v55 }
 0xe79   : > { %v5460_v46 = vadd.f32 %v7629_v50, %v7588_v41  ;;  %v7589_v47 = vpop.f32.mrb[112].mxu0  ;;  %v7630_v13 = vpop.f32.mrb[112].mxu1 }
 0xe7a   : > { %v7590_v14 = vpop.f32.mrb[113].mxu0  ;;  %v7631_v9 = vpop.f32.mrb[113].mxu1 }
 0xe7b   : > { %v7591_v10 = vadd.f32 %v7590_v14, %v7589_v47  ;;  %v7632_v16 = vadd.f32 %v7631_v9, %v7630_v13  ;;  %v8713_v47 = vpack.c.bf16 %v6085_v44, %v6081_v53  ;;  %v6319_v13 = vld [vmem:[%s9129_s14 + $0x680] sm:$0xff]  ;;  %v6320_v14 = vld [vmem:[%s9129_s14 + $0x688] sm:$0xff]  ;;  %v6353_v53 = vld [vmem:[%s9129_s14 + $0x790] sm:$0xff] }
 0xe7c   : > { %v8715_v33 = vpack.c.bf16 %v6320_v14, %v6319_v13  ;;  %v6354_v44 = vld [vmem:[%s9129_s14 + $0x798] sm:$0xff]  ;;  %v6323_v13 = vld [vmem:[%s9129_s14 + $0x6a0] sm:$0xff]  ;;  %v6324_v14 = vld [vmem:[%s9129_s14 + $0x6a8] sm:$0xff] }
 0xe7d   : > { %v5465_v56 = vadd.f32 %v7632_v16, %v7591_v10 }
 0xe91   : > { %v7665_v63 = vpop.f32.mrb[114].mxu0  ;;  %v7706_v54 = vpop.f32.mrb[114].mxu1 }
 0xe92   : > { %v7666_v51 = vpop.f32.mrb[115].mxu0  ;;  %v7707_v59 = vpop.f32.mrb[115].mxu1 }
 0xe93   : > { %v7667_v0 = vadd.f32 %v7666_v51, %v7665_v63  ;;  %v7708_v15 = vadd.f32 %v7707_v59, %v7706_v54  ;;  %v6351_v51 = vld [vmem:[%s9129_s14 + $0x780] sm:$0xff]  ;;  %v6352_v59 = vld [vmem:[%s9129_s14 + $0x788] sm:$0xff] }
 0xe95   : > { %v5535_v30 = vadd.f32 %v7667_v0, %v5455_v36  ;;  %v7668_v58 = vpop.f32.mrb[116].mxu0  ;;  %v7709_v18 = vpop.f32.mrb[116].mxu1 }
 0xe96   : > { %v7669_v45 = vpop.f32.mrb[117].mxu0  ;;  %v7710_v52 = vpop.f32.mrb[117].mxu1 }
 0xe97   : > { %v10481_v19 = vadd.f32 %v7708_v15, %v5535_v30  ;;  %v7670_v20 = vadd.f32 %v7669_v45, %v7668_v58  ;;  %v7711_v57 = vadd.f32 %v7710_v52, %v7709_v18  ;;  %v6088_v30 = vld [vmem:[%s9119_s12 + $0x168] sm:$0xf]  ;;  %v6090_v58 = vld [vmem:[%s9119_s12 + $0x178] sm:$0xf] }
 0xe99   : > { %v5540_v26 = vadd.f32 %v7670_v20, %v5460_v46  ;;  %v7671_v37 = vpop.f32.mrb[118].mxu0  ;;  %v7712_v38 = vpop.f32.mrb[118].mxu1  ;;  %v8709_v46 = vpack.c.bf16 %v6083_v35, %v6079_v49  ;;  %v6322_v35 = vld [vmem:[%s9129_s14 + $0x698] sm:$0xff] }
 0xe9a   : > { %v7672_v22 = vpop.f32.mrb[119].mxu0  ;;  %v7713_v25 = vpop.f32.mrb[119].mxu1 }
 0xe9b   : > { %v10487_v62 = vadd.f32 %v7711_v57, %v5540_v26  ;;  %v7673_v17 = vadd.f32 %v7672_v22, %v7671_v37  ;;  %v7714_v42 = vadd.f32 %v7713_v25, %v7712_v38  ;;  %v6087_v57 = vld [vmem:[%s9119_s12 + $0x160] sm:$0xf]  ;;  %v8747_v26 = vpack.c.bf16 %v6352_v59, %v6351_v51 }
 0xe9c   : > { %v8723_v51 = vpack.c.bf16 %v6324_v14, %v6323_v13  ;;  %v6332_v13 = vld [vmem:[%s9129_s14 + $0x6e8] sm:$0xff]  ;;  %v6363_v14 = vld [vmem:[%s9129_s14 + $0x7e0] sm:$0xff] }
 0xe9d   : > { %v5545_v28 = vadd.f32 %v7673_v17, %v5465_v56  ;;  %v5740_v61 = vpop.f32.mrb[120].mxu0  ;;  %v5823_v23 = vpop.f32.mrb[120].mxu1 }
 0xe9e   : > { %v5741_v39 = vadd.f32 %v5740_v61, %v5645_v60  ;;  %v5824_v12 = vadd.f32 %v5823_v23, %v5653_v27  ;;  %v5742_v48 = vpop.f32.mrb[121].mxu0  ;;  %v5825_v32 = vpop.f32.mrb[121].mxu1 }
 0xe9f   : > { %v10494_v36 = vadd.f32 %v7714_v42, %v5545_v28  ;;  %v5743_v40 = vadd.f32 %v5742_v48, %v5649_v31  ;;  %v5826_v55 = vadd.f32 %v5825_v32, %v5657_v8  ;;  %v6089_v28 = vld [vmem:[%s9119_s12 + $0x170] sm:$0xf]  ;;  %v6336_v48 = vld [vmem:[%s9129_s14 + $0x708] sm:$0xff] }
 0xea0   : > { %v5840_v9 = vmax.f32 %v5741_v39, 0.0  ;;  %v5842_v10 = vmax.f32 %v5824_v12, 0.0  ;;  %v6335_v12 = vld [vmem:[%s9129_s14 + $0x700] sm:$0xff]  ;;  %v6321_v32 = vld [vmem:[%s9129_s14 + $0x690] sm:$0xff] }
 0xea1   : > { %v5841_v11 = vmax.f32 %v5743_v40, 0.0  ;;  %v5843_v29 = vmax.f32 %v5826_v55, 0.0  ;;  %v5746_v41 = vpop.f32.mrb[122].mxu0  ;;  %v5829_v50 = vpop.f32.mrb[122].mxu1  ;;  %v8749_v55 = vpack.c.bf16 %v6336_v48, %v6335_v12  ;;  %v6329_v48 = vld [vmem:[%s9129_s14 + $0x6d0] sm:$0xff] }
 0xea2   : > { %v5747_v16 = vadd.f32 %v5746_v41, %v5645_v60  ;;  %v5830_v56 = vadd.f32 %v5829_v50, %v5653_v27  ;;  %v5748_v63 = vpop.f32.mrb[123].mxu0  ;;  %v5831_v54 = vpop.f32.mrb[123].mxu1  ;;  %v8719_v41 = vpack.c.bf16 %v6322_v35, %v6321_v32  ;;  %v8751_v50 = vpack.c.bf16 %v6354_v44, %v6353_v53  ;;  %v6330_v32 = vld [vmem:[%s9129_s14 + $0x6d8] sm:$0xff]  ;;  %v6361_v35 = vld [vmem:[%s9129_s14 + $0x7d0] sm:$0xff] }
 0xea3   : > { %v5749_v0 = vadd.f32 %v5748_v63, %v5649_v31  ;;  %v5832_v15 = vadd.f32 %v5831_v54, %v5657_v8  ;;  %5980 = vmatprep.mubr.f32.mxu0 %v5841_v11  ;;  %6060 = vmatprep.mubr.f32.mxu1 %v5843_v29  ;;  %v6305_v11 = vld [vmem:[%s9129_s14 + $0x610] sm:$0xff]  ;;  %v6306_v29 = vld [vmem:[%s9129_s14 + $0x618] sm:$0xff]  ;;  %v6307_v63 = vld [vmem:[%s9129_s14 + $0x620] sm:$0xff]  ;;  %v8735_v53 = vpack.c.bf16 %v6330_v32, %v6329_v48 }
 0xea4   : > { %5981 = vmatmul.mubr.f32.vlgmr.msra.gmra.mrb[126].mxu0 %v5840_v9  ;;  %6061 = vmatmul.mubr.f32.vlgmr.msra.gmra.mrb[126].mxu1 %v5842_v10  ;;  %v5844_v37 = vmax.f32 %v5747_v16, 0.0  ;;  %v5846_v38 = vmax.f32 %v5830_v56, 0.0  ;;  %v6355_v9 = vld [vmem:[%s9129_s14 + $0x7a0] sm:$0xff]  ;;  %v6356_v10 = vld [vmem:[%s9129_s14 + $0x7a8] sm:$0xff]  ;;  %v8721_v16 = vpack.c.bf16 %v6306_v29, %v6305_v11  ;;  %v6362_v44 = vld [vmem:[%s9129_s14 + $0x7d8] sm:$0xff] }
 0xea5   : > { %v5845_v18 = vmax.f32 %v5749_v0, 0.0  ;;  %v5847_v45 = vmax.f32 %v5832_v15, 0.0  ;;  %v5752_v52 = vpop.f32.mrb[124].mxu0  ;;  %v5835_v20 = vpop.f32.mrb[124].mxu1  ;;  %8710 = vmatpush1.bf16.msra.mxu0 %v8709_v46  ;;  %8714 = vmatpush1.bf16.msra.mxu1 %v8713_v47  ;;  %v6337_v46 = vld [vmem:[%s9129_s14 + $0x710] sm:$0xff]  ;;  %v6338_v47 = vld [vmem:[%s9129_s14 + $0x718] sm:$0xff]  ;;  %v8755_v59 = vpack.c.bf16 %v6356_v10, %v6355_v9  ;;  %v8767_v11 = vpack.c.bf16 %v6362_v44, %v6361_v35 }
 0xea6   : > { %v5753_v22 = vadd.f32 %v5752_v52, %v5645_v60  ;;  %v5836_v25 = vadd.f32 %v5835_v20, %v5653_v27  ;;  %v5754_v17 = vpop.f32.mrb[125].mxu0  ;;  %v5837_v42 = vpop.f32.mrb[125].mxu1  ;;  %7105 = vmatprep.subr.msk.mxu0 %vm1153_vm6, %v6088_v30  ;;  %7110 = vmatprep.subr.msk.mxu1 %vm1153_vm6, %v6090_v58  ;;  %v8753_v56 = vpack.c.bf16 %v6338_v47, %v6337_v46  ;;  %v6308_v54 = vld [vmem:[%s9129_s14 + $0x628] sm:$0xff]  ;;  %v6339_v0 = vld [vmem:[%s9129_s14 + $0x720] sm:$0xff]  ;;  %v6325_v30 = vld [vmem:[%s9129_s14 + $0x6b0] sm:$0xff] }
 0xea7   : > { %v5755_v61 = vadd.f32 %v5754_v17, %v5649_v31  ;;  %v5838_v23 = vadd.f32 %v5837_v42, %v5657_v8  ;;  %5985 = vmatprep.mubr.f32.mxu0 %v5845_v18  ;;  %6065 = vmatprep.mubr.f32.mxu1 %v5847_v45  ;;  %v6303_v31 = vld [vmem:[%s9129_s14 + $0x600] sm:$0xff]  ;;  %v6304_v8 = vld [vmem:[%s9129_s14 + $0x608] sm:$0xff]  ;;  %v6326_v58 = vld [vmem:[%s9129_s14 + $0x6b8] sm:$0xff]  ;;  %v8725_v52 = vpack.c.bf16 %v6308_v54, %v6307_v63 }
 0xea8   : > { %5986 = vmatmul.mubr.f32.gmra.mrb[128].mxu0 %v5844_v37  ;;  %6066 = vmatmul.mubr.f32.gmra.mrb[128].mxu1 %v5846_v38  ;;  %v5848_v49 = vmax.f32 %v5753_v22, 0.0  ;;  %v5850_v39 = vmax.f32 %v5836_v25, 0.0  ;;  %v8717_v40 = vpack.c.bf16 %v6304_v8, %v6303_v31  ;;  %v6340_v15 = vld [vmem:[%s9129_s14 + $0x728] sm:$0xff]  ;;  %v6357_v18 = vld [vmem:[%s9129_s14 + $0x7b0] sm:$0xff]  ;;  %v6358_v45 = vld [vmem:[%s9129_s14 + $0x7b8] sm:$0xff] }
 0xea9   : > { %v5849_v60 = vmax.f32 %v5755_v61, 0.0  ;;  %v5851_v27 = vmax.f32 %v5838_v23, 0.0  ;;  %7106 = vmatpush1.msk.msra.mxu0 %vm1153_vm6, %v6087_v57  ;;  %7111 = vmatpush1.msk.msra.mxu1 %vm1153_vm6, %v6089_v28  ;;  %v8757_v20 = vpack.c.bf16 %v6340_v15, %v6339_v0  ;;  %v8727_v57 = vpack.c.bf16 %v6326_v58, %v6325_v30  ;;  %v6341_v37 = vld [vmem:[%s9129_s14 + $0x730] sm:$0xff]  ;;  %v6342_v22 = vld [vmem:[%s9129_s14 + $0x738] sm:$0xff]  ;;  %v6327_v17 = vld [vmem:[%s9129_s14 + $0x6c0] sm:$0xff] }
 0xeaa   : > { %8716 = vmatprep.subr.bf16.mxu0 %v8715_v33  ;;  %8748 = vmatprep.subr.bf16.mxu1 %v8747_v26  ;;  %v8759_v33 = vpack.c.bf16 %v6358_v45, %v6357_v18  ;;  %v6310_v26 = vld [vmem:[%s9129_s14 + $0x638] sm:$0xff]  ;;  %v8761_v25 = vpack.c.bf16 %v6342_v22, %v6341_v37  ;;  %v6328_v42 = vld [vmem:[%s9129_s14 + $0x6c8] sm:$0xff]  ;;  %v6359_v28 = vld [vmem:[%s9129_s14 + $0x7c0] sm:$0xff] }
 0xeab   : > { %5990 = vmatprep.mubr.f32.mxu0 %v5849_v60  ;;  %6070 = vmatprep.mubr.f32.mxu1 %v5851_v27  ;;  %v8731_v61 = vpack.c.bf16 %v6328_v42, %v6327_v17  ;;  %v6360_v23 = vld [vmem:[%s9129_s14 + $0x7c8] sm:$0xff]  ;;  %v6311_v60 = vld [vmem:[%s9129_s14 + $0x640] sm:$0xff]  ;;  %v6333_v15 = vld [vmem:[%s9129_s14 + $0x6f0] sm:$0xff] }
 0xeac   : > { %5991 = vmatmul.mubr.f32.gmra.mrb[130].mxu0 %v5848_v49  ;;  %6071 = vmatmul.mubr.f32.gmra.mrb[130].mxu1 %v5850_v39  ;;  %v6312_v27 = vld [vmem:[%s9129_s14 + $0x648] sm:$0xff]  ;;  %v8763_v49 = vpack.c.bf16 %v6360_v23, %v6359_v28  ;;  %v6343_v31 = vld [vmem:[%s9129_s14 + $0x740] sm:$0xff]  ;;  %v6334_v30 = vld [vmem:[%s9129_s14 + $0x6f8] sm:$0xff] }
 0xead   : > { %6189 = vmatprep.mubr.f32.mxu0 %v8917_v34  ;;  %6272 = vmatprep.mubr.f32.mxu1 %v8917_v34  ;;  %v8733_v39 = vpack.c.bf16 %v6312_v27, %v6311_v60  ;;  %v6344_v8 = vld [vmem:[%s9129_s14 + $0x748] sm:$0xff]  ;;  %v6331_v47 = vld [vmem:[%s9129_s14 + $0x6e0] sm:$0xff]  ;;  %v6365_v58 = vld [vmem:[%s9129_s14 + $0x7f0] sm:$0xff]  ;;  %v8743_v18 = vpack.c.bf16 %v6334_v30, %v6333_v15 }
 0xeae   : > { %v8765_v12 = vpack.c.bf16 %v6344_v8, %v6343_v31  ;;  %v8739_v9 = vpack.c.bf16 %v6332_v13, %v6331_v47  ;;  %v6364_v10 = vld [vmem:[%s9129_s14 + $0x7e8] sm:$0xff]  ;;  %v6366_v45 = vld [vmem:[%s9129_s14 + $0x7f8] sm:$0xff] }
 0xeaf   : > { %v8771_v63 = vpack.c.bf16 %v6364_v10, %v6363_v14 }
 0xeb0   : > { %7107 = vmatmul.mubr.msk.f32.vlgmr.msra.gmra.mrb[132].mxu0 %vm1143_vm7, %v10110_v43  ;;  %7112 = vmatmul.mubr.msk.f32.vlgmr.msra.gmra.mrb[132].mxu1 %vm1143_vm7, %v10110_v43 }
 0xeb1   : > { %6195 = vmatprep.mubr.f32.mxu0 %v8917_v34  ;;  %6278 = vmatprep.mubr.f32.mxu1 %v8917_v34 }
 0xeb2   : > { %8718 = vmatpush3.bf16.msra.mxu0 %v8717_v40  ;;  %8750 = vmatpush3.bf16.msra.mxu1 %v8749_v55  ;;  %v6313_v40 = vld [vmem:[%s9129_s14 + $0x650] sm:$0xff]  ;;  %v6314_v55 = vld [vmem:[%s9129_s14 + $0x658] sm:$0xff] }
 0xeb3   : > { %8720 = vmatprep.subr.bf16.mxu0 %v8719_v41  ;;  %8752 = vmatprep.subr.bf16.mxu1 %v8751_v50  ;;  %v8737_v29 = vpack.c.bf16 %v6314_v55, %v6313_v40  ;;  %v6345_v41 = vld [vmem:[%s9129_s14 + $0x750] sm:$0xff]  ;;  %v6346_v50 = vld [vmem:[%s9129_s14 + $0x758] sm:$0xff] }
 0xeb4   : > { %7108 = vmatmul.mubr.msk.f32.gmra.mrb[134].mxu0 %vm1143_vm7, %v10123_v7  ;;  %7113 = vmatmul.mubr.msk.f32.gmra.mrb[134].mxu1 %vm1143_vm7, %v10123_v7  ;;  %v8769_v46 = vpack.c.bf16 %v6346_v50, %v6345_v41 }
 0xeb5   : > { %6201 = vmatprep.mubr.f32.mxu0 %v8917_v34  ;;  %6284 = vmatprep.mubr.f32.mxu1 %v8917_v34  ;;  %v6309_v34 = vld [vmem:[%s9129_s14 + $0x630] sm:$0xff] }
 0xeb6   : > { %8722 = vmatpush3.bf16.msra.mxu0 %v8721_v16  ;;  %8754 = vmatpush3.bf16.msra.mxu1 %v8753_v56  ;;  %v8729_v38 = vpack.c.bf16 %v6310_v26, %v6309_v34  ;;  %v6315_v16 = vld [vmem:[%s9129_s14 + $0x660] sm:$0xff]  ;;  %v6316_v56 = vld [vmem:[%s9129_s14 + $0x668] sm:$0xff]  ;;  %v6349_v34 = vld [vmem:[%s9129_s14 + $0x770] sm:$0xff] }
 0xeb7   : > { %8724 = vmatprep.subr.bf16.mxu0 %v8723_v51  ;;  %8756 = vmatprep.subr.bf16.mxu1 %v8755_v59  ;;  %v8741_v54 = vpack.c.bf16 %v6316_v56, %v6315_v16  ;;  %v6347_v51 = vld [vmem:[%s9129_s14 + $0x760] sm:$0xff]  ;;  %v6348_v59 = vld [vmem:[%s9129_s14 + $0x768] sm:$0xff]  ;;  %v6350_v26 = vld [vmem:[%s9129_s14 + $0x778] sm:$0xff] }
 0xeb8   : > { %7109 = vmatmul.mubr.msk.f32.gmra.mrb[136].mxu0 %vm1143_vm7, %v10138_v6  ;;  %7114 = vmatmul.mubr.msk.f32.gmra.mrb[136].mxu1 %vm1143_vm7, %v10138_v6  ;;  %v8773_v0 = vpack.c.bf16 %v6348_v59, %v6347_v51  ;;  %v8777_v37 = vpack.c.bf16 %v6350_v26, %v6349_v34 }
 0xeba   : > { %8726 = vmatpush3.bf16.msra.mxu0 %v8725_v52  ;;  %8758 = vmatpush3.bf16.msra.mxu1 %v8757_v20  ;;  %v6317_v52 = vld [vmem:[%s9129_s14 + $0x670] sm:$0xff]  ;;  %v6318_v20 = vld [vmem:[%s9129_s14 + $0x678] sm:$0xff] }
 0xebb   : > { %8728 = vmatprep.subr.bf16.mxu0 %v8727_v57  ;;  %8760 = vmatprep.subr.bf16.mxu1 %v8759_v33  ;;  %v8775_v57 = vpack.c.bf16 %v6366_v45, %v6365_v58  ;;  %v8745_v33 = vpack.c.bf16 %v6318_v20, %v6317_v52 }
 0xebe   : > { %8730 = vmatpush3.bf16.msra.mxu0 %v8729_v38  ;;  %8762 = vmatpush3.bf16.msra.mxu1 %v8761_v25 }
 0xebf   : > { %8732 = vmatprep.subr.bf16.mxu0 %v8731_v61  ;;  %8764 = vmatprep.subr.bf16.mxu1 %v8763_v49 }
 0xec2   : > { %8734 = vmatpush3.bf16.msra.mxu0 %v8733_v39  ;;  %8766 = vmatpush3.bf16.msra.mxu1 %v8765_v12  ;;  %v6091_v12 = vld [vmem:[%s9124_s13 + $0xc] sm:$0xf] }
 0xec3   : > { %8736 = vmatprep.subr.bf16.mxu0 %v8735_v53  ;;  %8768 = vmatprep.subr.bf16.mxu1 %v8767_v11  ;;  %v6096_v40 = vrot.slane %v6091_v12, %v9602_v1  ;;  %v6104_v55 = vrot.slane %v6091_v12, %v9604_v2  ;;  %v6100_v11 = vrot.slane %v6091_v12, %v9606_v3 }
 0xec4   : > { %v6108_v50 = vrot.slane %v6091_v12, %v9608_v4 }
 0xec6   : > { %8738 = vmatpush3.bf16.msra.mxu0 %v8737_v29  ;;  %8770 = vmatpush3.bf16.msra.mxu1 %v8769_v46 }
 0xec7   : > { %8740 = vmatprep.subr.bf16.mxu0 %v8739_v9  ;;  %8772 = vmatprep.subr.bf16.mxu1 %v8771_v63 }
 0xeca   : > { %8742 = vmatpush3.bf16.msra.mxu0 %v8741_v54  ;;  %8774 = vmatpush3.bf16.msra.mxu1 %v8773_v0 }
 0xecb   : > { %8744 = vmatprep.subr.bf16.mxu0 %v8743_v18  ;;  %8776 = vmatprep.subr.bf16.mxu1 %v8775_v57 }
 0xece   : > { %8746 = vmatpush3.bf16.msra.mxu0 %v8745_v33  ;;  %8778 = vmatpush3.bf16.msra.mxu1 %v8777_v37 }
 0xf77   : > { %v7747_v38 = vpop.f32.mrb[126].mxu0  ;;  %v7788_v22 = vpop.f32.mrb[126].mxu1 }
 0xf78   : > { %v7748_v25 = vpop.f32.mrb[127].mxu0  ;;  %v7789_v17 = vpop.f32.mrb[127].mxu1 }
 0xf79   : > { %v7749_v42 = vadd.f32 %v7748_v25, %v7747_v38  ;;  %v7790_v28 = vadd.f32 %v7789_v17, %v7788_v22 }
 0xf7b   : > { %v6063_v61 = vadd.f32 %v7790_v28, %v7749_v42  ;;  %v7750_v23 = vpop.f32.mrb[128].mxu0  ;;  %v7791_v60 = vpop.f32.mrb[128].mxu1 }
 0xf7c   : > { %v7751_v27 = vpop.f32.mrb[129].mxu0  ;;  %v7792_v49 = vpop.f32.mrb[129].mxu1 }
 0xf7d   : > { %v10587_v39 = vadd.f32 %v6063_v61, %v10481_v19  ;;  %v7752_v31 = vadd.f32 %v7751_v27, %v7750_v23  ;;  %v7793_v8 = vadd.f32 %v7792_v49, %v7791_v60  ;;  %v4106_v23 = vpop.xlane.xlu0 %4105 }
 0xf7f   : > { %v6068_v48 = vadd.f32 %v7793_v8, %v7752_v31  ;;  %v7753_v32 = vpop.f32.mrb[130].mxu0  ;;  %v7794_v35 = vpop.f32.mrb[130].mxu1 }
 0xf80   : > { %v7754_v53 = vpop.f32.mrb[131].mxu0  ;;  %v7795_v44 = vpop.f32.mrb[131].mxu1 }
 0xf81   : > { %v10594_v29 = vadd.f32 %v6068_v48, %v10487_v62  ;;  %v7755_v41 = vadd.f32 %v7754_v53, %v7753_v32  ;;  %v7796_v19 = vadd.f32 %v7795_v44, %v7794_v35 }
 0xf83   : > { %v6073_v46 = vadd.f32 %v7796_v19, %v7755_v41  ;;  %v6191_v47 = vpop.f32.mrb[132].mxu0  ;;  %v6274_v13 = vpop.f32.mrb[132].mxu1  ;;  %v4113_v41 = vmul.f32 0.05, %v4106_v23 }
 0xf84   : > { %v6192_v14 = vadd.f32 %v6191_v47, %v6096_v40  ;;  %v6275_v9 = vadd.f32 %v6274_v13, %v6104_v55  ;;  %v6193_v10 = vpop.f32.mrb[133].mxu0  ;;  %v6276_v16 = vpop.f32.mrb[133].mxu1 }
 0xf85   : > { %v10598_v1 = vadd.f32 %v6073_v46, %v10494_v36  ;;  %v6194_v2 = vadd.f32 %v6193_v10, %v6100_v11  ;;  %v6277_v56 = vadd.f32 %v6276_v16, %v6108_v50  ;;  %v4109_v19 = vpop.xlane.xlu1 %4108 }
 0xf86   : > { %v6291_v51 = vmax.f32 %v6192_v14, 0.0  ;;  %v6293_v59 = vmax.f32 %v6275_v9, 0.0  ;;  %v8876_v14 = vld [vmem:[%s9135_s15] ss:$0 sm:$0xff] }
 0xf87   : > { %v6292_v3 = vmax.f32 %v6194_v2, 0.0  ;;  %v6294_v63 = vmax.f32 %v6277_v56, 0.0  ;;  %v6197_v62 = vpop.f32.mrb[134].mxu0  ;;  %v6280_v54 = vpop.f32.mrb[134].mxu1 }
 0xf88   : > { %v6198_v0 = vadd.f32 %v6197_v62, %v6096_v40  ;;  %v6281_v4 = vadd.f32 %v6280_v54, %v6104_v55  ;;  %v6199_v15 = vpop.f32.mrb[135].mxu0  ;;  %v6282_v30 = vpop.f32.mrb[135].mxu1  ;;  %v4114_v62 = vmul.f32 0.05, %v4109_v19 }
 0xf89   : > { %v6200_v58 = vadd.f32 %v6199_v15, %v6100_v11  ;;  %v6283_v18 = vadd.f32 %v6282_v30, %v6108_v50  ;;  %6431 = vmatprep.mubr.f32.mxu0 %v6292_v3  ;;  %6511 = vmatprep.mubr.f32.mxu1 %v6294_v63 }
 0xf8a   : > { %6432 = vmatmul.mubr.f32.vlgmr.msra.gmra.mrb[138].mxu0 %v6291_v51  ;;  %6512 = vmatmul.mubr.f32.vlgmr.msra.gmra.mrb[138].mxu1 %v6293_v59  ;;  %v6295_v57 = vmax.f32 %v6198_v0, 0.0  ;;  %v6297_v33 = vmax.f32 %v6281_v4, 0.0 }
 0xf8b   : > { %v6296_v36 = vmax.f32 %v6200_v58, 0.0  ;;  %v6298_v45 = vmax.f32 %v6283_v18, 0.0  ;;  %v6203_v52 = vpop.f32.mrb[136].mxu0  ;;  %v6286_v20 = vpop.f32.mrb[136].mxu1 }
 0xf8c   : > { %v6204_v34 = vadd.f32 %v6203_v52, %v6096_v40  ;;  %v6287_v26 = vadd.f32 %v6286_v20, %v6104_v55  ;;  %v6205_v37 = vpop.f32.mrb[137].mxu0  ;;  %v6288_v38 = vpop.f32.mrb[137].mxu1 }
 0xf8d   : > { %v6206_v22 = vadd.f32 %v6205_v37, %v6100_v11  ;;  %v6289_v25 = vadd.f32 %v6288_v38, %v6108_v50  ;;  %6436 = vmatprep.mubr.f32.mxu0 %v6296_v36  ;;  %6516 = vmatprep.mubr.f32.mxu1 %v6298_v45  ;;  %v4112_v50 = vpop.xlane.xlu0 %4111 }
 0xf8e   : > { %6437 = vmatmul.mubr.f32.gmra.mrb[140].mxu0 %v6295_v57  ;;  %6517 = vmatmul.mubr.f32.gmra.mrb[140].mxu1 %v6297_v33  ;;  %v6299_v28 = vmax.f32 %v6204_v34, 0.0  ;;  %v6301_v61 = vmax.f32 %v6287_v26, 0.0  ;;  %v4115_v54 = vmul.f32 0.05, %v4112_v50 }
 0xf8f   : > { %v6300_v17 = vmax.f32 %v6206_v22, 0.0  ;;  %v6302_v42 = vmax.f32 %v6289_v25, 0.0 }
 0xf90   : > { %v4118_v58 = vsub.f32 %v10077_v24, %v4115_v54 }
 0xf91   : > { %6441 = vmatprep.mubr.f32.mxu0 %v6300_v17  ;;  %6521 = vmatprep.mubr.f32.mxu1 %v6302_v42 }
 0xf92   : > { %6442 = vmatmul.mubr.f32.gmra.mrb[142].mxu0 %v6299_v28  ;;  %6522 = vmatmul.mubr.f32.gmra.mrb[142].mxu1 %v6301_v61  ;;  %v4121_v20 = vmul.f32 %v4118_v58, %v4118_v58 }
0x105d   : > { %v7829_v60 = vpop.f32.mrb[138].mxu0  ;;  %v7870_v27 = vpop.f32.mrb[138].mxu1 }
0x105e   : > { %v7830_v49 = vpop.f32.mrb[139].mxu0  ;;  %v7871_v31 = vpop.f32.mrb[139].mxu1 }
0x105f   : > { %v7831_v8 = vadd.f32 %v7830_v49, %v7829_v60  ;;  %v7872_v12 = vadd.f32 %v7871_v31, %v7870_v27 }
0x1061   : > { %v6514_v48 = vadd.f32 %v7872_v12, %v7831_v8  ;;  %v7832_v32 = vpop.f32.mrb[140].mxu0  ;;  %v7873_v35 = vpop.f32.mrb[140].mxu1 }
0x1062   : > { %v7833_v53 = vpop.f32.mrb[141].mxu0  ;;  %v7874_v44 = vpop.f32.mrb[141].mxu1 }
0x1063   : > { %v6527_v40 = vadd.f32 %v6514_v48, %v10587_v39  ;;  %v7834_v55 = vadd.f32 %v7833_v53, %v7832_v32  ;;  %v7875_v11 = vadd.f32 %v7874_v44, %v7873_v35  ;;  %v4116_v39 = vsub.f32 %v10061_v5, %v4113_v41  ;;  %v7053_v53 = vld [vmem:[%s963_s7] ss:$0 sm:$0xff]  ;;  %s10764_s7 = sld [smem:[#allocation29_spill]] (!%p7115_p5) }
0x1065   : > { %v6519_v46 = vadd.f32 %v7875_v11, %v7834_v55  ;;  %v7835_v47 = vpop.f32.mrb[142].mxu0  ;;  %v7876_v13 = vpop.f32.mrb[142].mxu1  ;;  %v6530_v9 = vadd.f32 %v8876_v14, %v6527_v40  ;;  %v4119_v30 = vmul.f32 %v4116_v39, %v4116_v39  ;;  %v7054_v40 = vld [vmem:[%s966_s4] ss:$0 sm:$0xff] }
0x1066   : > { %v7836_v10 = vpop.f32.mrb[143].mxu0  ;;  %v7877_v16 = vpop.f32.mrb[143].mxu1 }
0x1067   : > { %v6528_v2 = vadd.f32 %v6519_v46, %v10594_v29  ;;  %v7837_v56 = vadd.f32 %v7836_v10, %v7835_v47  ;;  %v7878_v3 = vadd.f32 %v7877_v16, %v7876_v13  ;;  %v6533_v63 = vadd.f32 %v6530_v9, %v10110_v43 }
0x1068   : > { %v4117_v29 = vsub.f32 %v10074_v21, %v4114_v62  ;;  %v4122_v45 = vsel %vm1143_vm7, %v4119_v30, 0.0  ;;  %v4128_v21 = vsel %vm1242_vm8, %v4121_v20, 0.0  ;;  %v8919_v20 = vmov (!%p7115_p5), 0.0|0.0  }
0x1069   : > { %v6524_v51 = vadd.f32 %v7878_v3, %v7837_v56  ;;  %v6536_v59 = vsel %vm1143_vm7, %v6533_v63, 0.0  ;;  %v6531_v0 = vadd.f32 %v8876_v14, %v6528_v2  ;;  %8779 = vmatprep.subr.bf16.mxu0 (!%p7115_p5), %v8919_v20  ;;  %8782 = vmatprep.subr.bf16.mxu1 (!%p7115_p5), %v8919_v20 }
0x106a   : > { %6537 = vadd.xlane.f32.xlu1 %v6536_v59  ;;  %v4120_v52 = vmul.f32 %v4117_v29, %v4117_v29 }
0x106b   : > { %v6529_v4 = vadd.f32 %v6524_v51, %v10598_v1  ;;  %v6534_v15 = vadd.f32 %v6531_v0, %v10123_v7 }
0x106c   : > { %v4125_v7 = vsel %vm1143_vm7, %v4120_v52, 0.0  ;;  %v6589_v52 = vld [vmem:[%s10764_s7 + $0x8] sm:$0xff] (!%p7115_p5) }
0x106d   : > { %v6539_v43 = vsel %vm1143_vm7, %v6534_v15, 0.0  ;;  %v6532_v18 = vadd.f32 %v8876_v14, %v6529_v4 }
0x106e   : > { %6540 = vadd.xlane.f32.xlu0 %v6539_v43 }
0x106f   : > { %v6535_v5 = vadd.f32 %v6532_v18, %v10138_v6 }
0x1071   : > { %v6542_v36 = vsel %vm1242_vm8, %v6535_v5, 0.0 }
0x1072   : > { %6543 = vadd.xlane.f32.xlu1 %v6542_v36  ;;  %4123 = vadd.xlane.f32.xlu0 %v4122_v45  ;;  %v6588_v45 = vld [vmem:[%s10764_s7] sm:$0xff] (!%p7115_p5) }
0x1076   : > { %4126 = vadd.xlane.f32.xlu1 %v4125_v7  ;;  %4129 = vadd.xlane.f32.xlu0 %v4128_v21  ;;  %v8780_v7 = vpack.c.bf16 (!%p7115_p5), %v6589_v52, %v6588_v45  ;;  %v8921_v21 = vmov (!%p7115_p5), 0.0  }
0x1077   : > { %8135 = vmatprep.mubr.msk.f32.mxu0 (!%p7115_p5), %vm8920_vm13, %v8921_v21  ;;  %8144 = vmatprep.mubr.msk.f32.mxu1 (!%p7115_p5), %vm8920_vm13, %v8921_v21 }
0x1078   : > { %8781 = vmatpush3.bf16.msra.mxu0 (!%p7115_p5), %v8780_v7  ;;  %8784 = vmatpush3.bf16.msra.mxu1 (!%p7115_p5), %v8780_v7 }
0x1079   : > { %8133 = vmatprep.subr.mxu0 (!%p7115_p5), %v8921_v21  ;;  %8142 = vmatprep.subr.mxu1 (!%p7115_p5), %v8921_v21 }
0x10f7   : > { %v6538_v24 = vpop.xlane.xlu1 %6537 }
0x10f8   : > { %v6545_v1 = vmul.f32 0.05, %v6538_v24  ;;  %v6590_v24 = vld [vmem:[%s10764_s7 + $0x10] sm:$0xf] (!%p7115_p5) }
0x10f9   : > { %8134 = vmatpush3.msk.msra.mxu0 (!%p7115_p5), %vm1153_vm6, %v6590_v24  ;;  %8143 = vmatpush3.msk.msra.mxu1 (!%p7115_p5), %vm1153_vm6, %v6590_v24 }
0x10fa   : > { %v6548_v57 = vsub.f32 %v6533_v63, %v6545_v1 }
0x10fb   : > { %v6541_v33 = vpop.xlane.xlu0 %6540 }
0x10fc   : > { %v6546_v34 = vmul.f32 0.05, %v6541_v33  ;;  %v6551_v6 = vmul.f32 %v6548_v57, %v6548_v57  ;;  %v6591_v33 = vld [vmem:[%s10765_s22] sm:$0x1] (!%p7115_p5) }
0x10fe   : > { %v6549_v26 = vsub.f32 %v6534_v15, %v6546_v34  ;;  %v6554_v37 = vsel %vm1143_vm7, %v6551_v6, 0.0 }
0x10ff   : > { %6555 = vadd.xlane.f32.xlu1 %v6554_v37  ;;  %v6544_v38 = vpop.xlane.xlu1 %6543  ;;  %v4124_v22 = vpop.xlane.xlu0 %4123 }
0x1100   : > { %v6547_v25 = vmul.f32 0.05, %v6544_v38  ;;  %v4131_v17 = vmul.f32 0.05, %v4124_v22  ;;  %v6552_v42 = vmul.f32 %v6549_v26, %v6549_v26 }
0x1102   : > { %v6550_v28 = vsub.f32 %v6535_v5, %v6547_v25  ;;  %v4134_v61 = vadd.f32 1e-05, %v4131_v17  ;;  %v6557_v23 = vsel %vm1143_vm7, %v6552_v42, 0.0 }
0x1103   : > { %v4127_v60 = vpop.xlane.xlu1 %4126  ;;  %6558 = vadd.xlane.f32.xlu0 %v6557_v23  ;;  %v4130_v27 = vpop.xlane.xlu0 %4129 }
0x1104   : > { %8859 = vrsqrt.f32 %v4134_v61  ;;  %v4132_v49 = vmul.f32 0.05, %v4127_v60  ;;  %v4133_v31 = vmul.f32 0.05, %v4130_v27  ;;  %v6553_v8 = vmul.f32 %v6550_v28, %v6550_v28 }
0x1106   : > { %v4135_v12 = vadd.f32 1e-05, %v4132_v49  ;;  %v4136_v48 = vadd.f32 1e-05, %v4133_v31  ;;  %v6560_v32 = vsel %vm1242_vm8, %v6553_v8, 0.0 }
0x1107   : > { %6561 = vadd.xlane.f32.xlu1 %v6560_v32 }
0x1108   : > { %8861 = vrsqrt.f32 %v4135_v12 }
0x1109   : > { %8863 = vrsqrt.f32 %v4136_v48 }
0x110e   : > { %v8860_v35 = vpop.eup %8859 }
0x110f   : > { %v4140_v44 = vmul.f32 %v8860_v35, %v4116_v39 }
0x1111   : > { %v4149_v55 = vmul.f32 %v7053_v53, %v4140_v44 }
0x1112   : > { %v8862_v11 = vpop.eup %8861 }
0x1113   : > { %v8864_v41 = vpop.eup %8863  ;;  %v4158_v19 = vadd.f32 %v7054_v40, %v4149_v55  ;;  %v4141_v50 = vmul.f32 %v8862_v11, %v4117_v29 }
0x1114   : > { %v4142_v46 = vmul.f32 %v8864_v41, %v4118_v58 }
0x1115   : > { %4161 = vst.msk [vmem:[#allocation2] sm:$0xff] %vm1143_vm7, %v4158_v19  ;;  %v4150_v47 = vmul.f32 %v7053_v53, %v4141_v50 }
0x1116   : > { %v4151_v13 = vmul.f32 %v7053_v53, %v4142_v46 }
0x1117   : > { %v4159_v14 = vadd.f32 %v7054_v40, %v4150_v47 }
0x1118   : > { %v4160_v9 = vadd.f32 %v7054_v40, %v4151_v13 }
0x1119   : > { %4162 = vst.msk [vmem:[#allocation2 + $0x8] sm:$0xff] %vm1143_vm7, %v4159_v14 }
0x111a   : > { %4163 = vst.msk [vmem:[#allocation2 + $0x10] sm:$0x1] %vm1242_vm8, %v4160_v9 }
0x111c   : > { %v6592_v1 = vld [vmem:[#allocation2] sm:$0x1] (!%p7115_p5) }
0x111d   : > { %8136 = vmatmul.mubr.msk.f32.vlgmr.msra.gmra.mrb[0].mxu0 (!%p7115_p5), %vm1143_vm7, %v6592_v1 }
0x118c   : > { %v6556_v10 = vpop.xlane.xlu1 %6555 }
0x118d   : > { %v6563_v16 = vmul.f32 0.05, %v6556_v10 }
0x118f   : > { %v6566_v2 = vadd.f32 1e-05, %v6563_v16 }
0x1190   : > { %v6559_v56 = vpop.xlane.xlu0 %6558 }
0x1191   : > { %8865 = vrsqrt.f32 %v6566_v2  ;;  %v6564_v3 = vmul.f32 0.05, %v6559_v56 }
0x1193   : > { %v6567_v63 = vadd.f32 1e-05, %v6564_v3 }
0x1194   : > { %v6562_v39 = vpop.xlane.xlu1 %6561 }
0x1195   : > { %8867 = vrsqrt.f32 %v6567_v63  ;;  %v6565_v62 = vmul.f32 0.05, %v6562_v39 }
0x1197   : > { %v6568_v54 = vadd.f32 1e-05, %v6565_v62 }
0x1199   : > { %8869 = vrsqrt.f32 %v6568_v54 }
0x119b   : > { %v8866_v51 = vpop.eup %8865 }
0x119c   : > { %v6572_v59 = vmul.f32 %v8866_v51, %v6548_v57 }
0x119e   : > { %v6575_v0 = vmul.f32 %v7053_v53, %v6572_v59 }
0x119f   : > { %v8868_v4 = vpop.eup %8867 }
0x11a0   : > { %v6578_v15 = vadd.f32 %v7054_v40, %v6575_v0  ;;  %v6573_v30 = vmul.f32 %v8868_v4, %v6549_v26 }
0x11a2   : > { %6581 = vst.msk [vmem:[#allocation2 + $0x18] sm:$0xff] %vm1143_vm7, %v6578_v15  ;;  %v6576_v29 = vmul.f32 %v7053_v53, %v6573_v30 }
0x11a3   : > { %v8870_v58 = vpop.eup %8869 }
0x11a4   : > { %v6579_v43 = vadd.f32 %v7054_v40, %v6576_v29  ;;  %v6574_v18 = vmul.f32 %v8870_v58, %v6550_v28  ;;  %6587 = sbr.rel (%p7115_p5) target bundleno = 4737 (0x1281), region = 124 }
0x11a6   : > { %6582 = vst.msk [vmem:[#allocation2 + $0x20] sm:$0xff] %vm1143_vm7, %v6579_v43  ;;  %v6577_v5 = vmul.f32 %v7053_v53, %v6574_v18 }
0x11a8   : > { %v6580_v36 = vadd.f32 %v7054_v40, %v6577_v5 }
0x11a9   : > { %v6671_v57 = vld [vmem:[#allocation2 + $0x18] sm:$0x1] (!%p7115_p5) }
0x11aa   : > { %6583 = vst.msk [vmem:[#allocation2 + $0x28] sm:$0x1] %vm1242_vm8, %v6580_v36  ;;  %8145 = vmatmul.mubr.msk.f32.vlgmr.msra.gmra.mrb[0].mxu1 (!%p7115_p5), %vm1143_vm7, %v6671_v57 }
0x11f0   : > { %v6665_v34 = vpop.f32.mrb[0].mxu0 }
0x11f1   : > { %v6666_v26 = vadd.f32 %v6665_v34, %v6591_v33  ;;  %v8137_v38 = vpop.f32.mrb[1].mxu0 }
0x11f3   : > { %6670 = vst.msk [vmem:[#allocation6] sm:$0x1] %vm6669_vm14, %v6666_v26 }
0x127d   : > { %v6741_v6 = vpop.f32.mrb[0].mxu1 }
0x127e   : > { %v6742_v37 = vadd.f32 %v6741_v6, %v6591_v33  ;;  %v8146_v22 = vpop.f32.mrb[1].mxu1 }
0x1280   : > { %6745 = vst.msk [vmem:[#allocation6 + $0x1] sm:$0x1] %vm6669_vm14, %v6742_v37 }
0x1281 PF: > { %s10766_s29 = sld [smem:[#allocation10_spill]]  ;;  %s8922_s28 = smov [#allocation6]  }
0x1282   : > { %s6753_s25 = sshll.u32 %s8922_s28, 4  ;;  %s6754_s25 = int_to_ptr.vmem [resolvable:$true] %s6753_s25 }
0x1283   : > { %s8877_s16 = scalar_lea.vmem %s6754_s25, 32  ;;  %p8884_p10 = scmp.lt.s32.totalorder %s6754_s25, %s6754_s25 }
0x1284   : > { %p8878_p7 = scmp.ne.s32.totalorder %s6754_s25, %s8877_s16  ;;  %p8885_p11 = scmp.lt.s32.totalorder %s8877_s16, %s8877_s16 }
0x1286   : > { %p8886_p12 = por %p8885_p11, %p8884_p10 }
0x1287   : > { %p8793_p6 = scmp.eq.s32.totalorder %s10766_s29, 5 }
0x1289   : > { %p8879_p8 = pnand %p8878_p7, %p8793_p6 }
0x128b   : > { %p8880_p9 = pneg %p8879_p8 }
0x128d   : > { %p8887_p13 = pnand %p8886_p12, %p8880_p9 }
0x128f   : > { %8890 = shalt.err (!%p8887_p13)
}
0x1290   : > { %s10767_s13 = sld [smem:[#allocation31_spill]] }
0x1296   : > { %s8891_s14 = scalar_lea.hbm %s10767_s13, 32 }
0x1297   : > { %p8892_p0 = scmp.ne.s32.totalorder %s10767_s13, %s8891_s14  ;;  %p8897_p3 = scmp.lt.u32.totalorder %s8891_s14, %s10767_s13 }
0x1299   : > { %p8893_p1 = pnand %p8892_p0, %p8793_p6 }
0x129b   : > { %p8894_p2 = pneg %p8893_p1 }
0x129d   : > { %p8899_p4 = pnand %p8897_p3, %p8894_p2 }
0x129f   : > { %8902 = shalt.err (!%p8899_p4)
}
0x12a0   : > { %8790 = dma.vmem_to_hbm [thread:$0]  (%p8793_p6), %s6754_s25, 32, %s10767_s13, [#allocation7]  }
0x12a1   : > { %8908 = dma.done.wait (%p8793_p6), [#allocation7], 32  }
0x12a2   : > { %8910 = vsyncadd (%p8793_p6), [#allocation7], 4294967264 }
0x12a3 PF: > { %s10768_s10 = sld [smem:[#allocation9_spill]] }
0x12a9   : > { %s35_s5 = sadd.s32 1, %s10768_s10  }
0x12aa   : > { %p32_p5 = scmp.ge.s32.totalorder %s35_s5, 8  }
0x12ac   :  { %34 = sbr.rel (!%p32_p5) target bundleno = 21 (0x15), region = 201 }
0x12b3   :  { %6766 = vsyncpa [#allocation7], 1 }
0x12b4   :  { %6768 = vsyncpa [#allocation7 + $0x1], 1 }

</bundles_post_ra>
